<compile_context>
chip_gen: v5e
topology: v5e:2x2
jax: 0.10.0
libtpu: 0.0.40
codegen_flags: <defaults>
</compile_context>

<pallas_src>
import jax
import jax.numpy as jnp
from jax.experimental import pallas as pl
from jax.experimental.pallas import tpu as pltpu


def _round_up(x, m):
    return ((x + m - 1) // m) * m


def _vmem_limit_bytes():
    """~75% of physical VMEM (48 MiB on v7x, ~96 MiB on v5e/v6e)."""
    try:
        cap = pltpu.get_tpu_info().vmem_capacity_bytes
    except Exception:
        cap = 64 * 1024 * 1024
    return min(int(cap * 3 // 4), 112 * 1024 * 1024)


def bottleneck_kernel(x_ref, w1_ref, b1_ref, w2_ref, b2_ref, w3_ref, b3_ref,
                      o_ref, mid_ref):
    # x_ref   : (1, H, W, Cp)     f32   input tile (one batch element)
    # w1_ref  : (Cp, Cw)          bf16  1x1 conv1 weight (BN1 scale folded)
    # w2_ref  : (3, 3*Cw, Cw)     bf16  3x3 conv2 weight, kh-grouped im2col,
    #                                    rows ordered (kw, cin), BN2 folded
    # w3_ref  : (Cw, Cp)          bf16  1x1 conv3 weight (BN3 scale folded)
    # b*_ref  : (1, C)            f32   folded (eval-mode) BN bias
    # o_ref   : (1, H, W, Cp)     f32
    # mid_ref : (H+2, W+2, Cw)    bf16  scratch: y1 with a 1-pixel zero halo
    _, H, W, Cp = x_ref.shape
    Cw = w1_ref.shape[1]

    # ---- conv1 (1x1) + bn1 + relu : one MXU matmul, K = Cp ----
    acc1 = jnp.dot(x_ref[...].reshape(H * W, Cp).astype(jnp.bfloat16),
                   w1_ref[...], preferred_element_type=jnp.float32)
    y1 = jnp.maximum(acc1 + b1_ref[...], 0.0)                 # (H*W, Cw) f32

    # ---- stage y1 (bf16) into halo scratch: zero only the halo ring ----
    mid_ref[0:1, :, :] = jnp.zeros((1, W + 2, Cw), jnp.bfloat16)
    mid_ref[H + 1:H + 2, :, :] = jnp.zeros((1, W + 2, Cw), jnp.bfloat16)
    mid_ref[:, 0:1, :] = jnp.zeros((H + 2, 1, Cw), jnp.bfloat16)
    mid_ref[:, W + 1:W + 2, :] = jnp.zeros((H + 2, 1, Cw), jnp.bfloat16)
    mid_ref[1:H + 1, 1:W + 1, :] = y1.reshape(H, W, Cw).astype(jnp.bfloat16)

    # ---- conv2 (3x3, pad 1): 3 kh-grouped accumulated dots, K = 3*Cw ----
    acc2 = jnp.zeros((H * W, Cw), jnp.float32)
    for kh in range(3):
        taps = jnp.concatenate(
            [mid_ref[kh:kh + H, kw:kw + W, :] for kw in range(3)],
            axis=-1)                                           # (H, W, 3*Cw) bf16
        acc2 = acc2 + jnp.dot(taps.reshape(H * W, 3 * Cw), w2_ref[kh],
                              preferred_element_type=jnp.float32)
    y2 = jnp.maximum(acc2 + b2_ref[...], 0.0)                  # (H*W, Cw) f32

    # ---- conv3 (1x1) + bn3 + residual add + relu ----
    acc3 = jnp.dot(y2.astype(jnp.bfloat16), w3_ref[...],
                   preferred_element_type=jnp.float32)
    out = acc3 + b3_ref[...] + x_ref[...].reshape(H * W, Cp)   # re-read x here
    o_ref[...] = jnp.maximum(out, 0.0).reshape(1, H, W, Cp).astype(o_ref.dtype)


def bottleneck_forward(x_nchw, w1_oihw, bn1, w2_oihw, bn2, w3_oihw, bn3,
                       eps=1e-5):
    """Bottleneck forward (stride=1, groups=1, no downsample). NCHW in/out."""
    N, Cin, H, W = x_nchw.shape
    width = w1_oihw.shape[0]
    Cout = w3_oihw.shape[0]
    assert Cin == Cout, "no-downsample Bottleneck needs inplanes == 4*planes"

    Cp = _round_up(Cin, 128)      # padded residual / in / out channels
    Cw = _round_up(width, 128)    # padded bottleneck width

    # NCHW -> NHWC, zero-pad channels to the lane width (multiple of 128).
    x = jnp.transpose(x_nchw, (0, 2, 3, 1)).astype(jnp.float32)
    x = jnp.pad(x, ((0, 0), (0, 0), (0, 0), (0, Cp - Cin)))

    def fold_bn(p, cpad):
        gamma, beta, mean, var = p
        scale = gamma * jax.lax.rsqrt(var + eps)
        bias = beta - mean * scale
        scale = jnp.pad(scale, (0, cpad - scale.shape[0])).astype(jnp.float32)
        bias = jnp.pad(bias, (0, cpad - bias.shape[0]))
        return scale, bias.reshape(1, cpad).astype(jnp.float32)

    s1, b1 = fold_bn(bn1, Cw)
    s2, b2 = fold_bn(bn2, Cw)
    s3, b3 = fold_bn(bn3, Cp)

    # conv1 1x1: OIHW (width, Cin, 1, 1) -> (Cin, width), pad, fold s1, bf16.
    w1 = jnp.transpose(w1_oihw[:, :, 0, 0], (1, 0))
    w1 = (jnp.pad(w1, ((0, Cp - Cin), (0, Cw - width))) * s1[None, :]
          ).astype(jnp.bfloat16)

    # conv2 3x3: OIHW -> (kh, kw, in, out) -> fold s2 -> (3, 3*Cw, Cw), bf16.
    w2 = jnp.transpose(w2_oihw, (2, 3, 1, 0))                  # (3,3,in,out)
    w2 = jnp.pad(w2, ((0, 0), (0, 0), (0, Cw - width), (0, Cw - width)))
    w2 = (w2 * s2[None, None, None, :]).reshape(3, 3 * Cw, Cw
                                                ).astype(jnp.bfloat16)

    # conv3 1x1: (Cout, width, 1, 1) -> (width, Cout), pad, fold s3, bf16.
    w3 = jnp.transpose(w3_oihw[:, :, 0, 0], (1, 0))
    w3 = (jnp.pad(w3, ((0, Cw - width), (0, Cp - Cout))) * s3[None, :]
          ).astype(jnp.bfloat16)

    out_nhwc = pl.pallas_call(
        bottleneck_kernel,
        out_shape=jax.ShapeDtypeStruct((N, H, W, Cp), jnp.float32),
        grid_spec=pltpu.PrefetchScalarGridSpec(
            num_scalar_prefetch=0,
            grid=(N,),
            in_specs=[
                pl.BlockSpec((1, H, W, Cp), lambda n: (n, 0, 0, 0)),
                pl.BlockSpec((Cp, Cw), lambda n: (0, 0)),
                pl.BlockSpec((1, Cw), lambda n: (0, 0)),
                pl.BlockSpec((3, 3 * Cw, Cw), lambda n: (0, 0, 0)),
                pl.BlockSpec((1, Cw), lambda n: (0, 0)),
                pl.BlockSpec((Cw, Cp), lambda n: (0, 0)),
                pl.BlockSpec((1, Cp), lambda n: (0, 0)),
            ],
            out_specs=pl.BlockSpec((1, H, W, Cp), lambda n: (n, 0, 0, 0)),
            scratch_shapes=[pltpu.VMEM((H + 2, W + 2, Cw), jnp.bfloat16)],
        ),
        compiler_params=pltpu.CompilerParams(
            dimension_semantics=("parallel",),
            vmem_limit_bytes=_vmem_limit_bytes()),
    )(x, w1, b1, w2, b2, w3, b3)

    # Drop channel padding, NHWC -> NCHW.
    return jnp.transpose(out_nhwc[..., :Cout], (0, 3, 1, 2))


def _ref_forward(x, w1, bn1, w2, bn2, w3, bn3, eps=1e-5):
    """Pure-JAX reference (matches torch Bottleneck with eval-mode BN)."""
    def conv(x, w, pad):
        return jax.lax.conv_general_dilated(
            x, w, window_strides=(1, 1), padding=((pad, pad), (pad, pad)),
            dimension_numbers=("NCHW", "OIHW", "NCHW"))

    def bn(x, p):
        g, b, m, v = p
        s = g / jnp.sqrt(v + eps)
        return x * s[None, :, None, None] + (b - m * s)[None, :, None, None]

    out = jax.nn.relu(bn(conv(x, w1, 0), bn1))
    out = jax.nn.relu(bn(conv(out, w2, 1), bn2))
    out = bn(conv(out, w3, 0), bn3)
    return jax.nn.relu(out + x)


if __name__ == "__main__":
    # Bottleneck(inplanes=16, planes=4): width=4, out=16, stride=1, no
    # downsample -> identity residual is valid.
    N, H, W = 2, 16, 16
    planes = 4
    width = planes                  # groups=1, base_width=64
    Cin = Cout = planes * 4         # expansion = 4

    key = jax.random.PRNGKey(0)
    ks = jax.random.split(key, 8)

    x = jax.random.normal(ks[0], (N, Cin, H, W), jnp.float32)

    w1 = jax.random.normal(ks[1], (width, Cin, 1, 1), jnp.float32) * 0.1
    w2 = jax.random.normal(ks[2], (width, width, 3, 3), jnp.float32) * 0.1
    w3 = jax.random.normal(ks[3], (Cout, width, 1, 1), jnp.float32) * 0.1

    def rand_bn(k, c):
        k1, k2, k3, k4 = jax.random.split(k, 4)
        return (jax.random.uniform(k1, (c,), minval=0.5, maxval=1.5),   # gamma
                jax.random.normal(k2, (c,)) * 0.1,                      # beta
                jax.random.normal(k3, (c,)) * 0.1,                      # mean
                jax.random.uniform(k4, (c,), minval=0.5, maxval=1.5))   # var

    bn1 = rand_bn(ks[4], width)
    bn2 = rand_bn(ks[5], width)
    bn3 = rand_bn(ks[6], Cout)

    out = bottleneck_forward(x, w1, bn1, w2, bn2, w3, bn3)
    out = jax.block_until_ready(out)

    ref = _ref_forward(x, w1, bn1, w2, bn2, w3, bn3)
    assert out.shape == (N, Cout, H, W)
    err = jnp.max(jnp.abs(out - ref))
    # bf16 MXU operands -> looser tolerance than a pure-f32 kernel.
    assert err < 5e-2, f"max abs err {err}"

    print("KERNEL_OK")
</pallas_src>

<mosaic_0001>
module attributes {stable_mosaic.version = 11 : i64} {
  func.func @bottleneck_kernel(%arg0: i32, %arg1: memref<1x16x16x128xf32, #tpu.memory_space<vmem>>, %arg2: memref<128x128xbf16, #tpu.memory_space<vmem>>, %arg3: memref<1x128xf32, #tpu.memory_space<vmem>>, %arg4: memref<3x384x128xbf16, #tpu.memory_space<vmem>>, %arg5: memref<1x128xf32, #tpu.memory_space<vmem>>, %arg6: memref<128x128xbf16, #tpu.memory_space<vmem>>, %arg7: memref<1x128xf32, #tpu.memory_space<vmem>>, %arg8: memref<1x16x16x128xf32, #tpu.memory_space<vmem>>, %arg9: memref<18x18x128xbf16, #tpu.memory_space<vmem>>) attributes {dimension_semantics = [#tpu.dimension_semantics<parallel>], iteration_bounds = array<i64: 2>, scalar_prefetch = 0 : i64, scratch_operands = 1 : i64, tpu.core_type = #tpu.core_type<tc>, window_params = [{transform_indices = @transform_0, window_bounds = array<i64: 1, 16, 16, 128>}, {pipeline_mode = #tpu.pipeline_mode<synchronous>, transform_indices = @transform_1, window_bounds = array<i64: 128, 128>}, {pipeline_mode = #tpu.pipeline_mode<synchronous>, transform_indices = @transform_2, window_bounds = array<i64: 1, 128>}, {pipeline_mode = #tpu.pipeline_mode<synchronous>, transform_indices = @transform_3, window_bounds = array<i64: 3, 384, 128>}, {pipeline_mode = #tpu.pipeline_mode<synchronous>, transform_indices = @transform_4, window_bounds = array<i64: 1, 128>}, {pipeline_mode = #tpu.pipeline_mode<synchronous>, transform_indices = @transform_5, window_bounds = array<i64: 128, 128>}, {pipeline_mode = #tpu.pipeline_mode<synchronous>, transform_indices = @transform_6, window_bounds = array<i64: 1, 128>}, {transform_indices = @transform_7, window_bounds = array<i64: 1, 16, 16, 128>}]} {
    %c0 = arith.constant 0 : index
    %c0_0 = arith.constant 0 : index
    %c0_1 = arith.constant 0 : index
    %c0_2 = arith.constant 0 : index
    %0 = vector.load %arg1[%c0, %c0_0, %c0_1, %c0_2] : memref<1x16x16x128xf32, #tpu.memory_space<vmem>>, vector<1x16x16x128xf32>
    %1 = vector.shape_cast %0 : vector<1x16x16x128xf32> to vector<256x128xf32>
    %2 = arith.truncf %1 : vector<256x128xf32> to vector<256x128xbf16>
    %c0_3 = arith.constant 0 : index
    %c0_4 = arith.constant 0 : index
    %3 = vector.load %arg2[%c0_3, %c0_4] : memref<128x128xbf16, #tpu.memory_space<vmem>>, vector<128x128xbf16>
    %cst = arith.constant dense<0.000000e+00> : vector<256x128xf32>
    %4 = tpu.matmul %2, %3, %cst {dimension_numbers = #tpu.dot_dimension_numbers<[1], [0], [0], [1], [0, 0, 1, 1], [], []>} : vector<256x128xbf16>, vector<128x128xbf16>, vector<256x128xf32> -> vector<256x128xf32>
    %c0_5 = arith.constant 0 : index
    %c0_6 = arith.constant 0 : index
    %5 = vector.load %arg3[%c0_5, %c0_6] : memref<1x128xf32, #tpu.memory_space<vmem>>, vector<1x128xf32>
    %6 = vector.broadcast %5 : vector<1x128xf32> to vector<256x128xf32>
    %7 = arith.addf %4, %6 : vector<256x128xf32>
    %cst_7 = arith.constant 0.000000e+00 : f32
    %8 = vector.broadcast %cst_7 : f32 to vector<256x128xf32>
    %9 = arith.maximumf %7, %8 : vector<256x128xf32>
    %cst_8 = arith.constant 0.000000e+00 : bf16
    %10 = vector.broadcast %cst_8 : bf16 to vector<1x18x128xbf16>
    %c0_9 = arith.constant 0 : index
    %c0_10 = arith.constant 0 : index
    %c0_11 = arith.constant 0 : index
    %11 = vector.load %arg9[%c0_9, %c0_10, %c0_11] : memref<18x18x128xbf16, #tpu.memory_space<vmem>>, vector<1x18x128xbf16>
    tpu.vector_store %arg9[%c0_9, %c0_10, %c0_11], %10 {strides = array<i32>} : memref<18x18x128xbf16, #tpu.memory_space<vmem>>, vector<1x18x128xbf16>,
    %cst_12 = arith.constant 0.000000e+00 : bf16
    %12 = vector.broadcast %cst_12 : bf16 to vector<1x18x128xbf16>
    %c17 = arith.constant 17 : index
    %c0_13 = arith.constant 0 : index
    %c0_14 = arith.constant 0 : index
    %13 = vector.load %arg9[%c17, %c0_13, %c0_14] : memref<18x18x128xbf16, #tpu.memory_space<vmem>>, vector<1x18x128xbf16>
    tpu.vector_store %arg9[%c17, %c0_13, %c0_14], %12 {strides = array<i32>} : memref<18x18x128xbf16, #tpu.memory_space<vmem>>, vector<1x18x128xbf16>,
    %cst_15 = arith.constant 0.000000e+00 : bf16
    %14 = vector.broadcast %cst_15 : bf16 to vector<18x1x128xbf16>
    %c0_16 = arith.constant 0 : index
    %c0_17 = arith.constant 0 : index
    %c0_18 = arith.constant 0 : index
    %15 = vector.load %arg9[%c0_16, %c0_17, %c0_18] : memref<18x18x128xbf16, #tpu.memory_space<vmem>>, vector<18x1x128xbf16>
    tpu.vector_store %arg9[%c0_16, %c0_17, %c0_18], %14 {strides = array<i32>} : memref<18x18x128xbf16, #tpu.memory_space<vmem>>, vector<18x1x128xbf16>,
    %cst_19 = arith.constant 0.000000e+00 : bf16
    %16 = vector.broadcast %cst_19 : bf16 to vector<18x1x128xbf16>
    %c0_20 = arith.constant 0 : index
    %c17_21 = arith.constant 17 : index
    %c0_22 = arith.constant 0 : index
    %17 = vector.load %arg9[%c0_20, %c17_21, %c0_22] : memref<18x18x128xbf16, #tpu.memory_space<vmem>>, vector<18x1x128xbf16>
    tpu.vector_store %arg9[%c0_20, %c17_21, %c0_22], %16 {strides = array<i32>} : memref<18x18x128xbf16, #tpu.memory_space<vmem>>, vector<18x1x128xbf16>,
    %18 = vector.shape_cast %9 : vector<256x128xf32> to vector<16x16x128xf32>
    %19 = arith.truncf %18 : vector<16x16x128xf32> to vector<16x16x128xbf16>
    %c1 = arith.constant 1 : index
    %c1_23 = arith.constant 1 : index
    %c0_24 = arith.constant 0 : index
    %20 = vector.load %arg9[%c1, %c1_23, %c0_24] : memref<18x18x128xbf16, #tpu.memory_space<vmem>>, vector<16x16x128xbf16>
    tpu.vector_store %arg9[%c1, %c1_23, %c0_24], %19 {strides = array<i32>} : memref<18x18x128xbf16, #tpu.memory_space<vmem>>, vector<16x16x128xbf16>,
    %cst_25 = arith.constant 0.000000e+00 : f32
    %21 = vector.broadcast %cst_25 : f32 to vector<256x128xf32>
    %c0_26 = arith.constant 0 : index
    %c0_27 = arith.constant 0 : index
    %c0_28 = arith.constant 0 : index
    %22 = vector.load %arg9[%c0_26, %c0_27, %c0_28] : memref<18x18x128xbf16, #tpu.memory_space<vmem>>, vector<16x16x128xbf16>
    %c0_29 = arith.constant 0 : index
    %c1_30 = arith.constant 1 : index
    %c0_31 = arith.constant 0 : index
    %23 = vector.load %arg9[%c0_29, %c1_30, %c0_31] : memref<18x18x128xbf16, #tpu.memory_space<vmem>>, vector<16x16x128xbf16>
    %c0_32 = arith.constant 0 : index
    %c2 = arith.constant 2 : index
    %c0_33 = arith.constant 0 : index
    %24 = vector.load %arg9[%c0_32, %c2, %c0_33] : memref<18x18x128xbf16, #tpu.memory_space<vmem>>, vector<16x16x128xbf16>
    %25 = tpu.concatenate %22, %23, %24 in 2 : vector<16x16x128xbf16>, vector<16x16x128xbf16>, vector<16x16x128xbf16> -> vector<16x16x384xbf16>
    %26 = vector.shape_cast %25 : vector<16x16x384xbf16> to vector<256x384xbf16>
    %c0_34 = arith.constant 0 : index
    %c0_35 = arith.constant 0 : index
    %c0_36 = arith.constant 0 : index
    %27 = vector.load %arg4[%c0_34, %c0_35, %c0_36] : memref<3x384x128xbf16, #tpu.memory_space<vmem>>, vector<1x384x128xbf16>
    %28 = vector.shape_cast %27 : vector<1x384x128xbf16> to vector<384x128xbf16>
    %cst_37 = arith.constant dense<0.000000e+00> : vector<256x128xf32>
    %29 = tpu.matmul %26, %28, %cst_37 {dimension_numbers = #tpu.dot_dimension_numbers<[1], [0], [0], [1], [0, 0, 1, 1], [], []>} : vector<256x384xbf16>, vector<384x128xbf16>, vector<256x128xf32> -> vector<256x128xf32>
    %30 = arith.addf %21, %29 : vector<256x128xf32>
    %c1_38 = arith.constant 1 : index
    %c0_39 = arith.constant 0 : index
    %c0_40 = arith.constant 0 : index
    %31 = vector.load %arg9[%c1_38, %c0_39, %c0_40] : memref<18x18x128xbf16, #tpu.memory_space<vmem>>, vector<16x16x128xbf16>
    %c1_41 = arith.constant 1 : index
    %c1_42 = arith.constant 1 : index
    %c0_43 = arith.constant 0 : index
    %32 = vector.load %arg9[%c1_41, %c1_42, %c0_43] : memref<18x18x128xbf16, #tpu.memory_space<vmem>>, vector<16x16x128xbf16>
    %c1_44 = arith.constant 1 : index
    %c2_45 = arith.constant 2 : index
    %c0_46 = arith.constant 0 : index
    %33 = vector.load %arg9[%c1_44, %c2_45, %c0_46] : memref<18x18x128xbf16, #tpu.memory_space<vmem>>, vector<16x16x128xbf16>
    %34 = tpu.concatenate %31, %32, %33 in 2 : vector<16x16x128xbf16>, vector<16x16x128xbf16>, vector<16x16x128xbf16> -> vector<16x16x384xbf16>
    %35 = vector.shape_cast %34 : vector<16x16x384xbf16> to vector<256x384xbf16>
    %c1_47 = arith.constant 1 : index
    %c0_48 = arith.constant 0 : index
    %c0_49 = arith.constant 0 : index
    %36 = vector.load %arg4[%c1_47, %c0_48, %c0_49] : memref<3x384x128xbf16, #tpu.memory_space<vmem>>, vector<1x384x128xbf16>
    %37 = vector.shape_cast %36 : vector<1x384x128xbf16> to vector<384x128xbf16>
    %cst_50 = arith.constant dense<0.000000e+00> : vector<256x128xf32>
    %38 = tpu.matmul %35, %37, %cst_50 {dimension_numbers = #tpu.dot_dimension_numbers<[1], [0], [0], [1], [0, 0, 1, 1], [], []>} : vector<256x384xbf16>, vector<384x128xbf16>, vector<256x128xf32> -> vector<256x128xf32>
    %39 = arith.addf %30, %38 : vector<256x128xf32>
    %c2_51 = arith.constant 2 : index
    %c0_52 = arith.constant 0 : index
    %c0_53 = arith.constant 0 : index
    %40 = vector.load %arg9[%c2_51, %c0_52, %c0_53] : memref<18x18x128xbf16, #tpu.memory_space<vmem>>, vector<16x16x128xbf16>
    %c2_54 = arith.constant 2 : index
    %c1_55 = arith.constant 1 : index
    %c0_56 = arith.constant 0 : index
    %41 = vector.load %arg9[%c2_54, %c1_55, %c0_56] : memref<18x18x128xbf16, #tpu.memory_space<vmem>>, vector<16x16x128xbf16>
    %c2_57 = arith.constant 2 : index
    %c2_58 = arith.constant 2 : index
    %c0_59 = arith.constant 0 : index
    %42 = vector.load %arg9[%c2_57, %c2_58, %c0_59] : memref<18x18x128xbf16, #tpu.memory_space<vmem>>, vector<16x16x128xbf16>
    %43 = tpu.concatenate %40, %41, %42 in 2 : vector<16x16x128xbf16>, vector<16x16x128xbf16>, vector<16x16x128xbf16> -> vector<16x16x384xbf16>
    %44 = vector.shape_cast %43 : vector<16x16x384xbf16> to vector<256x384xbf16>
    %c2_60 = arith.constant 2 : index
    %c0_61 = arith.constant 0 : index
    %c0_62 = arith.constant 0 : index
    %45 = vector.load %arg4[%c2_60, %c0_61, %c0_62] : memref<3x384x128xbf16, #tpu.memory_space<vmem>>, vector<1x384x128xbf16>
    %46 = vector.shape_cast %45 : vector<1x384x128xbf16> to vector<384x128xbf16>
    %cst_63 = arith.constant dense<0.000000e+00> : vector<256x128xf32>
    %47 = tpu.matmul %44, %46, %cst_63 {dimension_numbers = #tpu.dot_dimension_numbers<[1], [0], [0], [1], [0, 0, 1, 1], [], []>} : vector<256x384xbf16>, vector<384x128xbf16>, vector<256x128xf32> -> vector<256x128xf32>
    %48 = arith.addf %39, %47 : vector<256x128xf32>
    %c0_64 = arith.constant 0 : index
    %c0_65 = arith.constant 0 : index
    %49 = vector.load %arg5[%c0_64, %c0_65] : memref<1x128xf32, #tpu.memory_space<vmem>>, vector<1x128xf32>
    %50 = vector.broadcast %49 : vector<1x128xf32> to vector<256x128xf32>
    %51 = arith.addf %48, %50 : vector<256x128xf32>
    %cst_66 = arith.constant 0.000000e+00 : f32
    %52 = vector.broadcast %cst_66 : f32 to vector<256x128xf32>
    %53 = arith.maximumf %51, %52 : vector<256x128xf32>
    %54 = arith.truncf %53 : vector<256x128xf32> to vector<256x128xbf16>
    %c0_67 = arith.constant 0 : index
    %c0_68 = arith.constant 0 : index
    %55 = vector.load %arg6[%c0_67, %c0_68] : memref<128x128xbf16, #tpu.memory_space<vmem>>, vector<128x128xbf16>
    %cst_69 = arith.constant dense<0.000000e+00> : vector<256x128xf32>
    %56 = tpu.matmul %54, %55, %cst_69 {dimension_numbers = #tpu.dot_dimension_numbers<[1], [0], [0], [1], [0, 0, 1, 1], [], []>} : vector<256x128xbf16>, vector<128x128xbf16>, vector<256x128xf32> -> vector<256x128xf32>
    %c0_70 = arith.constant 0 : index
    %c0_71 = arith.constant 0 : index
    %57 = vector.load %arg7[%c0_70, %c0_71] : memref<1x128xf32, #tpu.memory_space<vmem>>, vector<1x128xf32>
    %58 = vector.broadcast %57 : vector<1x128xf32> to vector<256x128xf32>
    %59 = arith.addf %56, %58 : vector<256x128xf32>
    %c0_72 = arith.constant 0 : index
    %c0_73 = arith.constant 0 : index
    %c0_74 = arith.constant 0 : index
    %c0_75 = arith.constant 0 : index
    %60 = vector.load %arg1[%c0_72, %c0_73, %c0_74, %c0_75] : memref<1x16x16x128xf32, #tpu.memory_space<vmem>>, vector<1x16x16x128xf32>
    %61 = vector.shape_cast %60 : vector<1x16x16x128xf32> to vector<256x128xf32>
    %62 = arith.addf %59, %61 : vector<256x128xf32>
    %cst_76 = arith.constant 0.000000e+00 : f32
    %63 = vector.broadcast %cst_76 : f32 to vector<256x128xf32>
    %64 = arith.maximumf %62, %63 : vector<256x128xf32>
    %65 = vector.shape_cast %64 : vector<256x128xf32> to vector<1x16x16x128xf32>
    %c0_77 = arith.constant 0 : index
    %c0_78 = arith.constant 0 : index
    %c0_79 = arith.constant 0 : index
    %c0_80 = arith.constant 0 : index
    %66 = vector.load %arg8[%c0_77, %c0_78, %c0_79, %c0_80] : memref<1x16x16x128xf32, #tpu.memory_space<vmem>>, vector<1x16x16x128xf32>
    tpu.vector_store %arg8[%c0_77, %c0_78, %c0_79, %c0_80], %65 {strides = array<i32>} : memref<1x16x16x128xf32, #tpu.memory_space<vmem>>, vector<1x16x16x128xf32>,
    return
  }
  func.func @transform_0(%arg0: i32) -> (i32, i32, i32, i32) {
    %c0_i32 = arith.constant 0 : i32
    %c0_i32_0 = arith.constant 0 : i32
    %c0_i32_1 = arith.constant 0 : i32
    %c0_i32_2 = arith.constant 0 : i32
    return %arg0, %c0_i32, %c0_i32_0, %c0_i32_1 : i32, i32, i32, i32
  }
  func.func @transform_1(%arg0: i32) -> (i32, i32) {
    %c0_i32 = arith.constant 0 : i32
    %c0_i32_0 = arith.constant 0 : i32
    %c0_i32_1 = arith.constant 0 : i32
    return %c0_i32, %c0_i32_0 : i32, i32
  }
  func.func @transform_2(%arg0: i32) -> (i32, i32) {
    %c0_i32 = arith.constant 0 : i32
    %c0_i32_0 = arith.constant 0 : i32
    %c0_i32_1 = arith.constant 0 : i32
    return %c0_i32, %c0_i32_0 : i32, i32
  }
  func.func @transform_3(%arg0: i32) -> (i32, i32, i32) {
    %c0_i32 = arith.constant 0 : i32
    %c0_i32_0 = arith.constant 0 : i32
    %c0_i32_1 = arith.constant 0 : i32
    %c0_i32_2 = arith.constant 0 : i32
    return %c0_i32, %c0_i32_0, %c0_i32_1 : i32, i32, i32
  }
  func.func @transform_4(%arg0: i32) -> (i32, i32) {
    %c0_i32 = arith.constant 0 : i32
    %c0_i32_0 = arith.constant 0 : i32
    %c0_i32_1 = arith.constant 0 : i32
    return %c0_i32, %c0_i32_0 : i32, i32
  }
  func.func @transform_5(%arg0: i32) -> (i32, i32) {
    %c0_i32 = arith.constant 0 : i32
    %c0_i32_0 = arith.constant 0 : i32
    %c0_i32_1 = arith.constant 0 : i32
    return %c0_i32, %c0_i32_0 : i32, i32
  }
  func.func @transform_6(%arg0: i32) -> (i32, i32) {
    %c0_i32 = arith.constant 0 : i32
    %c0_i32_0 = arith.constant 0 : i32
    %c0_i32_1 = arith.constant 0 : i32
    return %c0_i32, %c0_i32_0 : i32, i32
  }
  func.func @transform_7(%arg0: i32) -> (i32, i32, i32, i32) {
    %c0_i32 = arith.constant 0 : i32
    %c0_i32_0 = arith.constant 0 : i32
    %c0_i32_1 = arith.constant 0 : i32
    %c0_i32_2 = arith.constant 0 : i32
    return %arg0, %c0_i32, %c0_i32_0, %c0_i32_1 : i32, i32, i32, i32
  }
}

</mosaic_0001>

<bundles_post_ra>
// kernel: tpu_custom_call.1
= control target key start
LH: loop header
LB: loop body
LE: loop exit
PB: predicated region body
PF: predicated region fallthrough
CT: control target
= control target key end

     0   :  { %s7464_s0 = inlined_call_operand.hbm [shape: f32[2,16,16,128], index: 0, kind: input, shape index: {}]   ;;  %s7465_s1 = inlined_call_operand.hbm [shape: bf16[128,128], index: 1, kind: input, shape index: {}]   ;;  %s7466_s2 = inlined_call_operand.vmem [shape: f32[1,128], index: 2, kind: input, shape index: {}]   ;;  %s7467_s3 = inlined_call_operand.hbm [shape: bf16[3,384,128], index: 3, kind: input, shape index: {}]   ;;  %s7468_s4 = inlined_call_operand.vmem [shape: f32[1,128], index: 4, kind: input, shape index: {}]   ;;  %s7469_s5 = inlined_call_operand.hbm [shape: bf16[128,128], index: 5, kind: input, shape index: {}]   ;;  %s7470_s6 = inlined_call_operand.vmem [shape: f32[1,128], index: 6, kind: input, shape index: {}]   ;;  %s7471_s7 = inlined_call_operand.hbm [shape: f32[2,16,16,128], index: 7, kind: output, shape index: {}]  }
   0x1   :  { %7497 = sst [smem:[#allocation64_spill]] %s7465_s1 }
   0x2   :  { %12 = vsyncpa [#allocation4], 0 }
   0x3   :  { %14 = vsyncpa [#allocation4 + $0x1], 0 }
   0x4   :  { %15 = vsyncpa [#allocation7], 0 }
   0x5   :  { %16 = vsyncpa [#allocation10], 0 }
   0x6   :  { %17 = vsyncpa [#allocation5], 0 }
   0x7   :  { %19 = vsyncpa [#allocation5 + $0x1], 0  ;;  %s5740_s24 = smov 0   ;;  %s5742_s25 = smov 0  }
   0x8   :  { %s5744_s26 = smov 0   ;;  %s5746_s27 = smov 0  }
   0x9 LB: > { %s5761_s28 = sadd.s32 4294967295, %s5688_s27   ;;  %s4661_s29 = sadd.s32 4294967294, %s5688_s27   ;;  %s5688_s27 = sphi %s5746_s27, %s7659_s27   ;;  %s5684_s26 = sphi %s5744_s26, %s7658_s26   ;;  %s5680_s25 = sphi %s5742_s25, %s7657_s25   ;;  %s5676_s24 = sphi %s5740_s24, %s7656_s24  }
   0xa   : > { %p45_p0 = scmp.ne.s32.totalorder %s5680_s25, %s5676_s24  ;;  %p46_p1 = scmp.eq.s32.totalorder %s5761_s28, 0 }
   0xb   : > { %p195_p2 = scmp.eq.s32.totalorder %s5761_s28, 1  ;;  %p201_p3 = scmp.eq.s32.totalorder %s4661_s29, 1 }
   0xc   : > { %p5770_p4 = por %p46_p1, %p45_p0  ;;  %p4662_p5 = scmp.ge.s32.totalorder %s5688_s27, 1 }
   0xd   : > { %p5775_p6 = por %p201_p3, %p45_p0  ;;  %p208_p7 = scmp.lt.s32.totalorder %s5688_s27, 3 }
   0xe   : > { %s7500_s1 = sld [smem:[#allocation64_spill]]  ;;  %s5690_s13 = smov [#allocation6]  }
   0xf   : > { %p5783_p8 = pnand %p4662_p5, %p208_p7  ;;  %s221_s14 = sshll.u32 %s5690_s13, 4  ;;  %s222_s14 = int_to_ptr.vmem [resolvable:$true] %s221_s14 }
  0x10   : > { %s236_s18 = sshll.u32 %s7467_s3, 4  ;;  %s5691_s19 = smov 64   ;;  %s237_s18 = int_to_ptr.hbm [resolvable:$true] %s236_s18 }
  0x11   : > { %p5353_p9 = pneg %p5783_p8  ;;  %s5692_s20 = smov 4  }
  0x12   : > { %s5693_s21 = smov [#allocation8]   ;;  %s253_s9 = sshll.u32 %s7469_s5, 4  ;;  %s254_s9 = int_to_ptr.hbm [resolvable:$true] %s253_s9 }
  0x13   : > { %p5791_p10 = pnand %p5353_p9, %p46_p1  ;;  %s238_s22 = sshll.u32 %s5693_s21, 4  ;;  %s239_s22 = int_to_ptr.vmem [resolvable:$true] %s238_s22 }
  0x14   : > { %s219_s11 = sshll.u32 %s7500_s1, 4  ;;  %s5694_s10 = smov [#allocation9]   ;;  %s220_s11 = int_to_ptr.hbm [resolvable:$true] %s219_s11 }
  0x15   : > { %5356 = dma.hbm_to_vmem [thread:$0]  (!%p5791_p10), %s220_s11, 1024, %s222_s14, [#allocation7], %s5691_s19, %s5691_s19, %s5692_s20  }
  0x16   : > { %5359 = dma.hbm_to_vmem [thread:$0]  (!%p5791_p10), %s237_s18, 9216, %s239_s22, [#allocation7], %s5691_s19, %s5691_s19, %s5692_s20  }
  0x17   : > { %s255_s13 = sshll.u32 %s5694_s10, 4  ;;  %s5807_s11 = sadd.s32 1, %s5688_s27   ;;  %s256_s13 = int_to_ptr.vmem [resolvable:$true] %s255_s13 }
  0x18   : > { %5362 = dma.hbm_to_vmem [thread:$0]  (!%p5791_p10), %s254_s9, 1024, %s256_s13, [#allocation10], %s5691_s19, %s5691_s19, %s5692_s20  }
  0x19   : > { %s29_s14 = ssub.s32 %s5688_s27, %s5807_s11  ;;  %s32_s16 = sadd.s32 1, %s5684_s26 }
  0x1a   : > { %p30_p12 = scmp.eq.s32.totalorder %s29_s14, 0  ;;  %p39_p13 = scmp.ne.s32.totalorder %s5684_s26, %s5680_s25 }
  0x1b   : > { %p40_p0 = scmp.eq.s32.totalorder %s5688_s27, 0  ;;  %p5374_p3 = scmp.lt.s32.totalorder %s5688_s27, 2 }
  0x1c   : > { %s5819_s17 = scalar_select %p30_p12, %s5684_s26, %s32_s16  }
  0x1d   : > { %p41_p5 = por %p40_p0, %p39_p13  ;;  %p5823_p7 = por %p195_p2, %p39_p13 }
  0x1e   : > { %s272_s21 = sand.u32 1, %s5684_s26   ;;  %s5033_s22 = sshll.u32 %s5688_s27, 8 }
  0x1f   : > { %s4667_s15 = sshll.u32 %s272_s21, 8  ;;  %s281_s20 = scalar_lea.hbm %s7464_s0, %s5033_s22 }
  0x20   : > { %s282_s29 = sshll.u32 %s281_s20, 4  ;;  %s276_s9 = scalar_lea.vmem [#allocation3], %s4667_s15  ;;  %s283_s29 = int_to_ptr.hbm [resolvable:$true] %s282_s29 }
  0x21   : > { %s284_s10 = sshll.u32 %s276_s9, 4  ;;  %p5834_p9 = pnand %p5374_p3, %p41_p5  ;;  %s285_s10 = int_to_ptr.vmem [resolvable:$true] %s284_s10 }
  0x22   : > { %s273_s14 = scalar_lea.sflag [#allocation4], %s272_s21  ;;  %s5578_s16 = sshra.s32 %s283_s29, 4  ;;  %s5579_s16 = int_to_ptr.hbm [resolvable:$true] %s5578_s16 }
  0x23   : > { %s5580_s1 = scalar_lea.hbm %s5579_s16, 256  ;;  %p5582_p10 = pneg %p5834_p9 }
  0x24   : > { %p5581_p2 = scmp.ne.s32.totalorder %s5579_s16, %s5580_s1  ;;  %s5585_s23 = scalar_lea.hbm %s7464_s0, 512 }
  0x25   : > { %p5586_p0 = scmp.lt.s32.totalorder %s5579_s16, %s7464_s0  ;;  %p5587_p3 = scmp.lt.s32.totalorder %s5585_s23, %s5580_s1 }
  0x26   : > { %p5583_p12 = pnand %p5582_p10, %p5581_p2 }
  0x27   : > { %p5588_p5 = por %p5587_p3, %p5586_p0 }
  0x28   : > { %p5584_p13 = pneg %p5583_p12 }
  0x2a   : > { %p5589_p11 = pnand %p5588_p5, %p5584_p13 }
  0x2c   : > { %5592 = shalt.err (!%p5589_p11)
}
  0x2d   : > { %s5695_s21 = smov 128   ;;  %s5696_s9 = smov 8  }
  0x2e   : > { %5366 = dma.hbm_to_vmem [thread:$0]  (!%p5834_p9), %s283_s29, 4096, %s285_s10, %s273_s14, %s5695_s21, %s5695_s21, %s5696_s9  }
  0x2f   : > { %296 = sbr.rel (%p5783_p8) target bundleno = 1229 (0x4cd), region = 48 }
  0x34   : > { %s5851_s22 = sand.u32 1, %s5680_s25  }
  0x35   : > { %s4671_s16 = sshll.u32 %s5851_s22, 8  ;;  %s299_s1 = scalar_lea.sflag [#allocation4], %s5851_s22 }
  0x36   : > { %s5857_s15 = scalar_lea.vmem [#allocation3], %s4671_s16 }
  0x37   : > { %5653 = dma.done.wait (%p5770_p4), %s299_s1, 4096  }
  0x38   : > { %5655 = vsyncadd (%p5770_p4), %s299_s1, 4294963200 }
  0x39   : > { %5657 = dma.done.wait (%p46_p1), [#allocation7], 10240  }
  0x3a   : > { %5659 = vsyncadd (%p46_p1), [#allocation7], 4294957056 }
  0x3b   : > { %5661 = dma.done.wait (%p46_p1), [#allocation10], 1024  }
  0x3c   : > { %5663 = vsyncadd (%p46_p1), [#allocation10], 4294966272  ;;  %v5041_v0 = vld [vmem:[#allocation6 + $0x38] sm:$0xff]  ;;  %v5040_v1 = vld [vmem:[#allocation6 + $0x30] sm:$0xff]  ;;  %vm594_vm0 = vcmask 1040384   ;;  %v7505_v42 = vmov 0 }
  0x3d   : > { %466 = vmatpush.bf16.msra.mxu0 %v5041_v0  ;;  %5313 = vmatpush.bf16.msra.mxu3 %v5041_v0  ;;  %v5039_v2 = vld [vmem:[#allocation6 + $0x28] sm:$0xff]  ;;  %v5038_v3 = vld [vmem:[#allocation6 + $0x20] sm:$0xff]  ;;  %v5037_v4 = vld [vmem:[#allocation6 + $0x18] sm:$0xff]  ;;  %vm595_vm1 = vsmask.f32 256  ;;  %v7508_v46 = vmov 0 }
  0x3e   : > { %v5036_v5 = vld [vmem:[#allocation6 + $0x10] sm:$0xff]  ;;  %v5035_v6 = vld [vmem:[#allocation6 + $0x8] sm:$0xff]  ;;  %v5034_v7 = vld [vmem:[#allocation6] sm:$0xff]  ;;  %vm651_vm3 = vsmask.f32 7938  ;;  %vm1062_vm5 = vcmask 1043456  }
  0x3f   : > { %v350_v8 = vld [vmem:[%s5857_s15] sm:$0xff]  ;;  %v351_v9 = vld [vmem:[%s5857_s15 + $0x8] sm:$0xff]  ;;  %v352_v14 = vld [vmem:[%s5857_s15 + $0x10] sm:$0xff]  ;;  %vm739_vm7 = vsmask.f32 4368  ;;  %vm1641_vm10 = vcmask 1046528  }
  0x40   : > { %v374_v10 = vld [vmem:[%s5857_s15 + $0xc0] sm:$0xff]  ;;  %v375_v11 = vld [vmem:[%s5857_s15 + $0xc8] sm:$0xff]  ;;  %v382_v12 = vpack.c.bf16 %v351_v9, %v350_v8  ;;  %v353_v15 = vld [vmem:[%s5857_s15 + $0x18] sm:$0xff]  ;;  %vm1384_vm9 = vsmask.f32 7424  ;;  %s7303_s20 = scalar_lea.vmem [#allocation11], %s4671_s16 }
  0x41   : > { %467 = vmatpush.bf16.msra.mxu0 %v5040_v1  ;;  %5314 = vmatpush.bf16.msra.mxu3 %v5040_v1  ;;  %v394_v13 = vpack.c.bf16 %v375_v11, %v374_v10  ;;  %v376_v16 = vld [vmem:[%s5857_s15 + $0xd0] sm:$0xff]  ;;  %v377_v17 = vld [vmem:[%s5857_s15 + $0xd8] sm:$0xff]  ;;  %v383_v18 = vpack.c.bf16 %v353_v15, %v352_v14  ;;  %v354_v20 = vld [vmem:[%s5857_s15 + $0x20] sm:$0xff]  ;;  %s5122_s21 = sshll.u32 %s5761_s28, 8  ;;  %s4556_s30 = sshll.u32 %s7303_s20, 4  ;;  %s4557_s30 = int_to_ptr.vmem [resolvable:$true] %s4556_s30 }
  0x42   : > { %v395_v19 = vpack.c.bf16 %v377_v17, %v376_v16  ;;  %v355_v21 = vld [vmem:[%s5857_s15 + $0x28] sm:$0xff]  ;;  %v378_v22 = vld [vmem:[%s5857_s15 + $0xe0] sm:$0xff]  ;;  %v356_v26 = vld [vmem:[%s5857_s15 + $0x30] sm:$0xff]  ;;  %s4555_s1 = scalar_lea.hbm %s7471_s7, %s5122_s21  ;;  %s4544_s29 = scalar_lea.sflag [#allocation5], %s5851_s22 }
  0x43   : > { %v379_v23 = vld [vmem:[%s5857_s15 + $0xe8] sm:$0xff]  ;;  %v384_v24 = vpack.c.bf16 %v355_v21, %v354_v20  ;;  %v357_v27 = vld [vmem:[%s5857_s15 + $0x38] sm:$0xff]  ;;  %v380_v28 = vld [vmem:[%s5857_s15 + $0xf0] sm:$0xff]  ;;  %s4558_s12 = sshll.u32 %s4555_s1, 4  ;;  %s4559_s12 = int_to_ptr.hbm [resolvable:$true] %s4558_s12 }
  0x44   : > { %v396_v25 = vpack.c.bf16 %v379_v23, %v378_v22  ;;  %v381_v29 = vld [vmem:[%s5857_s15 + $0xf8] sm:$0xff]  ;;  %v385_v30 = vpack.c.bf16 %v357_v27, %v356_v26  ;;  %v358_v32 = vld [vmem:[%s5857_s15 + $0x40] sm:$0xff]  ;;  %v359_v33 = vld [vmem:[%s5857_s15 + $0x48] sm:$0xff]  ;;  %s5622_s28 = sshra.s32 %s4559_s12, 4  ;;  %s5623_s28 = int_to_ptr.hbm [resolvable:$true] %s5622_s28 }
  0x45   : > { %468 = vmatpush.bf16.msra.mxu0 %v5039_v2  ;;  %5315 = vmatpush.bf16.msra.mxu3 %v5039_v2  ;;  %v397_v31 = vpack.c.bf16 %v381_v29, %v380_v28  ;;  %v386_v34 = vpack.c.bf16 %v359_v33, %v358_v32  ;;  %v360_v35 = vld [vmem:[%s5857_s15 + $0x50] sm:$0xff]  ;;  %v361_v36 = vld [vmem:[%s5857_s15 + $0x58] sm:$0xff]  ;;  %v362_v38 = vld [vmem:[%s5857_s15 + $0x60] sm:$0xff]  ;;  %s5624_s10 = scalar_lea.hbm %s5623_s28, 256  ;;  %p5629_p11 = scmp.lt.s32.totalorder %s5623_s28, %s7471_s7 }
  0x46   : > { %v387_v37 = vpack.c.bf16 %v361_v36, %v360_v35  ;;  %v363_v39 = vld [vmem:[%s5857_s15 + $0x68] sm:$0xff]  ;;  %v5073_v41 = vld [vmem:[#allocation8 + $0xf8] sm:$0xff]  ;;  %vm5894_vm2 = vmand %vm594_vm0, %vm595_vm1  ;;  %p5625_p1 = scmp.ne.s32.totalorder %s5623_s28, %s5624_s10 }
  0x47   : > { %v388_v40 = vpack.c.bf16 %v363_v39, %v362_v38  ;;  %v7506_v42 = vsel %vm5894_vm2, 4294967295, %v7505_v42  ;;  %v600_v43 = vld [vmem:[#allocation2 + $0xc] sm:$0x1]  ;;  %2475 = vmatpush.bf16.msra.mxu1 %v5073_v41  ;;  %vm5901_vm4 = vmand %vm594_vm0, %vm651_vm3  ;;  %v5081_v47 = vld [vmem:[#allocation8 + $0x138] sm:$0xff] }
  0x48   : > { %7507 = vst [vmem:[#allocation16_spill] sm:$0xff] %v7506_v42  ;;  %v601_v44 = vsel %vm5894_vm2, 0, %v600_v43  ;;  %v5072_v45 = vld [vmem:[#allocation8 + $0xf0] sm:$0xff]  ;;  %v7509_v46 = vsel %vm5901_vm4, 4294967295, %v7508_v46  ;;  %v5071_v48 = vld [vmem:[#allocation8 + $0xe8] sm:$0xff]  ;;  %2564 = vmatpush.bf16.msra.mxu2 %v5081_v47  ;;  %v365_v51 = vld [vmem:[%s5857_s15 + $0x78] sm:$0xff]  ;;  %p5626_p4 = pnand %p5625_p1, %p5823_p7 }
  0x49   : > { %469 = vmatpush.bf16.msra.mxu0 %v5038_v3  ;;  %5316 = vmatpush.bf16.msra.mxu3 %v5038_v3  ;;  %602 = vst [vmem:[#allocation2 + $0xc] sm:$0x1] %v601_v44  ;;  %v656_v49 = vld [vmem:[#allocation2 + $0x14] sm:$0x1]  ;;  %v364_v50 = vld [vmem:[%s5857_s15 + $0x70] sm:$0xff]  ;;  %v5070_v55 = vld [vmem:[#allocation8 + $0xe0] sm:$0xff] }
  0x4a   : > { %7510 = vst [vmem:[#allocation17_spill] sm:$0xff] %v7509_v46  ;;  %v657_v52 = vsel %vm5901_vm4, 0, %v656_v49  ;;  %v5080_v53 = vld [vmem:[#allocation8 + $0x130] sm:$0xff]  ;;  %v636_v54 = vld [vmem:[#allocation2 + $0x9c] sm:$0x1]  ;;  %v389_v56 = vpack.c.bf16 %v365_v51, %v364_v50  ;;  %v5911_v58 = vld [vmem:[#allocation8 + $0x128] sm:$0xff]  ;;  %p5627_p8 = pneg %p5626_p4 }
  0x4b   : > { %2476 = vmatpush.bf16.msra.mxu1 %v5072_v45  ;;  %658 = vst [vmem:[#allocation2 + $0x14] sm:$0x1] %v657_v52  ;;  %v637_v57 = vsel %vm5894_vm2, 0, %v636_v54  ;;  %v5069_v59 = vld [vmem:[#allocation8 + $0xd8] sm:$0xff]  ;;  %v603_v60 = vld [vmem:[#allocation2 + $0x18] sm:$0x1]  ;;  %vm5953_vm6 = vmand %vm1062_vm5, %vm651_vm3 }
  0x4c   : > { %2565 = vmatpush.bf16.msra.mxu2 %v5080_v53  ;;  %638 = vst [vmem:[#allocation2 + $0x9c] sm:$0x1] %v637_v57  ;;  %v604_v61 = vsel %vm5894_vm2, 0, %v603_v60  ;;  %v5916_v62 = vld [vmem:[#allocation8 + $0x120] sm:$0xff]  ;;  %v5068_v63 = vld [vmem:[#allocation8 + $0xd0] sm:$0xff]  ;;  %v5921_v2 = vld [vmem:[#allocation8 + $0x118] sm:$0xff] }
  0x4d   : > { %470 = vmatpush.bf16.msra.mxu0 %v5037_v4  ;;  %5317 = vmatpush.bf16.msra.mxu3 %v5037_v4  ;;  %605 = vst [vmem:[#allocation2 + $0x18] sm:$0x1] %v604_v61  ;;  %v692_v0 = vld [vmem:[#allocation2 + $0xa4] sm:$0x1]  ;;  %v366_v4 = vld [vmem:[%s5857_s15 + $0x80] sm:$0xff]  ;;  %v5933_v9 = vld [vmem:[#allocation8 + $0x110] sm:$0xff] }
  0x4e   : > { %v693_v1 = vsel %vm5901_vm4, 0, %v692_v0  ;;  %v5067_v3 = vld [vmem:[#allocation8 + $0xc8] sm:$0xff]  ;;  %v5066_v10 = vld [vmem:[#allocation8 + $0xc0] sm:$0xff]  ;;  %v695_v26 = vld [vmem:[#allocation2 + $0xb0] sm:$0x1] }
  0x4f   : > { %2477 = vmatpush.bf16.msra.mxu1 %v5071_v48  ;;  %694 = vst [vmem:[#allocation2 + $0xa4] sm:$0x1] %v693_v1  ;;  %v5939_v16 = vld [vmem:[#allocation8 + $0x108] sm:$0xff]  ;;  %v5944_v22 = vld [vmem:[#allocation8 + $0x100] sm:$0xff]  ;;  %v5048_v27 = vld [vmem:[#allocation8 + $0x30] sm:$0xff]  ;;  %v696_v29 = vsel %vm5901_vm4, 0, %v695_v26 }
  0x50   : > { %2566 = vmatpush.bf16.msra.mxu2 %v5911_v58  ;;  %697 = vst [vmem:[#allocation2 + $0xb0] sm:$0x1] %v696_v29  ;;  %v1064_v35 = vld [vmem:[#allocation2 + $0xc] sm:$0xf]  ;;  %v5057_v54 = vld [vmem:[#allocation8 + $0x78] sm:$0xff]  ;;  %vm5973_vm8 = vmor %vm595_vm1, %vm739_vm7 }
  0x51   : > { %471 = vmatpush.bf16.msra.mxu0 %v5036_v5  ;;  %5318 = vmatpush.bf16.msra.mxu3 %v5036_v5  ;;  %v367_v5 = vld [vmem:[%s5857_s15 + $0x88] sm:$0xff]  ;;  %v368_v39 = vld [vmem:[%s5857_s15 + $0x90] sm:$0xff]  ;;  %v698_v26 = vld [vmem:[#allocation2 + $0xbc] sm:$0x1] }
  0x52   : > { %v390_v11 = vpack.c.bf16 %v367_v5, %v366_v4 }
  0x53   : > { %2478 = vmatpush.bf16.msra.mxu1 %v5070_v55 }
  0x54   : > { %2567 = vmatpush.bf16.msra.mxu2 %v5916_v62 }
  0x55   : > { %472 = vmatpush.bf16.msra.mxu0 %v5035_v6  ;;  %5319 = vmatpush.bf16.msra.mxu3 %v5035_v6  ;;  %v659_v6 = vld [vmem:[#allocation2 + $0x20] sm:$0x1] }
  0x56   : > { %v660_v8 = vsel %vm5901_vm4, 0, %v659_v6 }
  0x57   : > { %2479 = vmatpush.bf16.msra.mxu1 %v5069_v59  ;;  %661 = vst [vmem:[#allocation2 + $0x20] sm:$0x1] %v660_v8 }
  0x58   : > { %2568 = vmatpush.bf16.msra.mxu2 %v5921_v2 }
  0x59   : > { %473 = vmatpush.bf16.msra.mxu0 %v5034_v7  ;;  %5320 = vmatpush.bf16.msra.mxu3 %v5034_v7  ;;  %v5929_v7 = vld [vmem:[%s7466_s2] ss:$0 sm:$0xff] }
  0x5b   : > { %2480 = vmatpush.bf16.msra.mxu1 %v5068_v63 }
  0x5c   : > { %474 = vmatmul.bf16.vlgmr.msra.gmra.mxu0 %v382_v12  ;;  %534 = vmatmul.bf16.vlgmr.msra.gmra.mxu3 %v394_v13  ;;  %v639_v12 = vld [vmem:[#allocation2 + $0xa8] sm:$0x1] }
  0x5d   : > { %5321 = vmatpush.bf16.msrb.mxu3 %v5073_v41  ;;  %2569 = vmatpush.bf16.msra.mxu2 %v5933_v9  ;;  %v640_v14 = vsel %vm5894_vm2, 0, %v639_v12  ;;  %v662_v41 = vld [vmem:[#allocation2 + $0x2c] sm:$0x1] }
  0x5e   : > { %641 = vst [vmem:[#allocation2 + $0xa8] sm:$0x1] %v640_v14  ;;  %v663_v49 = vsel %vm5901_vm4, 0, %v662_v41 }
  0x5f   : > { %2481 = vmatpush.bf16.msra.mxu1 %v5067_v3  ;;  %664 = vst [vmem:[#allocation2 + $0x2c] sm:$0x1] %v663_v49 }
  0x61   : > { %5322 = vmatpush.bf16.msrb.mxu3 %v5072_v45  ;;  %2570 = vmatpush.bf16.msra.mxu2 %v5939_v16 }
  0x63   : > { %2482 = vmatpush.bf16.msra.mxu1 %v5066_v10 }
  0x65   : > { %5323 = vmatpush.bf16.msrb.mxu3 %v5071_v48  ;;  %2571 = vmatpush.bf16.msra.mxu2 %v5944_v22 }
  0x67   : > { %2975 = vmatpush.bf16.msrb.mxu1 %v5057_v54 }
  0x69   : > { %5324 = vmatpush.bf16.msrb.mxu3 %v5070_v55  ;;  %v642_v55 = vld [vmem:[#allocation2 + $0xb4] sm:$0x1] }
  0x6c   : > { %479 = vmatmul.bf16.gmra.mxu0 %v383_v18  ;;  %539 = vmatmul.bf16.gmra.mxu3 %v395_v19  ;;  %v5049_v18 = vld [vmem:[#allocation8 + $0x38] sm:$0xff]  ;;  %v606_v19 = vld [vmem:[#allocation2 + $0x24] sm:$0x1] }
  0x6d   : > { %5325 = vmatpush.bf16.msrb.mxu3 %v5069_v59  ;;  %v607_v21 = vsel %vm5894_vm2, 0, %v606_v19  ;;  %2886 = vmatpush.bf16.msrb.mxu0 %v5049_v18  ;;  %v5047_v59 = vld [vmem:[#allocation8 + $0x28] sm:$0xff] }
  0x6e   : > { %608 = vst [vmem:[#allocation2 + $0x24] sm:$0x1] %v607_v21 }
  0x71   : > { %5326 = vmatpush.bf16.msrb.mxu3 %v5068_v63  ;;  %2887 = vmatpush.bf16.msrb.mxu0 %v5048_v27 }
  0x75   : > { %5327 = vmatpush.bf16.msrb.mxu3 %v5067_v3  ;;  %v1068_v3 = vld [vmem:[#allocation2 + $0x14] sm:$0x1]  ;;  %2888 = vmatpush.bf16.msrb.mxu0 %v5047_v59 }
  0x79   : > { %5328 = vmatpush.bf16.msrb.mxu3 %v5066_v10 }
  0x7c   : > { %484 = vmatmul.bf16.gmra.mxu0 %v384_v24  ;;  %544 = vmatmul.bf16.gmra.mxu3 %v396_v25 }
  0x7d   : > { %5329 = vmatpush.bf16.msra.mxu3 %v5081_v47 }
  0x81   : > { %5330 = vmatpush.bf16.msra.mxu3 %v5080_v53 }
  0x85   : > { %5331 = vmatpush.bf16.msra.mxu3 %v5911_v58  ;;  %v643_v58 = vsel %vm5894_vm2, 0, %v642_v55 }
  0x86   : > { %644 = vst [vmem:[#allocation2 + $0xb4] sm:$0x1] %v643_v58 }
  0x89   : > { %5332 = vmatpush.bf16.msra.mxu3 %v5916_v62 }
  0x8c   : > { %489 = vmatmul.bf16.gmra.mxu0 %v385_v30  ;;  %549 = vmatmul.bf16.gmra.mxu3 %v397_v31 }
  0x8d   : > { %5333 = vmatpush.bf16.msra.mxu3 %v5921_v2 }
  0x91   : > { %5334 = vmatpush.bf16.msra.mxu3 %v5933_v9 }
  0x95   : > { %5335 = vmatpush.bf16.msra.mxu3 %v5939_v16  ;;  %v1071_v16 = vld [vmem:[#allocation2 + $0x18] sm:$0xf] }
  0x99   : > { %5336 = vmatpush.bf16.msra.mxu3 %v5944_v22 }
  0x9c   : > { %494 = vmatmul.bf16.gmra.mxu0 %v386_v34 }
  0xac   : > { %499 = vmatmul.bf16.gmra.mxu0 %v387_v37 }
  0xbc   : > { %504 = vmatmul.bf16.gmra.mxu0 %v388_v40  ;;  %v369_v40 = vld [vmem:[%s5857_s15 + $0x98] sm:$0xff] }
  0xbd   : > { %v391_v53 = vpack.c.bf16 %v369_v40, %v368_v39 }
  0xcc   : > { %509 = vmatmul.bf16.gmra.mxu0 %v389_v56  ;;  %v1148_v56 = vld [vmem:[#allocation2 + $0x9c] sm:$0xf] }
  0xd9   : > { %v475_v13 = vpop.f32.mrf.mxu0 }
  0xda   : > { %v476_v15 = vadd.f32 %v5929_v7, %v475_v13 }
  0xdc   : > { %v555_v17 = vmax.f32 %v476_v15, 0.0  ;;  %514 = vmatmul.bf16.gmra.mxu0 %v390_v11  ;;  %v5046_v11 = vld [vmem:[#allocation8 + $0x20] sm:$0xff] }
  0xdd   : > { %2889 = vmatpush.bf16.msrb.mxu0 %v5046_v11 }
  0xde   : > { %v707_v20 = vpack.c.bf16 %v555_v17, %v555_v17 }
  0xdf   : > { %v535_v23 = vpop.f32.mrf.mxu3 }
  0xe0   : > { %v742_v24 = vshrl.u32 %v707_v20, 16  ;;  %v536_v25 = vadd.f32 %v5929_v7, %v535_v23  ;;  %v745_v31 = vshll.u32 %v707_v20, 16  ;;  %v1152_v23 = vld [vmem:[#allocation2 + $0xa4] sm:$0x1] }
  0xe1   : > { %v477_v28 = vpop.f32.mrf.mxu0 }
  0xe2   : > { %v744_v30 = vrot.slane %v742_v24, 7  ;;  %v579_v32 = vmax.f32 %v536_v25, 0.0  ;;  %v478_v33 = vadd.f32 %v5929_v7, %v477_v28 }
  0xe4   : > { %v747_v36 = vor.u32 %v745_v31, %v744_v30  ;;  %v731_v37 = vpack.c.bf16 %v579_v32, %v579_v32  ;;  %v556_v38 = vmax.f32 %v478_v33, 0.0  ;;  %v748_v0 = vrot.slane %v744_v30, 4  ;;  %v609_v30 = vld [vmem:[#allocation2 + $0x30] sm:$0x1] }
  0xe5   : > { %v5045_v31 = vld [vmem:[#allocation8 + $0x18] sm:$0xff] }
  0xe6   : > { %v1065_v43 = vsel %vm5953_vm6, %v747_v36, %v1064_v35  ;;  %v946_v44 = vshrl.u32 %v731_v37, 16  ;;  %v949_v45 = vshll.u32 %v731_v37, 16  ;;  %v708_v47 = vpack.c.bf16 %v556_v38, %v556_v38  ;;  %2890 = vmatpush.bf16.msrb.mxu0 %v5045_v31 }
  0xe7   : > { %1066 = vst [vmem:[#allocation2 + $0xc] sm:$0xf] %v1065_v43  ;;  %v537_v48 = vpop.f32.mrf.mxu3  ;;  %v699_v35 = vsel %vm5901_vm4, 0, %v698_v26  ;;  %v610_v36 = vsel %vm5894_vm2, 0, %v609_v30  ;;  %v5697_v37 = vmov 0   ;;  %v370_v43 = vld [vmem:[%s5857_s15 + $0xa0] sm:$0xff] }
  0xe8   : > { %v5964_v50 = vrot.slane %v946_v44, 7  ;;  %v750_v51 = vshrl.u32 %v708_v47, 16  ;;  %v538_v52 = vadd.f32 %v5929_v7, %v537_v48  ;;  %v753_v62 = vshll.u32 %v708_v47, 16  ;;  %587 = vst [vmem:[#allocation2] sm:$0xf] %v5697_v37  ;;  %v371_v47 = vld [vmem:[%s5857_s15 + $0xa8] sm:$0xff] }
  0xe9   : > { %v480_v57 = vpop.f32.mrf.mxu0  ;;  %700 = vst [vmem:[#allocation2 + $0xbc] sm:$0x1] %v699_v35  ;;  %v5044_v48 = vld [vmem:[#allocation8 + $0x10] sm:$0xff] }
  0xea   : > { %v951_v60 = vor.u32 %v949_v45, %v5964_v50  ;;  %v752_v61 = vrot.slane %v750_v51, 7  ;;  %v580_v63 = vmax.f32 %v538_v52, 0.0  ;;  %v481_v4 = vadd.f32 %v5929_v7, %v480_v57  ;;  %611 = vst [vmem:[#allocation2 + $0x30] sm:$0x1] %v610_v36  ;;  %2891 = vmatpush.bf16.msrb.mxu0 %v5044_v48 }
  0xeb   : > { %v952_v19 = vrot.slane %v5964_v50, 4  ;;  %588 = vst [vmem:[#allocation2 + $0x4] sm:$0xf] %v5697_v37 }
  0xec   : > { %v1149_v5 = vsel %vm5953_vm6, %v951_v60, %v1148_v56  ;;  %v755_v6 = vor.u32 %v753_v62, %v752_v61  ;;  %v757_v8 = vrot.slane %v752_v61, 4  ;;  %v732_v10 = vpack.c.bf16 %v580_v63, %v580_v63  ;;  %519 = vmatmul.bf16.gmra.mxu0 %v391_v53  ;;  %v1155_v61 = vld [vmem:[#allocation2 + $0xa8] sm:$0xf]  ;;  %589 = vst [vmem:[#allocation2 + $0x8] sm:$0x1] %v5697_v37 }
  0xed   : > { %1150 = vst [vmem:[#allocation2 + $0x9c] sm:$0xf] %v1149_v5  ;;  %v557_v2 = vmax.f32 %v481_v4, 0.0  ;;  %v392_v60 = vpack.c.bf16 %v371_v47, %v370_v43 }
  0xee   : > { %v756_v12 = vsel %vm5973_vm8, %v748_v0, %v755_v6  ;;  %v1069_v13 = vsel %vm5894_vm2, %v757_v8, %v1068_v3  ;;  %v954_v14 = vshrl.u32 %v732_v10, 16  ;;  %v957_v15 = vshll.u32 %v732_v10, 16  ;;  %v6002_v45 = vld [vmem:[#allocation2 + $0xc] sm:$0xe]  ;;  %v5043_v0 = vld [vmem:[#allocation8 + $0x8] sm:$0xff] }
  0xef   : > { %1067 = vst [vmem:[#allocation2 + $0x10] sm:$0xf] %v756_v12  ;;  %v709_v17 = vpack.c.bf16 %v557_v2, %v557_v2  ;;  %v540_v18 = vpop.f32.mrf.mxu3  ;;  %v1075_v8 = vld [vmem:[#allocation2 + $0x20] sm:$0x1]  ;;  %2892 = vmatpush.bf16.msrb.mxu0 %v5043_v0 }
  0xf0   : > { %1070 = vst [vmem:[#allocation2 + $0x14] sm:$0x1] %v1069_v13  ;;  %v956_v20 = vrot.slane %v954_v14, 7  ;;  %v541_v21 = vadd.f32 %v5929_v7, %v540_v18  ;;  %v597_v0 = vld [vmem:[#allocation2] sm:$0x1] }
  0xf1   : > { %v759_v24 = vshrl.u32 %v709_v17, 16  ;;  %v482_v25 = vpop.f32.mrf.mxu0  ;;  %v762_v33 = vshll.u32 %v709_v17, 16  ;;  %591 = vst [vmem:[#allocation2 + $0xcc] sm:$0xf] %v5697_v37 }
  0xf2   : > { %v959_v27 = vor.u32 %v957_v15, %v956_v20  ;;  %v961_v28 = vrot.slane %v956_v20, 4  ;;  %v581_v29 = vmax.f32 %v541_v21, 0.0  ;;  %v483_v9 = vadd.f32 %v5929_v7, %v482_v25  ;;  %592 = vst [vmem:[#allocation2 + $0xd0] sm:$0xf] %v5697_v37 }
  0xf3   : > { %v5989_v32 = vrot.slane %v759_v24, 7  ;;  %593 = vst [vmem:[#allocation2 + $0xd4] sm:$0x1] %v5697_v37 }
  0xf4   : > { %v960_v38 = vsel %vm5973_vm8, %v952_v19, %v959_v27  ;;  %v1153_v39 = vsel %vm5894_vm2, %v961_v28, %v1152_v23  ;;  %v733_v40 = vpack.c.bf16 %v581_v29, %v581_v29  ;;  %v558_v41 = vmax.f32 %v483_v9, 0.0  ;;  %v665_v19 = vld [vmem:[#allocation2 + $0x38] sm:$0x1]  ;;  %v1159_v28 = vld [vmem:[#allocation2 + $0xb0] sm:$0x1] }
  0xf5   : > { %1151 = vst [vmem:[#allocation2 + $0xa0] sm:$0xf] %v960_v38  ;;  %v764_v44 = vor.u32 %v762_v33, %v5989_v32  ;;  %v765_v6 = vrot.slane %v5989_v32, 4  ;;  %v5042_v23 = vld [vmem:[#allocation8] sm:$0xff]  ;;  %v666_v36 = vsel %vm5901_vm4, 0, %v665_v19  ;;  %v5056_v38 = vld [vmem:[#allocation8 + $0x70] sm:$0xff] }
  0xf6   : > { %1154 = vst [vmem:[#allocation2 + $0xa4] sm:$0x1] %v1153_v39  ;;  %v963_v49 = vshrl.u32 %v733_v40, 16  ;;  %v966_v50 = vshll.u32 %v733_v40, 16  ;;  %v710_v51 = vpack.c.bf16 %v558_v41, %v558_v41  ;;  %v6005_v52 = vld [vmem:[#allocation2 + $0xc] sm:$0xff]   ;;  %2893 = vmatpush.bf16.msrb.mxu0 %v5042_v23  ;;  %2976 = vmatpush.bf16.msrb.mxu1 %v5056_v38  ;;  %v598_v23 = vsel %vm5894_vm2, 0, %v597_v0 }
  0xf7   : > { %v6007_v53 = vld [vmem:[#allocation2 + $0xc] sm:$0xf0]  ;;  %v1072_v54 = vsel %vm5953_vm6, %v764_v44, %v1071_v16  ;;  %v542_v55 = vpop.f32.mrf.mxu3  ;;  %v1786_v56 = vld [vmem:[#allocation2 + $0x14] sm:$0x1]  ;;  %2483 = vmatmul.bf16.vlgmr.msra.gmra.mxu1 %v6005_v52  ;;  %v1965_v21 = vshll.u32 %v6005_v52, 16  ;;  %v1963_v43 = vshrl.u32 %v6005_v52, 16 }
  0xf8   : > { %1073 = vst [vmem:[#allocation2 + $0x18] sm:$0xf] %v1072_v54  ;;  %v6012_v57 = vrot.slane %v963_v49, 7  ;;  %v767_v58 = vshrl.u32 %v710_v51, 16  ;;  %v543_v59 = vadd.f32 %v5929_v7, %v542_v55  ;;  %v1930_v63 = vunpack.c.l.b16 %v1786_v56  ;;  %v645_v49 = vld [vmem:[#allocation2 + $0xc0] sm:$0x1] }
  0xf9   : > { %v485_v62 = vpop.f32.mrf.mxu0  ;;  %v770_v4 = vshll.u32 %v710_v51, 16  ;;  %v5430_v2 = vor.u32 %v6002_v45, %v6007_v53  ;;  %v1967_v30 = vrot.slane %v1965_v21, 1  ;;  %667 = vst [vmem:[#allocation2 + $0x38] sm:$0x1] %v666_v36  ;;  %v612_v54 = vld [vmem:[#allocation2 + $0x3c] sm:$0x1] }
  0xfa   : > { %v968_v22 = vor.u32 %v966_v50, %v6012_v57  ;;  %v769_v3 = vrot.slane %v767_v58, 7  ;;  %v582_v5 = vmax.f32 %v543_v59, 0.0  ;;  %v486_v10 = vadd.f32 %v5929_v7, %v485_v62  ;;  %v1078_v56 = vld [vmem:[#allocation2 + $0x24] sm:$0xf]  ;;  %v372_v59 = vld [vmem:[%s5857_s15 + $0xb0] sm:$0xff] }
  0xfb   : > { %v6022_v11 = vpack.c.b16 %v1930_v63, %v1930_v63  ;;  %v969_v32 = vrot.slane %v6012_v57, 4  ;;  %v2218_v40 = vrot.slane %v5430_v2, 1  ;;  %v1968_v51 = vor.u32 %v1967_v30, %v1963_v43  ;;  %v1162_v19 = vld [vmem:[#allocation2 + $0xb4] sm:$0xf]  ;;  %599 = vst [vmem:[#allocation2] sm:$0x1] %v598_v23 }
  0xfc   : > { %v1156_v12 = vsel %vm5953_vm6, %v968_v22, %v1155_v61  ;;  %v772_v13 = vor.u32 %v770_v4, %v769_v3  ;;  %v774_v14 = vrot.slane %v769_v3, 4  ;;  %v734_v15 = vpack.c.bf16 %v582_v5, %v582_v5  ;;  %524 = vmatmul.bf16.gmra.mxu0 %v392_v60  ;;  %v6027_v17 = vld [vmem:[#allocation2 + $0x9c] sm:$0xff]   ;;  %v373_v60 = vld [vmem:[%s5857_s15 + $0xb8] sm:$0xff] }
  0xfd   : > { %v6029_v18 = vld [vmem:[#allocation2 + $0x9c] sm:$0xf0]  ;;  %1157 = vst [vmem:[#allocation2 + $0xa8] sm:$0xf] %v1156_v12  ;;  %v559_v20 = vmax.f32 %v486_v10, 0.0  ;;  %v1970_v31 = vshll.u32 %v6022_v11, 16  ;;  %2543 = vmatmul.bf16.vlgmr.msrb.gmra.mxu3 %v6027_v17 }
  0xfe   : > { %v773_v24 = vsel %vm5973_vm8, %v765_v6, %v772_v13  ;;  %v1076_v25 = vsel %vm5894_vm2, %v774_v14, %v1075_v8  ;;  %v971_v26 = vshrl.u32 %v734_v15, 16  ;;  %v974_v27 = vshll.u32 %v734_v15, 16 }
  0xff   : > { %1074 = vst [vmem:[#allocation2 + $0x1c] sm:$0xf] %v773_v24  ;;  %v711_v29 = vpack.c.bf16 %v559_v20, %v559_v20  ;;  %v545_v9 = vpop.f32.mrf.mxu3  ;;  %v1972_v53 = vrot.slane %v1970_v31, 1  ;;  %v2219_v63 = vrot.slane %v6022_v11, 1  ;;  %v646_v37 = vsel %vm5894_vm2, 0, %v645_v49 }
 0x100   : > { %1077 = vst [vmem:[#allocation2 + $0x20] sm:$0x1] %v1076_v25  ;;  %v973_v33 = vrot.slane %v971_v26, 7  ;;  %v546_v35 = vadd.f32 %v5929_v7, %v545_v9  ;;  %v613_v5 = vsel %vm5894_vm2, 0, %v612_v54  ;;  %v393_v14 = vpack.c.bf16 %v373_v60, %v372_v59  ;;  %v1082_v9 = vld [vmem:[#allocation2 + $0x2c] sm:$0x1] }
 0x101   : > { %v776_v39 = vshrl.u32 %v711_v29, 16  ;;  %v779_v16 = vshll.u32 %v711_v29, 16  ;;  %v487_v41 = vpop.f32.mrf.mxu0  ;;  %v1973_v62 = vsel %vm1384_vm9, %v1968_v51, %v1972_v53  ;;  %647 = vst [vmem:[#allocation2 + $0xc0] sm:$0x1] %v646_v37  ;;  %v6073_v24 = vsel %vm1641_vm10, %v2218_v40, %v2219_v63  ;;  %v701_v29 = vld [vmem:[#allocation2 + $0xc8] sm:$0x1] }
 0x102   : > { %v976_v44 = vor.u32 %v974_v27, %v973_v33  ;;  %v978_v45 = vrot.slane %v973_v33, 4  ;;  %v583_v47 = vmax.f32 %v546_v35, 0.0  ;;  %v488_v48 = vadd.f32 %v5929_v7, %v487_v41  ;;  %2572 = vmatmul.bf16.vlgmr.msra.gmra.mxu2 %v1973_v62  ;;  %614 = vst [vmem:[#allocation2 + $0x3c] sm:$0x1] %v613_v5  ;;  %v1166_v49 = vld [vmem:[#allocation2 + $0xbc] sm:$0x1] }
 0x103   : > { %v6046_v50 = vrot.slane %v776_v39, 7  ;;  %v702_v33 = vsel %vm5901_vm4, 0, %v701_v29  ;;  %v671_v29 = vld [vmem:[#allocation2 + $0x50] sm:$0x1] }
 0x104   : > { %v977_v52 = vsel %vm5973_vm8, %v969_v32, %v976_v44  ;;  %v1160_v55 = vsel %vm5894_vm2, %v978_v45, %v1159_v28  ;;  %v735_v57 = vpack.c.bf16 %v583_v47, %v583_v47  ;;  %v560_v58 = vmax.f32 %v488_v48, 0.0  ;;  %703 = vst [vmem:[#allocation2 + $0xc8] sm:$0x1] %v702_v33 }
 0x105   : > { %1158 = vst [vmem:[#allocation2 + $0xac] sm:$0xf] %v977_v52  ;;  %v781_v61 = vor.u32 %v779_v16, %v6046_v50  ;;  %v782_v15 = vrot.slane %v6046_v50, 4  ;;  %v668_v16 = vld [vmem:[#allocation2 + $0x44] sm:$0x1] }
 0x106   : > { %1161 = vst [vmem:[#allocation2 + $0xb0] sm:$0x1] %v1160_v55  ;;  %v980_v22 = vshrl.u32 %v735_v57, 16  ;;  %v983_v3 = vshll.u32 %v735_v57, 16  ;;  %v712_v4 = vpack.c.bf16 %v560_v58, %v560_v58  ;;  %v6067_v13 = vld [vmem:[#allocation2 + $0x18] sm:$0xff]   ;;  %v669_v54 = vsel %vm5901_vm4, 0, %v668_v16 }
 0x107   : > { %v1079_v6 = vsel %vm5953_vm6, %v781_v61, %v1078_v56  ;;  %v547_v8 = vpop.f32.mrf.mxu3  ;;  %v1787_v10 = vld [vmem:[#allocation2 + $0x20] sm:$0x1]  ;;  %v1977_v31 = vshll.u32 %v6067_v13, 16  ;;  %2488 = vmatmul.bf16.gmra.mxu1 %v6067_v13  ;;  %v1975_v56 = vshrl.u32 %v6067_v13, 16  ;;  %670 = vst [vmem:[#allocation2 + $0x44] sm:$0x1] %v669_v54 }
 0x108   : > { %1080 = vst [vmem:[#allocation2 + $0x24] sm:$0xf] %v1079_v6  ;;  %v6064_v2 = vrot.slane %v980_v22, 7  ;;  %v784_v11 = vshrl.u32 %v712_v4, 16  ;;  %v548_v12 = vadd.f32 %v5929_v7, %v547_v8  ;;  %v1931_v21 = vunpack.c.l.b16 %v1787_v10  ;;  %v615_v61 = vld [vmem:[#allocation2 + $0x48] sm:$0x1] }
 0x109   : > { %v490_v20 = vpop.f32.mrf.mxu0  ;;  %v787_v27 = vshll.u32 %v712_v4, 16  ;;  %v1979_v51 = vrot.slane %v1977_v31, 1  ;;  %v616_v5 = vsel %vm5894_vm2, 0, %v615_v61  ;;  %v1085_v10 = vld [vmem:[#allocation2 + $0x30] sm:$0xf]  ;;  %v672_v16 = vsel %vm5901_vm4, 0, %v671_v29 }
 0x10a   : > { %v985_v25 = vor.u32 %v983_v3, %v6064_v2  ;;  %v786_v26 = vrot.slane %v784_v11, 7  ;;  %v584_v28 = vmax.f32 %v548_v12, 0.0  ;;  %v491_v30 = vadd.f32 %v5929_v7, %v490_v20  ;;  %617 = vst [vmem:[#allocation2 + $0x48] sm:$0x1] %v616_v5 }
 0x10b   : > { %v6079_v32 = vpack.c.b16 %v1931_v21, %v1931_v21  ;;  %v986_v52 = vrot.slane %v6064_v2, 4  ;;  %v6099_v4 = vor.u32 %v1979_v51, %v1975_v56  ;;  %673 = vst [vmem:[#allocation2 + $0x50] sm:$0x1] %v672_v16 }
 0x10c   : > { %v1163_v35 = vsel %vm5953_vm6, %v985_v25, %v1162_v19  ;;  %v789_v36 = vor.u32 %v787_v27, %v786_v26  ;;  %v791_v38 = vrot.slane %v786_v26, 4  ;;  %v736_v39 = vpack.c.bf16 %v584_v28, %v584_v28  ;;  %529 = vmatmul.bf16.gmra.mxu0 %v393_v14  ;;  %v6090_v48 = vld [vmem:[#allocation2 + $0xa8] sm:$0xff]   ;;  %v5055_v28 = vld [vmem:[#allocation8 + $0x68] sm:$0xff] }
 0x10d   : > { %1164 = vst [vmem:[#allocation2 + $0xb4] sm:$0xf] %v1163_v35  ;;  %v561_v40 = vmax.f32 %v491_v30, 0.0  ;;  %v1982_v41 = vshll.u32 %v6079_v32, 16  ;;  %2548 = vmatmul.bf16.gmra.mxu3 %v6090_v48  ;;  %v1169_v35 = vld [vmem:[#allocation2 + $0xc0] sm:$0xf]  ;;  %2977 = vmatpush.bf16.msrb.mxu1 %v5055_v28 }
 0x10e   : > { %v790_v43 = vsel %vm5973_vm8, %v782_v15, %v789_v36  ;;  %v1083_v44 = vsel %vm5894_vm2, %v791_v38, %v1082_v9  ;;  %v988_v45 = vshrl.u32 %v736_v39, 16  ;;  %v991_v47 = vshll.u32 %v736_v39, 16  ;;  %v5124_v38 = vld [vmem:[#allocation2] sm:$0xff]  }
 0x10f   : > { %1081 = vst [vmem:[#allocation2 + $0x28] sm:$0xf] %v790_v43  ;;  %v713_v50 = vpack.c.bf16 %v561_v40, %v561_v40  ;;  %v550_v53 = vpop.f32.mrf.mxu3  ;;  %v1984_v60 = vrot.slane %v1982_v41, 1  ;;  %v5432_v5 = vld [vmem:[#allocation2 + $0x24] sm:$0xe] }
 0x110   : > { %1084 = vst [vmem:[#allocation2 + $0x2c] sm:$0x1] %v1083_v44  ;;  %v990_v55 = vrot.slane %v988_v45, 7  ;;  %v551_v57 = vadd.f32 %v5929_v7, %v550_v53  ;;  %v1089_v45 = vld [vmem:[#allocation2 + $0x38] sm:$0x1] }
 0x111   : > { %v793_v58 = vshrl.u32 %v713_v50, 16  ;;  %v492_v59 = vpop.f32.mrf.mxu0  ;;  %v796_v3 = vshll.u32 %v713_v50, 16  ;;  %v1985_v14 = vsel %vm1384_vm9, %v6099_v4, %v1984_v60 }
 0x112   : > { %v993_v62 = vor.u32 %v991_v47, %v990_v55  ;;  %v995_v63 = vrot.slane %v990_v55, 4  ;;  %v493_v37 = vadd.f32 %v5929_v7, %v492_v59  ;;  %v585_v0 = vmax.f32 %v551_v57, 0.0  ;;  %2577 = vmatmul.bf16.gmra.mxu2 %v1985_v14 }
 0x113   : > { %v795_v22 = vrot.slane %v793_v58, 7 }
 0x114   : > { %v994_v6 = vsel %vm5973_vm8, %v986_v52, %v993_v62  ;;  %v1167_v8 = vsel %vm5894_vm2, %v995_v63, %v1166_v49  ;;  %v562_v2 = vmax.f32 %v493_v37, 0.0  ;;  %v737_v11 = vpack.c.bf16 %v585_v0, %v585_v0 }
 0x115   : > { %1165 = vst [vmem:[#allocation2 + $0xb8] sm:$0xf] %v994_v6  ;;  %v798_v12 = vor.u32 %v796_v3, %v795_v22  ;;  %v799_v33 = vrot.slane %v795_v22, 4 }
 0x116   : > { %1168 = vst [vmem:[#allocation2 + $0xbc] sm:$0x1] %v1167_v8  ;;  %v714_v15 = vpack.c.bf16 %v562_v2, %v562_v2  ;;  %v997_v19 = vshrl.u32 %v737_v11, 16  ;;  %v1000_v20 = vshll.u32 %v737_v11, 16  ;;  %v1758_v21 = vld [vmem:[#allocation2 + $0x24] sm:$0xff]  }
 0x117   : > { %v6109_v23 = vld [vmem:[#allocation2 + $0x24] sm:$0xf0]  ;;  %v1086_v25 = vsel %vm5953_vm6, %v798_v12, %v1085_v10  ;;  %v552_v26 = vpop.f32.mrf.mxu3  ;;  %v1788_v27 = vld [vmem:[#allocation2 + $0x2c] sm:$0x1]  ;;  %2493 = vmatmul.bf16.gmra.mxu1 %v1758_v21  ;;  %v1987_v50 = vshrl.u32 %v1758_v21, 16  ;;  %v1989_v51 = vshll.u32 %v1758_v21, 16 }
 0x118   : > { %1087 = vst [vmem:[#allocation2 + $0x30] sm:$0xf] %v1086_v25  ;;  %v801_v9 = vshrl.u32 %v714_v15, 16  ;;  %v6113_v30 = vrot.slane %v997_v19, 7  ;;  %v553_v31 = vadd.f32 %v5929_v7, %v552_v26  ;;  %v1932_v39 = vunpack.c.l.b16 %v1788_v27  ;;  %v618_v11 = vld [vmem:[#allocation2 + $0x54] sm:$0x1] }
 0x119   : > { %v495_v36 = vpop.f32.mrf.mxu0  ;;  %v804_v41 = vshll.u32 %v714_v15, 16  ;;  %v1991_v59 = vrot.slane %v1989_v51, 1  ;;  %v1173_v15 = vld [vmem:[#allocation2 + $0xc8] sm:$0x1]  ;;  %v6138_v21 = vld [vmem:[#allocation2 + $0xc] sm:$0xf0] }
 0x11a   : > { %v803_v40 = vrot.slane %v801_v9, 7  ;;  %v1002_v43 = vor.u32 %v1000_v20, %v6113_v30  ;;  %v496_v44 = vadd.f32 %v5929_v7, %v495_v36  ;;  %v586_v47 = vmax.f32 %v553_v31, 0.0  ;;  %v6136_v20 = vld [vmem:[#allocation2 + $0xc] sm:$0xff]   ;;  %v1092_v26 = vld [vmem:[#allocation2 + $0x3c] sm:$0xf] }
 0x11b   : > { %v6120_v49 = vpack.c.b16 %v1932_v39, %v1932_v39  ;;  %v1992_v22 = vor.u32 %v1991_v59, %v1987_v50  ;;  %v1003_v6 = vrot.slane %v6113_v30, 4  ;;  %v619_v25 = vsel %vm5894_vm2, 0, %v618_v11 }
 0x11c   : > { %v806_v53 = vor.u32 %v804_v41, %v803_v40  ;;  %v808_v54 = vrot.slane %v803_v40, 4  ;;  %v1170_v52 = vsel %vm5953_vm6, %v1002_v43, %v1169_v35  ;;  %v563_v55 = vmax.f32 %v496_v44, 0.0  ;;  %2894 = vmatmul.bf16.vlgmr.msrb.gmra.mxu0 %v5124_v38  ;;  %v6124_v56 = vld [vmem:[#allocation2 + $0xb4] sm:$0xff]   ;;  %620 = vst [vmem:[#allocation2 + $0x54] sm:$0x1] %v619_v25 }
 0x11d   : > { %v6126_v57 = vld [vmem:[#allocation2 + $0xb4] sm:$0xf0]  ;;  %1171 = vst [vmem:[#allocation2 + $0xc0] sm:$0xf] %v1170_v52  ;;  %v738_v58 = vpack.c.bf16 %v586_v47, %v586_v47  ;;  %v1994_v63 = vshll.u32 %v6120_v49, 16  ;;  %2553 = vmatmul.bf16.gmra.mxu3 %v6124_v56  ;;  %v5433_v38 = vor.u32 %v5432_v5, %v6109_v23 }
 0x11e   : > { %7515 = vst [vmem:[#allocation18_spill] sm:$0xff] %v6126_v57  ;;  %v807_v60 = vsel %vm5973_vm8, %v799_v33, %v806_v53  ;;  %v1090_v61 = vsel %vm5894_vm2, %v808_v54, %v1089_v45  ;;  %v715_v62 = vpack.c.bf16 %v563_v55, %v563_v55  ;;  %v674_v43 = vld [vmem:[#allocation2 + $0x5c] sm:$0x1]  ;;  %v1798_v23 = vld [vmem:[#allocation2 + $0xa4] sm:$0x1] }
 0x11f   : > { %1088 = vst [vmem:[#allocation2 + $0x34] sm:$0xf] %v807_v60  ;;  %v1005_v37 = vshrl.u32 %v738_v58, 16  ;;  %v1008_v0 = vshll.u32 %v738_v58, 16  ;;  %v1996_v2 = vrot.slane %v1994_v63, 1  ;;  %v675_v45 = vsel %vm5901_vm4, 0, %v674_v43 }
 0x120   : > { %1091 = vst [vmem:[#allocation2 + $0x38] sm:$0x1] %v1090_v61  ;;  %v810_v3 = vshrl.u32 %v715_v62, 16  ;;  %v813_v14 = vshll.u32 %v715_v62, 16  ;;  %v2224_v47 = vrot.slane %v5433_v38, 1  ;;  %v2225_v58 = vrot.slane %v6120_v49, 1 }
 0x121   : > { %v1007_v8 = vrot.slane %v1005_v37, 7  ;;  %v497_v10 = vpop.f32.mrf.mxu0  ;;  %v1997_v29 = vsel %vm1384_vm9, %v1992_v22, %v1996_v2  ;;  %676 = vst [vmem:[#allocation2 + $0x5c] sm:$0x1] %v675_v45  ;;  %v1096_v52 = vld [vmem:[#allocation2 + $0x44] sm:$0x1]  ;;  %v1942_v37 = vunpack.c.l.b16 %v1798_v23  ;;  %v2109_v2 = vshll.u32 %v6027_v17, 16 }
 0x122   : > { %v812_v12 = vrot.slane %v810_v3, 7  ;;  %v498_v19 = vadd.f32 %v5929_v7, %v497_v10  ;;  %2582 = vmatmul.bf16.gmra.mxu2 %v1997_v29  ;;  %v5054_v10 = vld [vmem:[#allocation8 + $0x60] sm:$0xff]  ;;  %v1099_v29 = vld [vmem:[#allocation2 + $0x48] sm:$0xf] }
 0x123   : > { %v1010_v27 = vor.u32 %v1008_v0, %v1007_v8  ;;  %v1012_v28 = vrot.slane %v1007_v8, 4  ;;  %v6163_v0 = vsel %vm1641_vm10, %v2224_v47, %v2225_v58  ;;  %2978 = vmatpush.bf16.msrb.mxu1 %v5054_v10  ;;  %v2111_v38 = vrot.slane %v2109_v2, 1  ;;  %v677_v47 = vld [vmem:[#allocation2 + $0x68] sm:$0x1] }
 0x124   : > { %v815_v9 = vor.u32 %v813_v14, %v812_v12  ;;  %v564_v30 = vmax.f32 %v498_v19, 0.0  ;;  %v816_v59 = vrot.slane %v812_v12, 4  ;;  %v621_v19 = vld [vmem:[#allocation2 + $0x60] sm:$0x1] }
 0x125   : > { %v1011_v31 = vsel %vm5973_vm8, %v1003_v6, %v1010_v27  ;;  %v1174_v33 = vsel %vm5894_vm2, %v1012_v28, %v1173_v15  ;;  %v6174_v15 = vpack.c.b16 %v1942_v37, %v1942_v37  ;;  %v622_v28 = vsel %vm5894_vm2, 0, %v621_v19 }
 0x126   : > { %v1093_v35 = vsel %vm5953_vm6, %v815_v9, %v1092_v26  ;;  %1172 = vst [vmem:[#allocation2 + $0xc4] sm:$0xf] %v1011_v31  ;;  %v716_v36 = vpack.c.bf16 %v564_v30, %v564_v30  ;;  %v6150_v40 = vld [vmem:[#allocation2 + $0x30] sm:$0xff]  }
 0x127   : > { %1094 = vst [vmem:[#allocation2 + $0x3c] sm:$0xf] %v1093_v35  ;;  %v1789_v39 = vld [vmem:[#allocation2 + $0x38] sm:$0x1]  ;;  %v2001_v55 = vshll.u32 %v6150_v40, 16  ;;  %2498 = vmatmul.bf16.gmra.mxu1 %v6150_v40  ;;  %v1999_v11 = vshrl.u32 %v6150_v40, 16 }
 0x128   : > { %1175 = vst [vmem:[#allocation2 + $0xc8] sm:$0x1] %v1174_v33  ;;  %v818_v16 = vshrl.u32 %v716_v36, 16  ;;  %v1933_v41 = vunpack.c.l.b16 %v1789_v39  ;;  %v821_v51 = vshll.u32 %v716_v36, 16  ;;  %v2107_v35 = vshrl.u32 %v6027_v17, 16 }
 0x129   : > { %v500_v44 = vpop.f32.mrf.mxu0  ;;  %v2003_v6 = vrot.slane %v2001_v55, 1  ;;  %623 = vst [vmem:[#allocation2 + $0x60] sm:$0x1] %v622_v28  ;;  %v678_v17 = vsel %vm5901_vm4, 0, %v677_v47 }
 0x12a   : > { %v820_v50 = vrot.slane %v818_v16, 7  ;;  %v501_v53 = vadd.f32 %v5929_v7, %v500_v44  ;;  %v6155_v54 = vpack.c.b16 %v1933_v41, %v1933_v41  ;;  %v2114_v44 = vshll.u32 %v6174_v15, 16  ;;  %679 = vst [vmem:[#allocation2 + $0x68] sm:$0x1] %v678_v17 }
 0x12b   : > { %v6179_v9 = vor.u32 %v2003_v6, %v1999_v11  ;;  %v1799_v6 = vld [vmem:[#allocation2 + $0xb0] sm:$0x1]  ;;  %v2119_v17 = vshrl.u32 %v6090_v48, 16 }
 0x12c   : > { %v823_v60 = vor.u32 %v821_v51, %v820_v50  ;;  %v825_v61 = vrot.slane %v820_v50, 4  ;;  %v565_v62 = vmax.f32 %v501_v53, 0.0  ;;  %2899 = vmatmul.bf16.gmra.mxu0 %v6136_v20  ;;  %v2006_v63 = vshll.u32 %v6155_v54, 16 }
 0x12d   : > { %v6169_v49 = vld [vmem:[#allocation2 + $0xc0] sm:$0xff]  }
 0x12e   : > { %v824_v22 = vsel %vm5973_vm8, %v816_v59, %v823_v60  ;;  %v1097_v3 = vsel %vm5894_vm2, %v825_v61, %v1096_v52  ;;  %v717_v5 = vpack.c.bf16 %v565_v62, %v565_v62  ;;  %2558 = vmatmul.bf16.gmra.mxu3 %v6169_v49  ;;  %v2008_v14 = vrot.slane %v2006_v63, 1  ;;  %v5435_v33 = vld [vmem:[#allocation2 + $0x3c] sm:$0xe]  ;;  %v1103_v61 = vld [vmem:[#allocation2 + $0x50] sm:$0x1] }
 0x12f   : > { %1095 = vst [vmem:[#allocation2 + $0x40] sm:$0xf] %v824_v22  ;;  %v2112_v62 = vor.u32 %v2111_v38, %v2107_v35  ;;  %v2116_v63 = vrot.slane %v2114_v44, 1  ;;  %v1106_v44 = vld [vmem:[#allocation2 + $0x54] sm:$0xf] }
 0x130   : > { %1098 = vst [vmem:[#allocation2 + $0x44] sm:$0x1] %v1097_v3  ;;  %v827_v8 = vshrl.u32 %v717_v5, 16  ;;  %v830_v26 = vshll.u32 %v717_v5, 16  ;;  %v2009_v36 = vsel %vm1384_vm9, %v6179_v9, %v2008_v14 }
 0x131   : > { %v502_v12 = vpop.f32.mrf.mxu0 }
 0x132   : > { %v829_v25 = vrot.slane %v827_v8, 7  ;;  %v503_v27 = vadd.f32 %v5929_v7, %v502_v12  ;;  %2587 = vmatmul.bf16.gmra.mxu2 %v2009_v36  ;;  %v6202_v36 = vld [vmem:[%s7466_s2] ss:$0 sm:$0xff] }
 0x134   : > { %v832_v30 = vor.u32 %v830_v26, %v829_v25  ;;  %v566_v31 = vmax.f32 %v503_v27, 0.0  ;;  %v833_v60 = vrot.slane %v829_v25, 4  ;;  %v1943_v26 = vunpack.c.l.b16 %v1799_v6 }
 0x136   : > { %v1100_v39 = vsel %vm5953_vm6, %v832_v30, %v1099_v29  ;;  %v718_v16 = vpack.c.bf16 %v566_v31, %v566_v31  ;;  %v1762_v41 = vld [vmem:[#allocation2 + $0x3c] sm:$0xff]   ;;  %v624_v31 = vld [vmem:[#allocation2 + $0x6c] sm:$0x1]  ;;  %v6213_v47 = vpack.c.b16 %v1943_v26, %v1943_v26 }
 0x137   : > { %v5434_v43 = vld [vmem:[#allocation2 + $0x3c] sm:$0xf0]  ;;  %1101 = vst [vmem:[#allocation2 + $0x48] sm:$0xf] %v1100_v39  ;;  %v1790_v45 = vld [vmem:[#allocation2 + $0x44] sm:$0x1]  ;;  %2503 = vmatmul.bf16.gmra.mxu1 %v1762_v41 }
 0x138   : > { %v835_v50 = vshrl.u32 %v718_v16, 16  ;;  %v1934_v51 = vunpack.c.l.b16 %v1790_v45  ;;  %v5436_v23 = vor.u32 %v5435_v33, %v5434_v43  ;;  %v838_v55 = vshll.u32 %v718_v16, 16  ;;  %v6205_v39 = vld [vmem:[#allocation2 + $0x24] sm:$0xff]   ;;  %7516 = vst [vmem:[#allocation19_spill] sm:$0xff] %v6213_v47 }
 0x139   : > { %v505_v53 = vpop.f32.mrf.mxu0  ;;  %v2013_v37 = vshll.u32 %v1762_v41, 16  ;;  %v2011_v10 = vshrl.u32 %v1762_v41, 16  ;;  %v6207_v16 = vld [vmem:[#allocation2 + $0x24] sm:$0xf0]  ;;  %v625_v41 = vsel %vm5894_vm2, 0, %v624_v31  ;;  %v2121_v43 = vshll.u32 %v6090_v48, 16 }
 0x13a   : > { %v837_v52 = vrot.slane %v835_v50, 7  ;;  %v506_v58 = vadd.f32 %v5929_v7, %v505_v53  ;;  %v1950_v59 = vpack.c.b16 %v1934_v51, %v1934_v51  ;;  %v2230_v8 = vrot.slane %v5436_v23, 1  ;;  %626 = vst [vmem:[#allocation2 + $0x6c] sm:$0x1] %v625_v41 }
 0x13b   : > { %v2015_v2 = vrot.slane %v2013_v37, 1 }
 0x13c   : > { %v840_v22 = vor.u32 %v838_v55, %v837_v52  ;;  %v842_v3 = vrot.slane %v837_v52, 4  ;;  %v567_v5 = vmax.f32 %v506_v58, 0.0  ;;  %2904 = vmatmul.bf16.gmra.mxu0 %v6067_v13  ;;  %v2018_v11 = vshll.u32 %v1950_v59, 16 }
 0x13d   : > { %v2231_v12 = vrot.slane %v1950_v59, 1  ;;  %v2016_v25 = vor.u32 %v2015_v2, %v2011_v10  ;;  %v2117_v13 = vsel %vm1384_vm9, %v2112_v62, %v2116_v63  ;;  %v2123_v52 = vrot.slane %v2121_v43, 1  ;;  %v5053_v62 = vld [vmem:[#allocation8 + $0x58] sm:$0xff] }
 0x13e   : > { %v841_v7 = vsel %vm5973_vm8, %v833_v60, %v840_v22  ;;  %v1104_v14 = vsel %vm5894_vm2, %v842_v3, %v1103_v61  ;;  %v719_v19 = vpack.c.bf16 %v567_v5, %v567_v5  ;;  %2632 = vmatmul.bf16.vlgmr.msra.gmra.mxu3 %v2117_v13  ;;  %v2020_v30 = vrot.slane %v2018_v11, 1  ;;  %v680_v63 = vld [vmem:[#allocation2 + $0x74] sm:$0x1]  ;;  %2979 = vmatpush.bf16.msrb.mxu1 %v5053_v62 }
 0x13f   : > { %1102 = vst [vmem:[#allocation2 + $0x4c] sm:$0xf] %v841_v7  ;;  %v6197_v28 = vsel %vm1641_vm10, %v2230_v8, %v2231_v12  ;;  %v2126_v55 = vshll.u32 %v6213_v47, 16  ;;  %v681_v48 = vsel %vm5901_vm4, 0, %v680_v63  ;;  %v1110_v8 = vld [vmem:[#allocation2 + $0x5c] sm:$0x1]  ;;  %v2124_v2 = vor.u32 %v2123_v52, %v2119_v17 }
 0x140   : > { %1105 = vst [vmem:[#allocation2 + $0x50] sm:$0x1] %v1104_v14  ;;  %v844_v27 = vshrl.u32 %v719_v19, 16  ;;  %v847_v35 = vshll.u32 %v719_v19, 16  ;;  %v2021_v45 = vsel %vm1384_vm9, %v2016_v25, %v2020_v30  ;;  %v1800_v25 = vld [vmem:[#allocation2 + $0xbc] sm:$0x1] }
 0x141   : > { %v507_v29 = vpop.f32.mrf.mxu0  ;;  %682 = vst [vmem:[#allocation2 + $0x74] sm:$0x1] %v681_v48  ;;  %v2128_v11 = vrot.slane %v2126_v55, 1  ;;  %v1944_v31 = vunpack.c.l.b16 %v1800_v25  ;;  %v1113_v55 = vld [vmem:[#allocation2 + $0x60] sm:$0xf] }
 0x142   : > { %v846_v33 = vrot.slane %v844_v27, 7  ;;  %v508_v38 = vadd.f32 %v6202_v36, %v507_v29  ;;  %2592 = vmatmul.bf16.gmra.mxu2 %v2021_v45  ;;  %v2133_v45 = vshll.u32 %v6124_v56, 16  ;;  %v5226_v47 = vld [vmem:[#allocation2] sm:$0xf0] }
 0x144   : > { %v849_v50 = vor.u32 %v847_v35, %v846_v33  ;;  %v568_v51 = vmax.f32 %v508_v38, 0.0  ;;  %v850_v12 = vrot.slane %v846_v33, 4  ;;  %v2129_v35 = vsel %vm1384_vm9, %v2124_v2, %v2128_v11  ;;  %v5089_v38 = vld [vmem:[#allocation8 + $0x178] sm:$0xff]  ;;  %v5087_v11 = vld [vmem:[#allocation8 + $0x168] sm:$0xff] }
 0x145   : > { %2653 = vmatpush.bf16.msrb.mxu3 %v5089_v38 }
 0x146   : > { %v1107_v53 = vsel %vm5953_vm6, %v849_v50, %v1106_v44  ;;  %v720_v23 = vpack.c.bf16 %v568_v51, %v568_v51  ;;  %v6219_v60 = vld [vmem:[#allocation2 + $0x48] sm:$0xff]   ;;  %v627_v50 = vld [vmem:[#allocation2 + $0x78] sm:$0x1] }
 0x147   : > { %1108 = vst [vmem:[#allocation2 + $0x54] sm:$0xf] %v1107_v53  ;;  %v1791_v58 = vld [vmem:[#allocation2 + $0x50] sm:$0x1]  ;;  %v2025_v10 = vshll.u32 %v6219_v60, 16  ;;  %2508 = vmatmul.bf16.gmra.mxu1 %v6219_v60  ;;  %v2023_v41 = vshrl.u32 %v6219_v60, 16 }
 0x148   : > { %v852_v59 = vshrl.u32 %v720_v23, 16  ;;  %v1935_v61 = vunpack.c.l.b16 %v1791_v58  ;;  %v855_v3 = vshll.u32 %v720_v23, 16  ;;  %v5088_v23 = vld [vmem:[#allocation8 + $0x170] sm:$0xff]  ;;  %v628_v52 = vsel %vm5894_vm2, 0, %v627_v50 }
 0x149   : > { %v510_v37 = vpop.f32.mrf.mxu0  ;;  %v2027_v30 = vrot.slane %v2025_v10, 1  ;;  %629 = vst [vmem:[#allocation2 + $0x78] sm:$0x1] %v628_v52  ;;  %2654 = vmatpush.bf16.msrb.mxu3 %v5088_v23 }
 0x14a   : > { %v854_v22 = vrot.slane %v852_v59, 7  ;;  %v511_v5 = vadd.f32 %v6202_v36, %v510_v37  ;;  %v6224_v6 = vpack.c.b16 %v1935_v61, %v1935_v61  ;;  %v6242_v59 = vpack.c.b16 %v1944_v31, %v1944_v31 }
 0x14b   : > { %v6240_v58 = vor.u32 %v2027_v30, %v2023_v41  ;;  %v1117_v30 = vld [vmem:[#allocation2 + $0x68] sm:$0x1] }
 0x14c   : > { %v857_v7 = vor.u32 %v855_v3, %v854_v22  ;;  %v859_v14 = vrot.slane %v854_v22, 4  ;;  %v569_v19 = vmax.f32 %v511_v5, 0.0  ;;  %2909 = vmatmul.bf16.gmra.mxu0 %v6205_v39  ;;  %v2030_v26 = vshll.u32 %v6224_v6, 16  ;;  %7517 = vst [vmem:[#allocation20_spill] sm:$0xff] %v6242_v59 }
 0x14d   : > { %v2131_v5 = vshrl.u32 %v6124_v56, 16  ;;  %v2138_v10 = vshll.u32 %v6242_v59, 16  ;;  %2655 = vmatpush.bf16.msrb.mxu3 %v5087_v11  ;;  %v5086_v56 = vld [vmem:[#allocation8 + $0x160] sm:$0xff] }
 0x14e   : > { %v858_v27 = vsel %vm5973_vm8, %v850_v12, %v857_v7  ;;  %v1111_v13 = vsel %vm5894_vm2, %v859_v14, %v1110_v8  ;;  %v721_v29 = vpack.c.bf16 %v569_v19, %v569_v19  ;;  %2637 = vmatmul.bf16.gmra.mxu3 %v2129_v35  ;;  %v2032_v44 = vrot.slane %v2030_v26, 1  ;;  %v683_v14 = vld [vmem:[#allocation2 + $0x80] sm:$0x1] }
 0x14f   : > { %1109 = vst [vmem:[#allocation2 + $0x58] sm:$0xf] %v858_v27  ;;  %v2135_v8 = vrot.slane %v2133_v45, 1  ;;  %v684_v25 = vsel %vm5901_vm4, 0, %v683_v14  ;;  %v1801_v45 = vld [vmem:[#allocation2 + $0xc8] sm:$0x1] }
 0x150   : > { %1112 = vst [vmem:[#allocation2 + $0x5c] sm:$0x1] %v1111_v13  ;;  %v861_v33 = vshrl.u32 %v721_v29, 16  ;;  %v864_v17 = vshll.u32 %v721_v29, 16  ;;  %v2033_v63 = vsel %vm1384_vm9, %v6240_v58, %v2032_v44  ;;  %v6265_v11 = vld [vmem:[#allocation2 + $0x3c] sm:$0xff]  }
 0x151   : > { %v512_v43 = vpop.f32.mrf.mxu0  ;;  %685 = vst [vmem:[#allocation2 + $0x80] sm:$0x1] %v684_v25  ;;  %v2136_v31 = vor.u32 %v2135_v8, %v2131_v5  ;;  %2656 = vmatpush.bf16.msrb.mxu3 %v5086_v56  ;;  %v630_v5 = vld [vmem:[#allocation2 + $0x84] sm:$0x1]  ;;  %v1120_v25 = vld [vmem:[#allocation2 + $0x6c] sm:$0xf] }
 0x152   : > { %v863_v51 = vrot.slane %v861_v33, 7  ;;  %v513_v53 = vadd.f32 %v6202_v36, %v512_v43  ;;  %2597 = vmatmul.bf16.gmra.mxu2 %v2033_v63  ;;  %v2140_v33 = vrot.slane %v2138_v10, 1  ;;  %v5085_v63 = vld [vmem:[#allocation8 + $0x158] sm:$0xff]  ;;  %v631_v14 = vsel %vm5894_vm2, 0, %v630_v5 }
 0x153   : > { %632 = vst [vmem:[#allocation2 + $0x84] sm:$0x1] %v631_v14 }
 0x154   : > { %v866_v61 = vor.u32 %v864_v17, %v863_v51  ;;  %v570_v62 = vmax.f32 %v513_v53, 0.0  ;;  %v867_v38 = vrot.slane %v863_v51, 4 }
 0x155   : > { %2657 = vmatpush.bf16.msrb.mxu3 %v5085_v63 }
 0x156   : > { %v1114_v37 = vsel %vm5953_vm6, %v866_v61, %v1113_v55  ;;  %v722_v48 = vpack.c.bf16 %v570_v62, %v570_v62  ;;  %v1766_v22 = vld [vmem:[#allocation2 + $0x54] sm:$0xff]   ;;  %v1945_v61 = vunpack.c.l.b16 %v1801_v45 }
 0x157   : > { %v6248_v3 = vld [vmem:[#allocation2 + $0x54] sm:$0xf0]  ;;  %1115 = vst [vmem:[#allocation2 + $0x60] sm:$0xf] %v1114_v37  ;;  %v1792_v2 = vld [vmem:[#allocation2 + $0x5c] sm:$0x1]  ;;  %2513 = vmatmul.bf16.gmra.mxu1 %v1766_v22 }
 0x158   : > { %v869_v12 = vshrl.u32 %v722_v48, 16  ;;  %v1936_v7 = vunpack.c.l.b16 %v1792_v2  ;;  %v872_v27 = vshll.u32 %v722_v48, 16  ;;  %v2037_v35 = vshll.u32 %v1766_v22, 16  ;;  %v5052_v37 = vld [vmem:[#allocation8 + $0x50] sm:$0xff] }
 0x159   : > { %v515_v19 = vpop.f32.mrf.mxu0  ;;  %v2035_v50 = vshrl.u32 %v1766_v22, 16  ;;  %2980 = vmatpush.bf16.msrb.mxu1 %v5052_v37 }
 0x15a   : > { %v871_v26 = vrot.slane %v869_v12, 7  ;;  %v516_v13 = vadd.f32 %v6202_v36, %v515_v19  ;;  %v6255_v29 = vpack.c.b16 %v1936_v7, %v1936_v7  ;;  %v2039_v17 = vrot.slane %v2037_v35, 1  ;;  %v6267_v12 = vld [vmem:[#allocation2 + $0x3c] sm:$0xf0]  ;;  %v5084_v7 = vld [vmem:[#allocation8 + $0x150] sm:$0xff] }
 0x15b   : > { %v2145_v19 = vshll.u32 %v6169_v49, 16  ;;  %2658 = vmatpush.bf16.msrb.mxu3 %v5084_v7 }
 0x15c   : > { %v874_v41 = vor.u32 %v872_v27, %v871_v26  ;;  %v876_v43 = vrot.slane %v871_v26, 4  ;;  %v571_v44 = vmax.f32 %v516_v13, 0.0  ;;  %2914 = vmatmul.bf16.gmra.mxu0 %v6150_v40  ;;  %v2042_v53 = vshll.u32 %v6255_v29, 16 }
 0x15d   : > { %v2040_v51 = vor.u32 %v2039_v17, %v2035_v50  ;;  %v2141_v40 = vsel %vm1384_vm9, %v2136_v31, %v2140_v33  ;;  %v6273_v27 = vpack.c.b16 %v1945_v61, %v1945_v61  ;;  %v2147_v35 = vrot.slane %v2145_v19, 1  ;;  %v5083_v50 = vld [vmem:[#allocation8 + $0x148] sm:$0xff]  ;;  %v686_v17 = vld [vmem:[#allocation2 + $0x8c] sm:$0x1]  ;;  %v5082_v61 = vld [vmem:[#allocation8 + $0x140] sm:$0xff] }
 0x15e   : > { %v875_v23 = vsel %vm5973_vm8, %v867_v38, %v874_v41  ;;  %v1118_v52 = vsel %vm5894_vm2, %v876_v43, %v1117_v30  ;;  %v723_v55 = vpack.c.bf16 %v571_v44, %v571_v44  ;;  %2642 = vmatmul.bf16.gmra.mxu3 %v2141_v40  ;;  %v2044_v22 = vrot.slane %v2042_v53, 1 }
 0x15f   : > { %1116 = vst [vmem:[#allocation2 + $0x64] sm:$0xf] %v875_v23  ;;  %v2143_v30 = vshrl.u32 %v6169_v49, 16  ;;  %v2150_v38 = vshll.u32 %v6273_v27, 16  ;;  %v687_v49 = vsel %vm5901_vm4, 0, %v686_v17  ;;  %2659 = vmatpush.bf16.msrb.mxu3 %v5083_v50 }
 0x160   : > { %1119 = vst [vmem:[#allocation2 + $0x68] sm:$0x1] %v1118_v52  ;;  %v878_v62 = vshrl.u32 %v723_v55, 16  ;;  %v881_v10 = vshll.u32 %v723_v55, 16  ;;  %v2045_v26 = vsel %vm1384_vm9, %v2040_v51, %v2044_v22 }
 0x161   : > { %v517_v48 = vpop.f32.mrf.mxu0  ;;  %7518 = vst [vmem:[#allocation21_spill] sm:$0xff] %v6273_v27  ;;  %v2148_v63 = vor.u32 %v2147_v35, %v2143_v30  ;;  %v2152_v37 = vrot.slane %v2150_v38, 1 }
 0x162   : > { %v880_v8 = vrot.slane %v878_v62, 7  ;;  %v518_v2 = vadd.f32 %v6202_v36, %v517_v48  ;;  %2602 = vmatmul.bf16.gmra.mxu2 %v2045_v26  ;;  %688 = vst [vmem:[#allocation2 + $0x8c] sm:$0x1] %v687_v49  ;;  %v1124_v62 = vld [vmem:[#allocation2 + $0x74] sm:$0x1] }
 0x163   : > { %2660 = vmatpush.bf16.msrb.mxu3 %v5082_v61  ;;  %v5438_v61 = vld [vmem:[#allocation2 + $0x54] sm:$0xe] }
 0x164   : > { %v883_v13 = vor.u32 %v881_v10, %v880_v8  ;;  %v572_v56 = vmax.f32 %v518_v2, 0.0  ;;  %v884_v48 = vrot.slane %v880_v8, 4  ;;  %v2153_v8 = vsel %vm1384_vm9, %v2148_v63, %v2152_v37  ;;  %v5065_v63 = vld [vmem:[#allocation8 + $0xb8] sm:$0xff] }
 0x165   : > { %3064 = vmatpush.bf16.msrb.mxu2 %v5065_v63 }
 0x166   : > { %v1121_v31 = vsel %vm5953_vm6, %v883_v13, %v1120_v25  ;;  %v724_v33 = vpack.c.bf16 %v572_v56, %v572_v56  ;;  %v6279_v44 = vld [vmem:[#allocation2 + $0x60] sm:$0xff]   ;;  %v633_v13 = vld [vmem:[#allocation2 + $0x90] sm:$0x1] }
 0x167   : > { %1122 = vst [vmem:[#allocation2 + $0x6c] sm:$0xf] %v1121_v31  ;;  %v1793_v41 = vld [vmem:[#allocation2 + $0x68] sm:$0x1]  ;;  %v2049_v40 = vshll.u32 %v6279_v44, 16  ;;  %2518 = vmatmul.bf16.gmra.mxu1 %v6279_v44  ;;  %v2047_v56 = vshrl.u32 %v6279_v44, 16 }
 0x168   : > { %v886_v43 = vshrl.u32 %v724_v33, 16  ;;  %v1937_v45 = vunpack.c.l.b16 %v1793_v41  ;;  %v889_v52 = vshll.u32 %v724_v33, 16  ;;  %v634_v33 = vsel %vm5894_vm2, 0, %v633_v13 }
 0x169   : > { %v520_v53 = vpop.f32.mrf.mxu0  ;;  %v2051_v25 = vrot.slane %v2049_v40, 1  ;;  %635 = vst [vmem:[#allocation2 + $0x90] sm:$0x1] %v634_v33  ;;  %v5051_v40 = vld [vmem:[#allocation8 + $0x48] sm:$0xff] }
 0x16a   : > { %v888_v23 = vrot.slane %v886_v43, 7  ;;  %v521_v55 = vadd.f32 %v6202_v36, %v520_v53  ;;  %v6284_v51 = vpack.c.b16 %v1937_v45, %v1937_v45  ;;  %v1127_v43 = vld [vmem:[#allocation2 + $0x78] sm:$0xf]  ;;  %2981 = vmatpush.bf16.msrb.mxu1 %v5051_v40 }
 0x16b   : > { %v6299_v45 = vor.u32 %v2051_v25, %v2047_v56  ;;  %v5439_v56 = vor.u32 %v5438_v61, %v6248_v3 }
 0x16c   : > { %v891_v22 = vor.u32 %v889_v52, %v888_v23  ;;  %v893_v5 = vrot.slane %v888_v23, 4  ;;  %v573_v10 = vmax.f32 %v521_v55, 0.0  ;;  %2919 = vmatmul.bf16.gmra.mxu0 %v6265_v11  ;;  %v2054_v2 = vshll.u32 %v6284_v51, 16 }
 0x16e   : > { %v892_v7 = vsel %vm5973_vm8, %v884_v48, %v891_v22  ;;  %v1125_v14 = vsel %vm5894_vm2, %v893_v5, %v1124_v62  ;;  %v725_v19 = vpack.c.bf16 %v573_v10, %v573_v10  ;;  %2647 = vmatmul.bf16.gmra.mxu3 %v2153_v8  ;;  %v2056_v31 = vrot.slane %v2054_v2, 1  ;;  %v689_v5 = vld [vmem:[#allocation2 + $0x98] sm:$0x1]  ;;  %v1131_v8 = vld [vmem:[#allocation2 + $0x80] sm:$0x1] }
 0x16f   : > { %1123 = vst [vmem:[#allocation2 + $0x70] sm:$0xf] %v892_v7  ;;  %v690_v2 = vsel %vm5901_vm4, 0, %v689_v5  ;;  %v1134_v5 = vld [vmem:[#allocation2 + $0x84] sm:$0xf] }
 0x170   : > { %1126 = vst [vmem:[#allocation2 + $0x74] sm:$0x1] %v1125_v14  ;;  %v895_v26 = vshrl.u32 %v725_v19, 16  ;;  %v898_v38 = vshll.u32 %v725_v19, 16  ;;  %v2057_v53 = vsel %vm1384_vm9, %v6299_v45, %v2056_v31 }
 0x171   : > { %v522_v30 = vpop.f32.mrf.mxu0  ;;  %691 = vst [vmem:[#allocation2 + $0x98] sm:$0x1] %v690_v2 }
 0x172   : > { %v897_v35 = vrot.slane %v895_v26, 7  ;;  %v523_v41 = vadd.f32 %v6202_v36, %v522_v30  ;;  %2607 = vmatmul.bf16.gmra.mxu2 %v2057_v53 }
 0x174   : > { %v900_v50 = vor.u32 %v898_v38, %v897_v35  ;;  %v574_v17 = vmax.f32 %v523_v41, 0.0  ;;  %v6307_v48 = vpop.f32.mrf.mxu1  ;;  %v901_v26 = vrot.slane %v897_v35, 4 }
 0x176   : > { %v1128_v49 = vsel %vm5953_vm6, %v900_v50, %v1127_v43  ;;  %v726_v23 = vpack.c.bf16 %v574_v17, %v574_v17  ;;  %v1770_v52 = vld [vmem:[#allocation2 + $0x6c] sm:$0xff]   ;;  %v2236_v50 = vrot.slane %v5439_v56, 1  ;;  %v2237_v17 = vrot.slane %v6255_v29, 1 }
 0x177   : > { %v6305_v55 = vld [vmem:[#allocation2 + $0x6c] sm:$0xf0]  ;;  %1129 = vst [vmem:[#allocation2 + $0x78] sm:$0xf] %v1128_v49  ;;  %v1794_v62 = vld [vmem:[#allocation2 + $0x74] sm:$0x1]  ;;  %2523 = vmatmul.bf16.gmra.mxu1 %v1770_v52 }
 0x178   : > { %v903_v37 = vshrl.u32 %v726_v23, 16  ;;  %v1938_v22 = vunpack.c.l.b16 %v1794_v62  ;;  %v906_v14 = vshll.u32 %v726_v23, 16  ;;  %v2061_v13 = vshll.u32 %v1770_v52, 16 }
 0x179   : > { %v525_v10 = vpop.f32.mrf.mxu0  ;;  %v2059_v38 = vshrl.u32 %v1770_v52, 16  ;;  %v6323_v23 = vsel %vm1641_vm10, %v2236_v50, %v2237_v17 }
 0x17a   : > { %v905_v7 = vrot.slane %v903_v37, 7  ;;  %v526_v19 = vadd.f32 %v6202_v36, %v525_v10  ;;  %v6312_v25 = vpack.c.b16 %v1938_v22, %v1938_v22  ;;  %v2063_v41 = vrot.slane %v2061_v13, 1  ;;  %v6329_v37 = vld [vmem:[#allocation2 + $0x54] sm:$0xff]   ;;  %v5064_v13 = vld [vmem:[#allocation8 + $0xb0] sm:$0xff] }
 0x17b   : > { %v6331_v22 = vld [vmem:[#allocation2 + $0x54] sm:$0xf0]  ;;  %3065 = vmatpush.bf16.msrb.mxu2 %v5064_v13 }
 0x17c   : > { %v908_v30 = vor.u32 %v906_v14, %v905_v7  ;;  %v910_v31 = vrot.slane %v905_v7, 4  ;;  %v575_v33 = vmax.f32 %v526_v19, 0.0  ;;  %2924 = vmatmul.bf16.gmra.mxu0 %v6219_v60  ;;  %v2066_v43 = vshll.u32 %v6312_v25, 16  ;;  %v6325_v52 = vpop.f32.mrf.mxu1 }
 0x17d   : > { %v2064_v3 = vor.u32 %v2063_v41, %v2059_v38  ;;  %v5259_v38 = vld [vmem:[#allocation2 + $0x18] sm:$0xe]  ;;  %v2243_v46 = vrot.slane %v6312_v25, 1 }
 0x17e   : > { %v909_v35 = vsel %vm5973_vm8, %v901_v26, %v908_v30  ;;  %v1132_v53 = vsel %vm5894_vm2, %v910_v31, %v1131_v8  ;;  %v727_v49 = vpack.c.bf16 %v575_v33, %v575_v33  ;;  %2661 = vmatmul.bf16.vlgmr.msrb.gmra.mxu3 %v6073_v24  ;;  %v2068_v29 = vrot.slane %v2066_v43, 1  ;;  %v5258_v26 = vld [vmem:[#allocation2 + $0x18] sm:$0xf0] }
 0x17f   : > { %1130 = vst [vmem:[#allocation2 + $0x7c] sm:$0xf] %v909_v35  ;;  %v5050_v8 = vld [vmem:[#allocation8 + $0x40] sm:$0xff]  ;;  %v5260_v35 = vor.u32 %v5259_v38, %v5258_v26 }
 0x180   : > { %1133 = vst [vmem:[#allocation2 + $0x80] sm:$0x1] %v1132_v53  ;;  %v912_v60 = vshrl.u32 %v727_v49, 16  ;;  %v915_v40 = vshll.u32 %v727_v49, 16  ;;  %v2069_v10 = vsel %vm1384_vm9, %v2064_v3, %v2068_v29  ;;  %v6334_v14 = vpop.f32.mrf.mxu3  ;;  %2982 = vmatpush.bf16.msrb.mxu1 %v5050_v8 }
 0x181   : > { %v527_v61 = vpop.f32.mrf.mxu0 }
 0x182   : > { %v914_v62 = vrot.slane %v912_v60, 7  ;;  %v528_v63 = vadd.f32 %v6202_v36, %v527_v61  ;;  %2612 = vmatmul.bf16.gmra.mxu2 %v2069_v10  ;;  %v1138_v61 = vld [vmem:[#allocation2 + $0x8c] sm:$0x1] }
 0x184   : > { %v917_v2 = vor.u32 %v915_v40, %v914_v62  ;;  %v576_v7 = vmax.f32 %v528_v63, 0.0  ;;  %v6338_v31 = vpop.f32.mrf.mxu1  ;;  %v2222_v40 = vrot.slane %v6079_v32, 1  ;;  %v5063_v63 = vld [vmem:[#allocation8 + $0xa8] sm:$0xff]  ;;  %v2221_v32 = vrot.slane %v5260_v35, 1 }
 0x185   : > { %v2573_v50 = vpop.f32.mrf.mxu2  ;;  %3066 = vmatpush.bf16.msrb.mxu2 %v5063_v63 }
 0x186   : > { %v1135_v19 = vsel %vm5953_vm6, %v917_v2, %v1134_v5  ;;  %v728_v24 = vpack.c.bf16 %v576_v7, %v576_v7  ;;  %v6340_v33 = vld [vmem:[#allocation2 + $0x78] sm:$0xff]   ;;  %v6343_v49 = vadd.f32 %v2573_v50, %v6307_v48  ;;  %v918_v5 = vrot.slane %v914_v62, 4 }
 0x187   : > { %1136 = vst [vmem:[#allocation2 + $0x84] sm:$0xf] %v1135_v19  ;;  %v1795_v56 = vld [vmem:[#allocation2 + $0x80] sm:$0x1]  ;;  %v2073_v29 = vshll.u32 %v6340_v33, 16  ;;  %2528 = vmatmul.bf16.gmra.mxu1 %v6340_v33  ;;  %v2223_v38 = vsel %vm1641_vm10, %v2221_v32, %v2222_v40 }
 0x188   : > { %v920_v30 = vshrl.u32 %v728_v24, 16  ;;  %v1939_v41 = vunpack.c.l.b16 %v1795_v56  ;;  %v923_v43 = vshll.u32 %v728_v24, 16  ;;  %v6351_v19 = vpop.f32.mrf.mxu3 }
 0x189   : > { %v530_v17 = vpop.f32.mrf.mxu0  ;;  %v2075_v62 = vrot.slane %v2073_v29, 1  ;;  %v1141_v29 = vld [vmem:[#allocation2 + $0x90] sm:$0xf] }
 0x18a   : > { %v922_v53 = vrot.slane %v920_v30, 7  ;;  %v531_v3 = vadd.f32 %v6202_v36, %v530_v17  ;;  %v6346_v60 = vpack.c.b16 %v1939_v41, %v1939_v41  ;;  %v2071_v41 = vshrl.u32 %v6340_v33, 16 }
 0x18c   : > { %v925_v10 = vor.u32 %v923_v43, %v922_v53  ;;  %v927_v2 = vrot.slane %v922_v53, 4  ;;  %v577_v7 = vmax.f32 %v531_v3, 0.0  ;;  %2929 = vmatmul.bf16.gmra.mxu0 %v6329_v37  ;;  %v2078_v48 = vshll.u32 %v6346_v60, 16  ;;  %v6359_v30 = vpop.f32.mrf.mxu1 }
 0x18d   : > { %v2575_v43 = vpop.f32.mrf.mxu2  ;;  %v6367_v63 = vor.u32 %v2075_v62, %v2071_v41 }
 0x18e   : > { %v926_v24 = vsel %vm5973_vm8, %v918_v5, %v925_v10  ;;  %v1139_v26 = vsel %vm5894_vm2, %v927_v2, %v1138_v61  ;;  %v729_v8 = vpack.c.bf16 %v577_v7, %v577_v7  ;;  %2666 = vmatmul.bf16.gmra.mxu3 %v2223_v38  ;;  %v2080_v17 = vrot.slane %v2078_v48, 1  ;;  %v5062_v61 = vld [vmem:[#allocation8 + $0xa0] sm:$0xff]  ;;  %v5441_v7 = vld [vmem:[#allocation2 + $0x6c] sm:$0xe] }
 0x18f   : > { %1137 = vst [vmem:[#allocation2 + $0x88] sm:$0xf] %v926_v24  ;;  %v6364_v3 = vadd.f32 %v2575_v43, %v6325_v52  ;;  %3067 = vmatpush.bf16.msrb.mxu2 %v5062_v61  ;;  %v5105_v61 = vld [vmem:[#allocation8 + $0x1f8] sm:$0xff] }
 0x190   : > { %1140 = vst [vmem:[#allocation2 + $0x8c] sm:$0x1] %v1139_v26  ;;  %v929_v13 = vshrl.u32 %v729_v8, 16  ;;  %v932_v56 = vshll.u32 %v729_v8, 16  ;;  %v6369_v2 = vpop.f32.mrf.mxu3  ;;  %v2081_v40 = vsel %vm1384_vm9, %v6367_v63, %v2080_v17  ;;  %v5061_v26 = vld [vmem:[#allocation8 + $0x98] sm:$0xff]  ;;  %3964 = vmatpush.bf16.msra.mxu0 %v5105_v61 }
 0x191   : > { %v532_v50 = vpop.f32.mrf.mxu0  ;;  %7519 = vst [vmem:[#allocation22_spill] sm:$0xff] %v6367_v63  ;;  %v5097_v8 = vld [vmem:[#allocation8 + $0x1b8] sm:$0xff] }
 0x192   : > { %v931_v53 = vrot.slane %v929_v13, 7  ;;  %v533_v35 = vadd.f32 %v6202_v36, %v532_v50  ;;  %2617 = vmatmul.bf16.gmra.mxu2 %v2081_v40  ;;  %3875 = vmatpush.bf16.msra.mxu3 %v5097_v8 }
 0x193   : > { %3068 = vmatpush.bf16.msrb.mxu2 %v5061_v26  ;;  %v5442_v26 = vor.u32 %v5441_v7, %v6305_v55 }
 0x194   : > { %v934_v5 = vor.u32 %v932_v56, %v931_v53  ;;  %v578_v10 = vmax.f32 %v533_v35, 0.0  ;;  %v6377_v13 = vpop.f32.mrf.mxu1  ;;  %v5060_v35 = vld [vmem:[#allocation8 + $0x90] sm:$0xff]  ;;  %v935_v8 = vrot.slane %v931_v53, 4 }
 0x195   : > { %v2578_v38 = vpop.f32.mrf.mxu2 }
 0x196   : > { %v1142_v48 = vsel %vm5953_vm6, %v934_v5, %v1141_v29  ;;  %v730_v52 = vpack.c.bf16 %v578_v10, %v578_v10  ;;  %v1774_v24 = vld [vmem:[#allocation2 + $0x84] sm:$0xff]   ;;  %v6382_v50 = vadd.f32 %v2578_v38, %v6338_v31  ;;  %v1145_v5 = vld [vmem:[#allocation2 + $0x98] sm:$0x1] }
 0x197   : > { %v6375_v36 = vld [vmem:[#allocation2 + $0x84] sm:$0xf0]  ;;  %1143 = vst [vmem:[#allocation2 + $0x90] sm:$0xf] %v1142_v48  ;;  %v1796_v32 = vld [vmem:[#allocation2 + $0x8c] sm:$0x1]  ;;  %2533 = vmatmul.bf16.gmra.mxu1 %v1774_v24  ;;  %3069 = vmatpush.bf16.msrb.mxu2 %v5060_v35 }
 0x198   : > { %v937_v62 = vshrl.u32 %v730_v52, 16  ;;  %v1940_v56 = vunpack.c.l.b16 %v1796_v32  ;;  %v940_v43 = vshll.u32 %v730_v52, 16  ;;  %v653_v29 = vld [vmem:[#allocation2 + $0x8] sm:$0x1]  ;;  %v2085_v10 = vshll.u32 %v1774_v24, 16  ;;  %v5113_v48 = vld [vmem:[#allocation8 + $0x238] sm:$0xff] }
 0x199   : > { %v6379_v41 = vpop.f32.mrf.mxu0  ;;  %v654_v40 = vsel %vm5901_vm4, 0, %v653_v29  ;;  %v2083_v31 = vshrl.u32 %v1774_v24, 16  ;;  %4053 = vmatpush.bf16.msra.mxu1 %v5113_v48  ;;  %v2242_v29 = vrot.slane %v5442_v26, 1  ;;  %v5058_v35 = vld [vmem:[#allocation8 + $0x80] sm:$0xff]  ;;  %v5261_v48 = vld [vmem:[#allocation2 + $0x30] sm:$0xf0] }
 0x19a   : > { %v939_v34 = vrot.slane %v937_v62, 7  ;;  %v6384_v17 = vpack.c.b16 %v1940_v56, %v1940_v56  ;;  %v6389_v62 = vpop.f32.mrf.mxu3  ;;  %655 = vst [vmem:[#allocation2 + $0x8] sm:$0x1] %v654_v40  ;;  %v5059_v56 = vld [vmem:[#allocation8 + $0x88] sm:$0xff]  ;;  %v2087_v38 = vrot.slane %v2085_v10, 1 }
 0x19b   : > { %v6399_v7 = vsel %vm1641_vm10, %v2242_v29, %v2243_v46  ;;  %3070 = vmatpush.bf16.msrb.mxu2 %v5059_v56  ;;  %v6410_v10 = vld [vmem:[#allocation2 + $0x6c] sm:$0xf0] }
 0x19c   : > { %v942_v32 = vor.u32 %v940_v43, %v939_v34  ;;  %v944_v52 = vrot.slane %v939_v34, 4  ;;  %2934 = vmatmul.bf16.gmra.mxu0 %v6279_v44  ;;  %v2090_v27 = vshll.u32 %v6384_v17, 16  ;;  %v2088_v44 = vor.u32 %v2087_v38, %v2083_v31  ;;  %v2496_v24 = vpop.f32.mrf.mxu1  ;;  %7521 = vst [vmem:[#allocation24_spill] sm:$0xff] %v6410_v10  ;;  %v5262_v31 = vld [vmem:[#allocation2 + $0x30] sm:$0xe] }
 0x19d   : > { %v2580_v34 = vpop.f32.mrf.mxu2  ;;  %v5263_v38 = vor.u32 %v5262_v31, %v5261_v48 }
 0x19e   : > { %v943_v55 = vsel %vm5973_vm8, %v935_v8, %v942_v32  ;;  %v1146_v53 = vsel %vm5894_vm2, %v944_v52, %v1145_v5  ;;  %2671 = vmatmul.bf16.gmra.mxu3 %v6163_v0  ;;  %v2092_v25 = vrot.slane %v2090_v27, 1  ;;  %v6405_v1 = vadd.f32 %v2580_v34, %v6359_v30  ;;  %v6408_v5 = vld [vmem:[#allocation2 + $0x6c] sm:$0xff]  }
 0x19f   : > { %1144 = vst [vmem:[#allocation2 + $0x94] sm:$0xf] %v943_v55  ;;  %3071 = vmatpush.bf16.msrb.mxu2 %v5058_v35 }
 0x1a0   : > { %1147 = vst [vmem:[#allocation2 + $0x98] sm:$0x1] %v1146_v53  ;;  %v2093_v61 = vsel %vm1384_vm9, %v2088_v44, %v2092_v25  ;;  %v5425_v53 = vld [vmem:[#allocation2] sm:$0xff]   ;;  %v2228_v25 = vrot.slane %v6155_v54, 1 }
 0x1a1   : > { %v6402_v43 = vpop.f32.mrf.mxu0  ;;  %v1208_v40 = vld [vmem:[#allocation2 + $0x8] sm:$0x1]  ;;  %v1388_v44 = vshll.u32 %v5425_v53, 16  ;;  %v1386_v48 = vshrl.u32 %v5425_v53, 16 }
 0x1a2   : > { %7520 = vst [vmem:[#allocation23_spill] sm:$0xff] %v6402_v43  ;;  %v6412_v46 = vpop.f32.mrf.mxu3  ;;  %2622 = vmatmul.bf16.gmra.mxu2 %v2093_v61  ;;  %v1352_v30 = vunpack.c.l.b16 %v1208_v40  ;;  %v6465_v43 = vld [vmem:[#allocation2 + $0x84] sm:$0xff]  }
 0x1a4   : > { %v2499_v26 = vpop.f32.mrf.mxu1  ;;  %v1368_v35 = vpack.c.b16 %v1352_v30, %v1352_v30 }
 0x1a5   : > { %v2583_v32 = vpop.f32.mrf.mxu2 }
 0x1a6   : > { %v6414_v8 = vld [vmem:[#allocation2 + $0x90] sm:$0xff]   ;;  %v6419_v56 = vadd.f32 %v2583_v32, %v6377_v13  ;;  %v2227_v13 = vrot.slane %v5263_v38, 1  ;;  %v1393_v31 = vshll.u32 %v1368_v35, 16 }
 0x1a7   : > { %v1797_v0 = vld [vmem:[#allocation2 + $0x98] sm:$0x1]  ;;  %v2097_v55 = vshll.u32 %v6414_v8, 16  ;;  %2538 = vmatmul.bf16.gmra.mxu1 %v6414_v8  ;;  %v2095_v42 = vshrl.u32 %v6414_v8, 16 }
 0x1a8   : > { %v1941_v27 = vunpack.c.l.b16 %v1797_v0  ;;  %v1390_v0 = vrot.slane %v1388_v44, 1  ;;  %v2229_v32 = vsel %vm1641_vm10, %v2227_v13, %v2228_v25  ;;  %v5096_v44 = vld [vmem:[#allocation8 + $0x1b0] sm:$0xff]  ;;  %v3197_v25 = vld [vmem:[#allocation2 + $0xa4] sm:$0x1] }
 0x1a9   : > { %v6416_v52 = vpop.f32.mrf.mxu0  ;;  %v2099_v40 = vrot.slane %v2097_v55, 1  ;;  %v1395_v55 = vrot.slane %v1393_v31, 1  ;;  %3876 = vmatpush.bf16.msra.mxu3 %v5096_v44 }
 0x1aa   : > { %7522 = vst [vmem:[#allocation25_spill] sm:$0xff] %v6416_v52  ;;  %v6421_v29 = vpack.c.b16 %v1941_v27, %v1941_v27  ;;  %v6425_v34 = vpop.f32.mrf.mxu3  ;;  %v1391_v30 = vor.u32 %v1390_v0, %v1386_v48  ;;  %v3341_v48 = vunpack.c.l.b16 %v3197_v25  ;;  %v1400_v25 = vshll.u32 %v6136_v20, 16 }
 0x1ab   : > { %v6436_v54 = vor.u32 %v2099_v40, %v2095_v42  ;;  %v6445_v40 = vld [vmem:[#allocation2 + $0x9c] sm:$0xff]  }
 0x1ac   : > { %2939 = vmatmul.bf16.gmra.mxu0 %v6408_v5  ;;  %v2102_v61 = vshll.u32 %v6421_v29, 16  ;;  %v2501_v27 = vpop.f32.mrf.mxu1  ;;  %7526 = vst [vmem:[#allocation29_spill] sm:$0xff] %v6445_v40 }
 0x1ad   : > { %v2585_v59 = vpop.f32.mrf.mxu2  ;;  %7524 = vst [vmem:[#allocation27_spill] sm:$0xff] %v6436_v54 }
 0x1ae   : > { %2676 = vmatmul.bf16.gmra.mxu3 %v2229_v32  ;;  %v2104_v57 = vrot.slane %v2102_v61, 1  ;;  %v6434_v10 = vadd.f32 %v2585_v59, %v2496_v24  ;;  %v1396_v32 = vsel %vm1384_vm9, %v1391_v30, %v1395_v55  ;;  %v3213_v59 = vld [vmem:[#allocation2 + $0x9c] sm:$0xe]  ;;  %v1209_v61 = vld [vmem:[#allocation2 + $0x14] sm:$0x1] }
 0x1af   : > { %v3597_v30 = vunpack.c.l.b16 %v3213_v59  ;;  %v1353_v44 = vunpack.c.l.b16 %v1209_v61 }
 0x1b0   : > { %v2105_v53 = vsel %vm1384_vm9, %v6436_v54, %v2104_v57  ;;  %v5104_v57 = vld [vmem:[#allocation8 + $0x1f0] sm:$0xff]  ;;  %v6449_v54 = vpack.c.b16 %v3341_v48, %v3341_v48 }
 0x1b1   : > { %v6432_v63 = vpop.f32.mrf.mxu0  ;;  %3965 = vmatpush.bf16.msra.mxu0 %v5104_v57  ;;  %v1369_v59 = vpack.c.b16 %v1353_v44, %v1353_v44  ;;  %v1402_v57 = vrot.slane %v1400_v25, 1  ;;  %v1398_v44 = vshrl.u32 %v6136_v20, 16  ;;  %v5264_v25 = vld [vmem:[#allocation2 + $0x48] sm:$0xf0] }
 0x1b2   : > { %7523 = vst [vmem:[#allocation26_spill] sm:$0xff] %v6432_v63  ;;  %v6438_v38 = vpop.f32.mrf.mxu3  ;;  %2627 = vmatmul.bf16.gmra.mxu2 %v2105_v53  ;;  %v5227_v63 = vld [vmem:[#allocation2] sm:$0xe]  ;;  %v5112_v53 = vld [vmem:[#allocation8 + $0x230] sm:$0xff] }
 0x1b3   : > { %v5228_v31 = vor.u32 %v5227_v63, %v5226_v47  ;;  %7527 = vst [vmem:[#allocation30_spill] sm:$0xff] %v6449_v54  ;;  %4054 = vmatpush.bf16.msra.mxu1 %v5112_v53  ;;  %v1643_v47 = vrot.slane %v1368_v35, 1  ;;  %v3652_v63 = vrot.slane %v6449_v54, 1 }
 0x1b4   : > { %v2504_v13 = vpop.f32.mrf.mxu1 }
 0x1b5   : > { %v2588_v24 = vpop.f32.mrf.mxu2 }
 0x1b6   : > { %v6447_v0 = vadd.f32 %v2588_v24, %v2499_v26 }
 0x1b7   : > { %2983 = vmatmul.bf16.vlgmr.msrb.gmra.mxu1 %v1396_v32  ;;  %v1642_v32 = vrot.slane %v5228_v31, 1 }
 0x1b9   : > { %v6443_v42 = vpop.f32.mrf.mxu0  ;;  %v1644_v53 = vsel %vm1641_vm10, %v1642_v32, %v1643_v47  ;;  %v5444_v47 = vld [vmem:[#allocation2 + $0xc] sm:$0xe] }
 0x1ba   : > { %7525 = vst [vmem:[#allocation28_spill] sm:$0xff] %v6443_v42  ;;  %v6451_v55 = vpop.f32.mrf.mxu3  ;;  %v7479_v42 = vunpack.c.h.b16 %v6445_v40 }
 0x1bc   : > { %2944 = vmatmul.bf16.gmra.mxu0 %v6340_v33  ;;  %v3613_v26 = vpack.c.b16 %v7479_v42, %v3597_v30  ;;  %v2506_v24 = vpop.f32.mrf.mxu1  ;;  %v6467_v30 = vld [vmem:[#allocation2 + $0x84] sm:$0xf0] }
 0x1bd   : > { %v2590_v52 = vpop.f32.mrf.mxu2  ;;  %7528 = vst [vmem:[#allocation31_spill] sm:$0xff] %v6467_v30  ;;  %v5265_v30 = vld [vmem:[#allocation2 + $0x48] sm:$0xe] }
 0x1be   : > { %v3651_v48 = vrot.slane %v3613_v26, 1  ;;  %2681 = vmatmul.bf16.gmra.mxu3 %v6197_v28  ;;  %v6462_v61 = vadd.f32 %v2590_v52, %v2501_v27  ;;  %v1405_v26 = vshll.u32 %v1369_v59, 16  ;;  %v1403_v52 = vor.u32 %v1402_v57, %v1398_v44  ;;  %v1210_v27 = vld [vmem:[#allocation2 + $0x20] sm:$0x1] }
 0x1bf   : > { %v2234_v57 = vrot.slane %v6224_v6, 1  ;;  %v3215_v6 = vld [vmem:[#allocation2 + $0xb4] sm:$0xe] }
 0x1c0   : > { %v6470_v35 = vsel %vm1641_vm10, %v3651_v48, %v3652_v63  ;;  %v1407_v32 = vrot.slane %v1405_v26, 1  ;;  %v1354_v63 = vunpack.c.l.b16 %v1210_v27  ;;  %v5447_v27 = vld [vmem:[#allocation2 + $0x84] sm:$0xe] }
 0x1c1   : > { %v6460_v33 = vpop.f32.mrf.mxu0  ;;  %7529 = vst [vmem:[#allocation32_spill] sm:$0xff] %v6470_v35  ;;  %v5266_v35 = vor.u32 %v5265_v30, %v5264_v25 }
 0x1c2   : > { %v2633_v31 = vpop.f32.mrf.mxu3  ;;  %3072 = vmatmul.bf16.vlgmr.msrb.gmra.mxu2 %v1644_v53  ;;  %v1408_v20 = vsel %vm1384_vm9, %v1403_v52, %v1407_v32  ;;  %v6487_v26 = vpack.c.b16 %v1354_v63, %v1354_v63  ;;  %v1646_v32 = vrot.slane %v1369_v59, 1 }
 0x1c3   : > { %v6474_v28 = vadd.f32 %v2633_v31, %v6334_v14  ;;  %v5445_v31 = vor.u32 %v5444_v47, %v6138_v21  ;;  %v2233_v44 = vrot.slane %v5266_v35, 1  ;;  %v6495_v21 = vld [vmem:[#allocation2 + $0xb4] sm:$0xff]   ;;  %v5448_v47 = vor.u32 %v5447_v27, %v6375_v36 }
 0x1c4   : > { %v2509_v42 = vpop.f32.mrf.mxu1  ;;  %7533 = vst [vmem:[#allocation36_spill] sm:$0xff] %v6495_v21 }
 0x1c5   : > { %7530 = vst [vmem:[#allocation33_spill] sm:$0xff] %v6474_v28  ;;  %v2593_v54 = vpop.f32.mrf.mxu2  ;;  %v1645_v25 = vrot.slane %v5445_v31, 1  ;;  %v5095_v31 = vld [vmem:[#allocation8 + $0x1a8] sm:$0xff] }
 0x1c6   : > { %v6478_v48 = vadd.f32 %v2593_v54, %v2504_v13  ;;  %v2235_v13 = vsel %vm1641_vm10, %v2233_v44, %v2234_v57  ;;  %3877 = vmatpush.bf16.msra.mxu3 %v5095_v31 }
 0x1c7   : > { %2988 = vmatmul.bf16.gmra.mxu1 %v1408_v20  ;;  %v3199_v20 = vld [vmem:[#allocation2 + $0xbc] sm:$0x1]  ;;  %v1647_v57 = vsel %vm1641_vm10, %v1645_v25, %v1646_v32  ;;  %v1211_v25 = vld [vmem:[#allocation2 + $0x2c] sm:$0x1] }
 0x1c8   : > { %v3343_v63 = vunpack.c.l.b16 %v3199_v20 }
 0x1c9   : > { %v6476_v40 = vpop.f32.mrf.mxu0 }
 0x1ca   : > { %v2635_v14 = vpop.f32.mrf.mxu3  ;;  %v6507_v36 = vpack.c.b16 %v3343_v63, %v3343_v63  ;;  %v1355_v63 = vunpack.c.l.b16 %v1211_v25 }
 0x1cb   : > { %v6484_v53 = vadd.f32 %v2635_v14, %v6351_v19  ;;  %v1417_v19 = vshll.u32 %v6487_v26, 16  ;;  %v3599_v14 = vunpack.c.l.b16 %v3215_v6  ;;  %v5103_v6 = vld [vmem:[#allocation8 + $0x1e8] sm:$0xff] }
 0x1cc   : > { %2949 = vmatmul.bf16.gmra.mxu0 %v6465_v43  ;;  %v2511_v54 = vpop.f32.mrf.mxu1  ;;  %7535 = vst [vmem:[#allocation38_spill] sm:$0xff] %v6507_v36 }
 0x1cd   : > { %7531 = vst [vmem:[#allocation34_spill] sm:$0xff] %v6484_v53  ;;  %v2595_v52 = vpop.f32.mrf.mxu2  ;;  %v1419_v59 = vrot.slane %v1417_v19, 1  ;;  %v5111_v19 = vld [vmem:[#allocation8 + $0x228] sm:$0xff]  ;;  %3966 = vmatpush.bf16.msra.mxu0 %v5103_v6 }
 0x1ce   : > { %2686 = vmatmul.bf16.gmra.mxu3 %v2235_v13  ;;  %v6492_v28 = vadd.f32 %v2595_v52, %v2506_v24  ;;  %v2248_v13 = vrot.slane %v5448_v47, 1  ;;  %v2249_v24 = vrot.slane %v6384_v17, 1  ;;  %v7482_v52 = vunpack.c.h.b16 %v6495_v21  ;;  %v5229_v47 = vld [vmem:[#allocation2 + $0x18] sm:$0xf0]  ;;  %4055 = vmatpush.bf16.msra.mxu1 %v5111_v19  ;;  %v6532_v6 = vld [vmem:[#allocation2 + $0x9c] sm:$0xf0] }
 0x1cf   : > { %v1420_v17 = vsel %vm1384_vm9, %v6099_v4, %v1419_v59 }
 0x1d0   : > { %v3615_v27 = vpack.c.b16 %v7482_v52, %v3599_v14  ;;  %v3658_v14 = vrot.slane %v6507_v36, 1  ;;  %v5450_v52 = vld [vmem:[#allocation2 + $0x24] sm:$0xe] }
 0x1d1   : > { %v6490_v30 = vpop.f32.mrf.mxu0 }
 0x1d2   : > { %7532 = vst [vmem:[#allocation35_spill] sm:$0xff] %v6490_v30  ;;  %v2638_v35 = vpop.f32.mrf.mxu3  ;;  %3077 = vmatmul.bf16.gmra.mxu2 %v1647_v57  ;;  %v6505_v30 = vsel %vm1641_vm10, %v2248_v13, %v2249_v24  ;;  %v3657_v57 = vrot.slane %v3615_v27, 1  ;;  %v5230_v13 = vld [vmem:[#allocation2 + $0x18] sm:$0xe]  ;;  %v1649_v27 = vrot.slane %v6487_v26, 1 }
 0x1d3   : > { %v6500_v44 = vadd.f32 %v2638_v35, %v6369_v2  ;;  %v5231_v59 = vor.u32 %v5230_v13, %v5229_v47  ;;  %v1422_v47 = vshrl.u32 %v6205_v39, 16 }
 0x1d4   : > { %v2514_v53 = vpop.f32.mrf.mxu1  ;;  %v6524_v4 = vsel %vm1641_vm10, %v3657_v57, %v3658_v14 }
 0x1d5   : > { %7534 = vst [vmem:[#allocation37_spill] sm:$0xff] %v6500_v44  ;;  %v2598_v2 = vpop.f32.mrf.mxu2  ;;  %v1648_v19 = vrot.slane %v5231_v59, 1  ;;  %v5268_v59 = vld [vmem:[#allocation2 + $0x60] sm:$0xe]  ;;  %v5102_v44 = vld [vmem:[#allocation8 + $0x1e0] sm:$0xff] }
 0x1d6   : > { %v6511_v32 = vadd.f32 %v2598_v2, %v2509_v42  ;;  %v1424_v42 = vshll.u32 %v6205_v39, 16  ;;  %7537 = vst [vmem:[#allocation40_spill] sm:$0xff] %v6524_v4  ;;  %v1371_v2 = vpack.c.b16 %v1355_v63, %v1355_v63  ;;  %3967 = vmatpush.bf16.msra.mxu0 %v5102_v44 }
 0x1d7   : > { %2993 = vmatmul.bf16.gmra.mxu1 %v1420_v17  ;;  %v6530_v17 = vld [vmem:[#allocation2 + $0x9c] sm:$0xff]   ;;  %v1650_v63 = vsel %vm1641_vm10, %v1648_v19, %v1649_v27  ;;  %v5451_v19 = vor.u32 %v5450_v52, %v6207_v16  ;;  %v5100_v16 = vld [vmem:[#allocation8 + $0x1d0] sm:$0xff] }
 0x1d8   : > { %v1429_v14 = vshll.u32 %v1371_v2, 16 }
 0x1d9   : > { %v6513_v20 = vpop.f32.mrf.mxu0 }
 0x1da   : > { %v2640_v35 = vpop.f32.mrf.mxu3 }
 0x1db   : > { %v6520_v31 = vadd.f32 %v2640_v35, %v6389_v62  ;;  %v1426_v62 = vrot.slane %v1424_v42, 1  ;;  %v1212_v42 = vld [vmem:[#allocation2 + $0x38] sm:$0x1] }
 0x1dc   : > { %2954 = vmatmul.bf16.gmra.mxu0 %v6414_v8  ;;  %v2516_v24 = vpop.f32.mrf.mxu1  ;;  %v1356_v21 = vunpack.c.l.b16 %v1212_v42 }
 0x1dd   : > { %7536 = vst [vmem:[#allocation39_spill] sm:$0xff] %v6520_v31  ;;  %v2600_v8 = vpop.f32.mrf.mxu2  ;;  %v1427_v26 = vor.u32 %v1426_v62, %v1422_v47 }
 0x1de   : > { %2691 = vmatmul.bf16.gmra.mxu3 %v6323_v23  ;;  %v6528_v25 = vadd.f32 %v2600_v8, %v2511_v54  ;;  %v5267_v54 = vld [vmem:[#allocation2 + $0x60] sm:$0xf0]  ;;  %v1431_v8 = vrot.slane %v1429_v14, 1 }
 0x1df   : > { %v5269_v39 = vor.u32 %v5268_v59, %v5267_v54 }
 0x1e0   : > { %v1432_v31 = vsel %vm1384_vm9, %v1427_v26, %v1431_v8  ;;  %v1652_v26 = vrot.slane %v1371_v2, 1  ;;  %v5094_v8 = vld [vmem:[#allocation8 + $0x1a0] sm:$0xff]  ;;  %v1213_v2 = vld [vmem:[#allocation2 + $0x44] sm:$0x1] }
 0x1e1   : > { %v6534_v35 = vpop.f32.mrf.mxu0  ;;  %3878 = vmatpush.bf16.msra.mxu3 %v5094_v8 }
 0x1e2   : > { %v2643_v57 = vpop.f32.mrf.mxu3  ;;  %3082 = vmatmul.bf16.gmra.mxu2 %v1650_v63  ;;  %v1651_v63 = vrot.slane %v5451_v19, 1  ;;  %v5099_v19 = vld [vmem:[#allocation8 + $0x1c8] sm:$0xff] }
 0x1e3   : > { %v6539_v23 = vadd.f32 %v2643_v57, %v6412_v46  ;;  %v2240_v46 = vrot.slane %v6284_v51, 1 }
 0x1e4   : > { %v2519_v13 = vpop.f32.mrf.mxu1  ;;  %v1653_v44 = vsel %vm1641_vm10, %v1651_v63, %v1652_v26  ;;  %v5232_v26 = vld [vmem:[#allocation2 + $0x30] sm:$0xf0] }
 0x1e5   : > { %7538 = vst [vmem:[#allocation41_spill] sm:$0xff] %v6539_v23  ;;  %v2603_v4 = vpop.f32.mrf.mxu2 }
 0x1e6   : > { %v6541_v36 = vadd.f32 %v2603_v4, %v2514_v53  ;;  %v2239_v53 = vrot.slane %v5269_v39, 1  ;;  %v6552_v4 = vpack.c.b16 %v1356_v21, %v1356_v21 }
 0x1e7   : > { %2998 = vmatmul.bf16.gmra.mxu1 %v1432_v31 }
 0x1e8   : > { %v2241_v14 = vsel %vm1641_vm10, %v2239_v53, %v2240_v46  ;;  %v1441_v51 = vshll.u32 %v6552_v4, 16  ;;  %v6568_v53 = vld [vmem:[#allocation2 + $0xa8] sm:$0xff]  }
 0x1e9   : > { %v6550_v57 = vpop.f32.mrf.mxu0  ;;  %7542 = vst [vmem:[#allocation45_spill] sm:$0xff] %v6568_v53 }
 0x1ea   : > { %v2645_v27 = vpop.f32.mrf.mxu3  ;;  %v1443_v52 = vrot.slane %v1441_v51, 1  ;;  %v1448_v51 = vshll.u32 %v6265_v11, 16 }
 0x1eb   : > { %v6547_v62 = vadd.f32 %v2645_v27, %v6425_v34  ;;  %v5101_v34 = vld [vmem:[#allocation8 + $0x1d8] sm:$0xff] }
 0x1ec   : > { %2959 = vmatmul.bf16.gmra.mxu0 %v6530_v17  ;;  %v2521_v47 = vpop.f32.mrf.mxu1  ;;  %v1444_v46 = vsel %vm1384_vm9, %v6179_v9, %v1443_v52  ;;  %v6575_v9 = vld [vmem:[#allocation2 + $0x6c] sm:$0xff]  }
 0x1ed   : > { %7539 = vst [vmem:[#allocation42_spill] sm:$0xff] %v6547_v62  ;;  %v2605_v31 = vpop.f32.mrf.mxu2  ;;  %3968 = vmatpush.bf16.msra.mxu0 %v5101_v34 }
 0x1ee   : > { %2696 = vmatmul.bf16.gmra.mxu3 %v2241_v14  ;;  %v6555_v54 = vadd.f32 %v2605_v31, %v2516_v24  ;;  %v5110_v14 = vld [vmem:[#allocation8 + $0x220] sm:$0xff]  ;;  %v3193_v31 = vld [vmem:[#allocation2 + $0x74] sm:$0x1] }
 0x1ef   : > { %4056 = vmatpush.bf16.msra.mxu1 %v5110_v14 }
 0x1f1   : > { %v6562_v59 = vpop.f32.mrf.mxu0  ;;  %3969 = vmatpush.bf16.msra.mxu0 %v5100_v16  ;;  %v5233_v16 = vld [vmem:[#allocation2 + $0x30] sm:$0xe] }
 0x1f2   : > { %v2648_v42 = vpop.f32.mrf.mxu3  ;;  %3087 = vmatmul.bf16.gmra.mxu2 %v1653_v44  ;;  %7541 = vst [vmem:[#allocation44_spill] sm:$0xff] %v6562_v59  ;;  %v3337_v44 = vunpack.c.l.b16 %v3193_v31  ;;  %v5234_v52 = vor.u32 %v5233_v16, %v5232_v26  ;;  %v1446_v31 = vshrl.u32 %v6265_v11, 16  ;;  %v6589_v26 = vld [vmem:[#allocation2 + $0xb4] sm:$0xff]   ;;  %v5270_v11 = vld [vmem:[#allocation2 + $0x78] sm:$0xf0] }
 0x1f3   : > { %v6560_v21 = vadd.f32 %v2648_v42, %v6438_v38  ;;  %v1357_v38 = vunpack.c.l.b16 %v1213_v2  ;;  %v5668_v42 = vld [vmem:[#allocation2 + $0x6c] sm:$0xf0]  ;;  %v5669_v2 = vld [vmem:[#allocation2 + $0x6c] sm:$0xe]  ;;  %7545 = vst [vmem:[#allocation48_spill] sm:$0xff] %v6589_v26 }
 0x1f4   : > { %v2524_v39 = vpop.f32.mrf.mxu1  ;;  %v6591_v16 = vld [vmem:[#allocation2 + $0xb4] sm:$0xf0]  ;;  %v5670_v62 = vor.u32 %v5669_v2, %v5668_v42  ;;  %v3186_v59 = vld [vmem:[#allocation2 + $0x20] sm:$0x1] }
 0x1f5   : > { %7540 = vst [vmem:[#allocation43_spill] sm:$0xff] %v6560_v21  ;;  %v2608_v24 = vpop.f32.mrf.mxu2  ;;  %3970 = vmatpush.bf16.msra.mxu0 %v5099_v19  ;;  %v6577_v8 = vpack.c.b16 %v1357_v38, %v1357_v38  ;;  %v1655_v21 = vrot.slane %v6552_v4, 1 }
 0x1f6   : > { %v6564_v27 = vadd.f32 %v2608_v24, %v2519_v13  ;;  %v5098_v13 = vld [vmem:[#allocation8 + $0x1c0] sm:$0xff]  ;;  %7546 = vst [vmem:[#allocation49_spill] sm:$0xff] %v6591_v16 }
 0x1f7   : > { %3003 = vmatmul.bf16.gmra.mxu1 %v1444_v46  ;;  %v1453_v38 = vshll.u32 %v6577_v8, 16 }
 0x1f9   : > { %3971 = vmatpush.bf16.msra.mxu0 %v5098_v13  ;;  %v6581_v19 = vpop.f32.mrf.mxu0  ;;  %v3639_v13 = vrot.slane %v5670_v62, 1  ;;  %v3330_v62 = vunpack.c.l.b16 %v3186_v59 }
 0x1fa   : > { %v2650_v63 = vpop.f32.mrf.mxu3  ;;  %7544 = vst [vmem:[#allocation47_spill] sm:$0xff] %v6581_v19  ;;  %v5453_v19 = vld [vmem:[#allocation2 + $0x3c] sm:$0xe] }
 0x1fb   : > { %v6573_v34 = vadd.f32 %v2650_v63, %v6451_v55  ;;  %v1450_v55 = vrot.slane %v1448_v51, 1  ;;  %v6585_v63 = vpack.c.b16 %v3337_v44, %v3337_v44 }
 0x1fc   : > { %2964 = vmatmul.bf16.gmra.mxu0 %v6568_v53  ;;  %v2526_v24 = vpop.f32.mrf.mxu1 }
 0x1fd   : > { %7543 = vst [vmem:[#allocation46_spill] sm:$0xff] %v6573_v34  ;;  %v2610_v46 = vpop.f32.mrf.mxu2  ;;  %v1654_v34 = vrot.slane %v5234_v52, 1  ;;  %v3640_v44 = vrot.slane %v6585_v63, 1  ;;  %v1455_v52 = vrot.slane %v1453_v38, 1 }
 0x1fe   : > { %2701 = vmatmul.bf16.gmra.mxu3 %v6399_v7  ;;  %v6583_v14 = vadd.f32 %v2610_v46, %v2521_v47  ;;  %v1451_v47 = vor.u32 %v1450_v55, %v1446_v31  ;;  %v1214_v46 = vld [vmem:[#allocation2 + $0x50] sm:$0x1] }
 0x1ff   : > { %v1656_v4 = vsel %vm1641_vm10, %v1654_v34, %v1655_v21  ;;  %v6599_v16 = vsel %vm1641_vm10, %v3639_v13, %v3640_v44  ;;  %v5271_v34 = vld [vmem:[#allocation2 + $0x78] sm:$0xe]  ;;  %v1358_v55 = vunpack.c.l.b16 %v1214_v46  ;;  %v5454_v13 = vor.u32 %v5453_v19, %v6267_v12 }
 0x200   : > { %7547 = vst [vmem:[#allocation50_spill] sm:$0xff] %v6599_v16  ;;  %v1456_v21 = vsel %vm1384_vm9, %v1451_v47, %v1455_v52  ;;  %v5272_v2 = vor.u32 %v5271_v34, %v5270_v11  ;;  %v6616_v52 = vpack.c.b16 %v3330_v62, %v3330_v62 }
 0x201   : > { %v6604_v31 = vpop.f32.mrf.mxu0  ;;  %v6612_v44 = vpack.c.b16 %v1358_v55, %v1358_v55  ;;  %v6627_v55 = vld [vmem:[#allocation2 + $0x24] sm:$0xf0] }
 0x202   : > { %v2662_v7 = vpop.f32.mrf.mxu3  ;;  %3092 = vmatmul.bf16.gmra.mxu2 %v1656_v4  ;;  %7548 = vst [vmem:[#allocation51_spill] sm:$0xff] %v6604_v31  ;;  %v2245_v47 = vrot.slane %v5272_v2, 1  ;;  %v3370_v19 = vshll.u32 %v6616_v52, 16  ;;  %v6625_v2 = vld [vmem:[#allocation2 + $0x24] sm:$0xff]  }
 0x203   : > { %v6595_v51 = vadd.f32 %v2662_v7, %v6343_v49  ;;  %v2246_v7 = vrot.slane %v6346_v60, 1  ;;  %7549 = vst [vmem:[#allocation52_spill] sm:$0xff] %v6616_v52  ;;  %v1658_v60 = vrot.slane %v6577_v8, 1  ;;  %v1465_v12 = vshll.u32 %v6612_v44, 16 }
 0x204   : > { %v2529_v23 = vpop.f32.mrf.mxu1  ;;  %7550 = vst [vmem:[#allocation53_spill] sm:$0xff] %v6625_v2 }
 0x205   : > { %v2613_v42 = vpop.f32.mrf.mxu2  ;;  %v2247_v11 = vsel %vm1641_vm10, %v2245_v47, %v2246_v7  ;;  %7551 = vst [vmem:[#allocation54_spill] sm:$0xff] %v6627_v55  ;;  %v1215_v55 = vld [vmem:[#allocation2 + $0x5c] sm:$0x1] }
 0x206   : > { %v6602_v49 = vadd.f32 %v2613_v42, %v2524_v39  ;;  %v6614_v39 = vld [vmem:[#allocation2 + $0x18] sm:$0xff]   ;;  %v1657_v42 = vrot.slane %v5454_v13, 1  ;;  %v5093_v13 = vld [vmem:[#allocation8 + $0x198] sm:$0xff] }
 0x207   : > { %3008 = vmatmul.bf16.gmra.mxu1 %v1456_v21  ;;  %v3363_v47 = vshrl.u32 %v6614_v39, 16  ;;  %3879 = vmatpush.bf16.msra.mxu3 %v5093_v13 }
 0x208   : > { %v1659_v62 = vsel %vm1641_vm10, %v1657_v42, %v1658_v60  ;;  %v3187_v42 = vld [vmem:[#allocation2 + $0x2c] sm:$0x1] }
 0x209   : > { %v6633_v8 = vpop.f32.mrf.mxu0 }
 0x20a   : > { %v2664_v38 = vpop.f32.mrf.mxu3  ;;  %7552 = vst [vmem:[#allocation55_spill] sm:$0xff] %v6633_v8 }
 0x20b   : > { %v6609_v4 = vadd.f32 %v2664_v38, %v6364_v3  ;;  %v3365_v3 = vshll.u32 %v6614_v39, 16 }
 0x20c   : > { %2969 = vmatmul.bf16.gmra.mxu0 %v6589_v26  ;;  %v2531_v59 = vpop.f32.mrf.mxu1 }
 0x20d   : > { %v2615_v46 = vpop.f32.mrf.mxu2  ;;  %v3367_v7 = vrot.slane %v3365_v3, 1  ;;  %v5109_v3 = vld [vmem:[#allocation8 + $0x218] sm:$0xff] }
 0x20e   : > { %2706 = vmatmul.bf16.gmra.mxu3 %v2247_v11  ;;  %v6621_v21 = vadd.f32 %v2615_v46, %v2526_v24  ;;  %v1467_v24 = vrot.slane %v1465_v12, 1  ;;  %v3372_v11 = vrot.slane %v3370_v19, 1  ;;  %v3195_v12 = vld [vmem:[#allocation2 + $0x8c] sm:$0x1]  ;;  %4057 = vmatpush.bf16.msra.mxu1 %v5109_v3 }
 0x20f   : > { %v3368_v52 = vor.u32 %v3367_v7, %v3363_v47  ;;  %v5235_v19 = vld [vmem:[#allocation2 + $0x48] sm:$0xf0]  ;;  %v3331_v7 = vunpack.c.l.b16 %v3187_v42  ;;  %v3339_v47 = vunpack.c.l.b16 %v3195_v12  ;;  %v1661_v42 = vrot.slane %v6612_v44, 1 }
 0x210   : > { %v3375_v44 = vshrl.u32 %v6625_v2, 16 }
 0x211   : > { %v3373_v60 = vsel %vm1384_vm9, %v3368_v52, %v3372_v11  ;;  %v3377_v52 = vshll.u32 %v6625_v2, 16  ;;  %v5672_v11 = vld [vmem:[#allocation2 + $0x84] sm:$0xe]  ;;  %v6650_v8 = vpop.f32.mrf.mxu0  ;;  %v6656_v3 = vpack.c.b16 %v3331_v7, %v3331_v7  ;;  %v6660_v12 = vpack.c.b16 %v3339_v47, %v3339_v47 }
 0x212   : > { %v2667_v34 = vpop.f32.mrf.mxu3  ;;  %3097 = vmatmul.bf16.gmra.mxu2 %v1659_v62  ;;  %v1359_v62 = vunpack.c.l.b16 %v1215_v55  ;;  %7555 = vst [vmem:[#allocation58_spill] sm:$0xff] %v6650_v8  ;;  %v1470_v8 = vshrl.u32 %v6329_v37, 16 }
 0x213   : > { %v6631_v38 = vadd.f32 %v2667_v34, %v6382_v50  ;;  %v1468_v50 = vsel %vm1384_vm9, %v6240_v58, %v1467_v24  ;;  %v1472_v58 = vshll.u32 %v6329_v37, 16  ;;  %v5236_v24 = vld [vmem:[#allocation2 + $0x48] sm:$0xe]  ;;  %7556 = vst [vmem:[#allocation59_spill] sm:$0xff] %v6656_v3  ;;  %v3646_v47 = vrot.slane %v6660_v12, 1 }
 0x214   : > { %v6636_v46 = vpop.f32.mrf.mxu1  ;;  %v6652_v55 = vpack.c.b16 %v1359_v62, %v1359_v62  ;;  %v1216_v37 = vld [vmem:[#allocation2 + $0x68] sm:$0x1] }
 0x215   : > { %v2618_v16 = vpop.f32.mrf.mxu2 }
 0x216   : > { %v6638_v31 = vadd.f32 %v2618_v16, %v2529_v23  ;;  %v6646_v23 = vld [vmem:[#allocation2 + $0x84] sm:$0xff]   ;;  %v1477_v62 = vshll.u32 %v6652_v55, 16 }
 0x217   : > { %3013 = vmatmul.bf16.gmra.mxu1 %v1468_v50  ;;  %7554 = vst [vmem:[#allocation57_spill] sm:$0xff] %v6646_v23  ;;  %v5671_v16 = vld [vmem:[#allocation2 + $0x84] sm:$0xf0]  ;;  %v5237_v50 = vor.u32 %v5236_v24, %v5235_v19  ;;  %v1474_v23 = vrot.slane %v1472_v58, 1  ;;  %v3379_v24 = vrot.slane %v3377_v52, 1 }
 0x218   : > { %7553 = vst [vmem:[#allocation56_spill] sm:$0xff] %v6638_v31  ;;  %v5673_v31 = vor.u32 %v5672_v11, %v5671_v16  ;;  %v5273_v52 = vld [vmem:[#allocation2 + $0x90] sm:$0xf0]  ;;  %v3188_v11 = vld [vmem:[#allocation2 + $0x38] sm:$0x1] }
 0x219   : > { %v1660_v19 = vrot.slane %v5237_v50, 1  ;;  %v1475_v7 = vor.u32 %v1474_v23, %v1470_v8  ;;  %v3380_v50 = vor.u32 %v3379_v24, %v3375_v44  ;;  %v5456_v16 = vld [vmem:[#allocation2 + $0x54] sm:$0xe]  ;;  %v6674_v2 = vpop.f32.mrf.mxu0  ;;  %v1360_v23 = vunpack.c.l.b16 %v1216_v37 }
 0x21a   : > { %v2669_v34 = vpop.f32.mrf.mxu3  ;;  %v3645_v58 = vrot.slane %v5673_v31, 1  ;;  %v5121_v44 = vld [vmem:[#allocation9 + $0x38] sm:$0xff] }
 0x21b   : > { %v6644_v13 = vadd.f32 %v2669_v34, %v6405_v1  ;;  %v1662_v53 = vsel %vm1641_vm10, %v1660_v19, %v1661_v42  ;;  %v5274_v19 = vld [vmem:[#allocation2 + $0x90] sm:$0xe]  ;;  %4326 = vmatpush.bf16.msra.mxu2 %v5121_v44 }
 0x21c   : > { %3972 = vmatmul.bf16.vlgmr.msra.gmra.mxu0 %v3373_v60  ;;  %v2536_v60 = vpop.f32.mrf.mxu1  ;;  %v6672_v42 = vsel %vm1641_vm10, %v3645_v58, %v3646_v47  ;;  %v5275_v8 = vor.u32 %v5274_v19, %v5273_v52  ;;  %v2252_v58 = vrot.slane %v6421_v29, 1  ;;  %v5457_v47 = vor.u32 %v5456_v16, %v6331_v22 }
 0x21d   : > { %v2620_v1 = vpop.f32.mrf.mxu2  ;;  %7558 = vst [vmem:[#allocation61_spill] sm:$0xff] %v6672_v42  ;;  %v1664_v29 = vrot.slane %v6652_v55, 1 }
 0x21e   : > { %2711 = vmatmul.bf16.gmra.mxu3 %v6505_v30  ;;  %v6658_v34 = vadd.f32 %v2620_v1, %v2531_v59  ;;  %v3382_v59 = vshll.u32 %v6656_v3, 16 }
 0x220   : > { %7557 = vst [vmem:[#allocation60_spill] sm:$0xff] %v6658_v34  ;;  %v1479_v34 = vrot.slane %v1477_v62, 1  ;;  %v3332_v62 = vunpack.c.l.b16 %v3188_v11  ;;  %v1663_v11 = vrot.slane %v5457_v47, 1  ;;  %v2896_v47 = vadd.f32 %v6379_v41, %v6595_v51 }
 0x221   : > { %v6699_v19 = vpop.f32.mrf.mxu0 }
 0x222   : > { %v2672_v26 = vpop.f32.mrf.mxu3  ;;  %3102 = vmatmul.bf16.gmra.mxu2 %v1662_v53  ;;  %v1480_v31 = vsel %vm1384_vm9, %v1475_v7, %v1479_v34  ;;  %v6688_v34 = vld [vmem:[#allocation2 + $0x30] sm:$0xff]   ;;  %v6690_v7 = vpack.c.b16 %v3332_v62, %v3332_v62 }
 0x223   : > { %v6666_v30 = vadd.f32 %v2672_v26, %v6419_v56  ;;  %v3384_v26 = vrot.slane %v3382_v59, 1  ;;  %v3387_v44 = vshrl.u32 %v6688_v34, 16 }
 0x224   : > { %v2539_v1 = vpop.f32.mrf.mxu1  ;;  %7559 = vst [vmem:[#allocation62_spill] sm:$0xff] %v6690_v7 }
 0x225   : > { %v2623_v56 = vpop.f32.mrf.mxu2  ;;  %v3385_v24 = vsel %vm1384_vm9, %v3380_v50, %v3384_v26  ;;  %v3394_v26 = vshll.u32 %v6690_v7, 16 }
 0x226   : > { %v6677_v53 = vadd.f32 %v2623_v56, %v6636_v46  ;;  %v2251_v46 = vrot.slane %v5275_v8, 1  ;;  %v6686_v56 = vpack.c.b16 %v1360_v23, %v1360_v23  ;;  %v6701_v8 = vld [vmem:[#allocation2 + $0x3c] sm:$0xff]  }
 0x227   : > { %3018 = vmatmul.bf16.gmra.mxu1 %v1480_v31  ;;  %v6703_v23 = vld [vmem:[#allocation2 + $0x3c] sm:$0xf0] }
 0x228   : > { %v2253_v52 = vsel %vm1641_vm10, %v2251_v46, %v2252_v58  ;;  %v1489_v16 = vshll.u32 %v6686_v56, 16  ;;  %7560 = vst [vmem:[#allocation63_spill] sm:$0xff] %v6703_v23  ;;  %v5092_v58 = vld [vmem:[#allocation8 + $0x190] sm:$0xff]  ;;  %v3396_v46 = vrot.slane %v3394_v26, 1 }
 0x229   : > { %3880 = vmatpush.bf16.msra.mxu3 %v5092_v58 }
 0x22a   : > { %v2674_v3 = vpop.f32.mrf.mxu3 }
 0x22b   : > { %v6683_v59 = vadd.f32 %v2674_v3, %v6434_v10  ;;  %v3389_v10 = vshll.u32 %v6688_v34, 16  ;;  %v5459_v3 = vld [vmem:[#allocation2 + $0x9c] sm:$0xe] }
 0x22c   : > { %3977 = vmatmul.bf16.gmra.mxu0 %v3385_v24  ;;  %v2541_v50 = vpop.f32.mrf.mxu1  ;;  %v1665_v24 = vsel %vm1641_vm10, %v1663_v11, %v1664_v29  ;;  %v1217_v29 = vld [vmem:[#allocation2 + $0x74] sm:$0x1] }
 0x22d   : > { %v2625_v37 = vpop.f32.mrf.mxu2  ;;  %v3391_v62 = vrot.slane %v3389_v10, 1  ;;  %v1361_v26 = vunpack.c.l.b16 %v1217_v29  ;;  %v1667_v29 = vrot.slane %v6686_v56, 1 }
 0x22e   : > { %2716 = vmatmul.bf16.gmra.mxu3 %v2253_v52  ;;  %v6695_v22 = vadd.f32 %v2625_v37, %v2536_v60  ;;  %v1491_v60 = vrot.slane %v1489_v16, 1  ;;  %v5460_v37 = vor.u32 %v5459_v3, %v6029_v18  ;;  %v3189_v16 = vld [vmem:[#allocation2 + $0x44] sm:$0x1]  ;;  %v2255_v18 = vrot.slane %v6174_v15, 1 }
 0x22f   : > { %v3392_v11 = vor.u32 %v3391_v62, %v3387_v44  ;;  %v5238_v3 = vld [vmem:[#allocation2 + $0x60] sm:$0xf0]  ;;  %v7561_v44 = vld [vmem:[#allocation23_spill] sm:$0xff] }
 0x230   : > { %v1492_v10 = vsel %vm1384_vm9, %v6299_v45, %v1491_v60  ;;  %v2254_v51 = vrot.slane %v5460_v37, 1  ;;  %v6723_v45 = vpop.f32.mrf.mxu0  ;;  %v5239_v60 = vld [vmem:[#allocation2 + $0x60] sm:$0xe]  ;;  %v2898_v58 = vadd.f32 %v7561_v44, %v6609_v4  ;;  %v6729_v37 = vpack.c.b16 %v1361_v26, %v1361_v26 }
 0x231   : > { %v3399_v26 = vshrl.u32 %v6701_v8, 16  ;;  %v7563_v44 = vld [vmem:[#allocation25_spill] sm:$0xff] }
 0x232   : > { %v2677_v31 = vpop.f32.mrf.mxu3  ;;  %3107 = vmatmul.bf16.gmra.mxu2 %v1665_v24  ;;  %v5108_v24 = vld [vmem:[#allocation8 + $0x210] sm:$0xff]  ;;  %v2256_v15 = vsel %vm1641_vm10, %v2254_v51, %v2255_v18 }
 0x233   : > { %v6707_v55 = vadd.f32 %v2677_v31, %v6447_v0  ;;  %v3397_v31 = vsel %vm1384_vm9, %v3392_v11, %v3396_v46  ;;  %4058 = vmatpush.bf16.msra.mxu1 %v5108_v24  ;;  %v3401_v46 = vshll.u32 %v6701_v8, 16 }
 0x234   : > { %v2984_v52 = vpop.f32.mrf.mxu1 }
 0x235   : > { %v2628_v42 = vpop.f32.mrf.mxu2  ;;  %v2985_v23 = vadd.f32 %v2984_v52, %v2896_v47  ;;  %v5240_v47 = vor.u32 %v5239_v60, %v5238_v3  ;;  %v3403_v4 = vrot.slane %v3401_v46, 1  ;;  %v1494_v3 = vshrl.u32 %v6408_v5, 16 }
 0x236   : > { %v6713_v0 = vadd.f32 %v2628_v42, %v2539_v1  ;;  %v3333_v1 = vunpack.c.l.b16 %v3189_v16  ;;  %v1496_v42 = vshll.u32 %v6408_v5, 16  ;;  %v1501_v60 = vshll.u32 %v6729_v37, 16  ;;  %v1218_v5 = vld [vmem:[#allocation2 + $0x80] sm:$0x1] }
 0x237   : > { %3023 = vmatmul.bf16.gmra.mxu1 %v1492_v10  ;;  %v1666_v24 = vrot.slane %v5240_v47, 1  ;;  %v3404_v47 = vor.u32 %v3403_v4, %v3399_v26 }
 0x238   : > { %v6732_v10 = vpack.c.b16 %v3333_v1, %v3333_v1  ;;  %v5276_v1 = vld [vmem:[#allocation2 + $0xa8] sm:$0xf0]  ;;  %v6746_v46 = vpop.f32.mrf.mxu0 }
 0x239   : > { %v1668_v51 = vsel %vm1641_vm10, %v1666_v24, %v1667_v29  ;;  %v3190_v29 = vld [vmem:[#allocation2 + $0x50] sm:$0x1] }
 0x23a   : > { %v2679_v41 = vpop.f32.mrf.mxu3  ;;  %7562 = vst [vmem:[#allocation23_spill] sm:$0xff] %v6732_v10  ;;  %v3406_v56 = vshll.u32 %v6732_v10, 16  ;;  %v3334_v4 = vunpack.c.l.b16 %v3190_v29 }
 0x23b   : > { %v6720_v62 = vadd.f32 %v2679_v41, %v6462_v61 }
 0x23c   : > { %3982 = vmatmul.bf16.gmra.mxu0 %v3397_v31  ;;  %v2986_v52 = vpop.f32.mrf.mxu1  ;;  %v1498_v31 = vrot.slane %v1496_v42, 1  ;;  %v3408_v7 = vrot.slane %v3406_v56, 1 }
 0x23d   : > { %v2630_v61 = vpop.f32.mrf.mxu2  ;;  %v2987_v11 = vadd.f32 %v2986_v52, %v2898_v58  ;;  %v2901_v58 = vadd.f32 %v7563_v44, %v6631_v38 }
 0x23e   : > { %2721 = vmatmul.bf16.gmra.mxu3 %v2256_v15  ;;  %v6734_v16 = vadd.f32 %v2630_v61, %v2541_v50  ;;  %v5277_v50 = vld [vmem:[#allocation2 + $0xa8] sm:$0xe]  ;;  %v1499_v42 = vor.u32 %v1498_v31, %v1494_v3  ;;  %v1503_v15 = vrot.slane %v1501_v60, 1  ;;  %v1362_v31 = vunpack.c.l.b16 %v1218_v5  ;;  %v7565_v60 = vld [vmem:[#allocation19_spill] sm:$0xff] }
 0x23f   : > { %v5278_v61 = vor.u32 %v5277_v50, %v5276_v1  ;;  %v3409_v38 = vsel %vm1384_vm9, %v3404_v47, %v3408_v7  ;;  %v5120_v3 = vld [vmem:[#allocation9 + $0x30] sm:$0xff]  ;;  %v2258_v1 = vrot.slane %v7565_v60, 1  ;;  %v6763_v47 = vpack.c.b16 %v3334_v4, %v3334_v4 }
 0x240   : > { %4327 = vmatpush.bf16.msra.mxu2 %v5120_v3  ;;  %v7567_v5 = vld [vmem:[#allocation26_spill] sm:$0xff] }
 0x241   : > { %v2257_v44 = vrot.slane %v5278_v61, 1  ;;  %v2903_v7 = vadd.f32 %v7567_v5, %v6644_v13  ;;  %7568 = vst [vmem:[#allocation19_spill] sm:$0xff] %v6763_v47  ;;  %v3418_v4 = vshll.u32 %v6763_v47, 16  ;;  %v7571_v5 = vld [vmem:[#allocation28_spill] sm:$0xff]  ;;  %v5107_v47 = vld [vmem:[#allocation8 + $0x208] sm:$0xff] }
 0x242   : > { %v2682_v41 = vpop.f32.mrf.mxu3  ;;  %3112 = vmatmul.bf16.gmra.mxu2 %v1668_v51  ;;  %v1504_v51 = vsel %vm1384_vm9, %v1499_v42, %v1503_v15  ;;  %v6759_v42 = vld [vmem:[#allocation2 + $0x48] sm:$0xff]   ;;  %4059 = vmatpush.bf16.msra.mxu1 %v5107_v47 }
 0x243   : > { %v6740_v18 = vadd.f32 %v2682_v41, %v6478_v48  ;;  %v5462_v48 = vld [vmem:[#allocation2 + $0x6c] sm:$0xe]  ;;  %v2259_v15 = vsel %vm1641_vm10, %v2257_v44, %v2258_v1  ;;  %v6776_v44 = vld [vmem:[#allocation2 + $0x54] sm:$0xf0] }
 0x244   : > { %v2989_v52 = vpop.f32.mrf.mxu1  ;;  %7570 = vst [vmem:[#allocation26_spill] sm:$0xff] %v6776_v44 }
 0x245   : > { %v3073_v24 = vpop.f32.mrf.mxu2  ;;  %v2990_v41 = vadd.f32 %v2989_v52, %v2901_v58  ;;  %v7566_v58 = vld [vmem:[#allocation24_spill] sm:$0xff] }
 0x246   : > { %v6748_v10 = vadd.f32 %v3073_v24, %v2985_v23  ;;  %v5463_v56 = vor.u32 %v5462_v48, %v7566_v58  ;;  %v6757_v23 = vpack.c.b16 %v1362_v31, %v1362_v31  ;;  %v1670_v24 = vrot.slane %v6729_v37, 1  ;;  %v6768_v31 = vpop.f32.mrf.mxu0 }
 0x247   : > { %3028 = vmatmul.bf16.gmra.mxu1 %v1504_v51  ;;  %v3413_v48 = vshll.u32 %v6759_v42, 16  ;;  %v5465_v51 = vld [vmem:[#allocation2 + $0xb4] sm:$0xe] }
 0x248   : > { %7564 = vst [vmem:[#allocation25_spill] sm:$0xff] %v6748_v10  ;;  %v1513_v13 = vshll.u32 %v6757_v23, 16 }
 0x249   : > { %v3415_v1 = vrot.slane %v3413_v48, 1  ;;  %v7574_v48 = vld [vmem:[#allocation22_spill] sm:$0xff] }
 0x24a   : > { %v2684_v26 = vpop.f32.mrf.mxu3  ;;  %v1515_v58 = vrot.slane %v1513_v13, 1 }
 0x24b   : > { %v6754_v50 = vadd.f32 %v2684_v26, %v6492_v28  ;;  %v1669_v28 = vrot.slane %v5463_v56, 1  ;;  %v6774_v26 = vld [vmem:[#allocation2 + $0x54] sm:$0xff]   ;;  %v5091_v56 = vld [vmem:[#allocation8 + $0x188] sm:$0xff] }
 0x24c   : > { %3987 = vmatmul.bf16.gmra.mxu0 %v3409_v38  ;;  %v2991_v52 = vpop.f32.mrf.mxu1  ;;  %3881 = vmatpush.bf16.msra.mxu3 %v5091_v56  ;;  %v1516_v13 = vsel %vm1384_vm9, %v7574_v48, %v1515_v58  ;;  %v7575_v56 = vld [vmem:[#allocation20_spill] sm:$0xff]  ;;  %v1520_v58 = vshll.u32 %v6465_v43, 16 }
 0x24d   : > { %v3075_v61 = vpop.f32.mrf.mxu2  ;;  %v2992_v29 = vadd.f32 %v2991_v52, %v2903_v7  ;;  %v1671_v60 = vsel %vm1641_vm10, %v1669_v28, %v1670_v24  ;;  %v2906_v7 = vadd.f32 %v7571_v5, %v6666_v30  ;;  %v3420_v52 = vrot.slane %v3418_v4, 1  ;;  %v1219_v24 = vld [vmem:[#allocation2 + $0x8c] sm:$0x1] }
 0x24e   : > { %2726 = vmatmul.bf16.gmra.mxu3 %v2259_v15  ;;  %v6770_v38 = vadd.f32 %v3075_v61, %v2987_v11  ;;  %v3411_v11 = vshrl.u32 %v6759_v42, 16  ;;  %v7572_v61 = vld [vmem:[#allocation18_spill] sm:$0xff]  ;;  %v6791_v30 = vpop.f32.mrf.mxu0  ;;  %v2261_v5 = vrot.slane %v7575_v56, 1 }
 0x250   : > { %7569 = vst [vmem:[#allocation24_spill] sm:$0xff] %v6770_v38  ;;  %v5466_v38 = vor.u32 %v5465_v51, %v7572_v61  ;;  %v3416_v28 = vor.u32 %v3415_v1, %v3411_v11  ;;  %v1363_v1 = vunpack.c.l.b16 %v1219_v24  ;;  %v5242_v11 = vld [vmem:[#allocation2 + $0x78] sm:$0xe]  ;;  %v3425_v61 = vshll.u32 %v6774_v26, 16 }
 0x252   : > { %v2687_v3 = vpop.f32.mrf.mxu3  ;;  %3117 = vmatmul.bf16.gmra.mxu2 %v1671_v60  ;;  %v3421_v60 = vsel %vm1384_vm9, %v3416_v28, %v3420_v52  ;;  %v2260_v51 = vrot.slane %v5466_v38, 1  ;;  %v2908_v52 = vadd.f32 %v6460_v33, %v6683_v59  ;;  %v6802_v48 = vpack.c.b16 %v1363_v1, %v1363_v1 }
 0x253   : > { %v6780_v37 = vadd.f32 %v2687_v3, %v6511_v32  ;;  %v3191_v3 = vld [vmem:[#allocation2 + $0x5c] sm:$0x1]  ;;  %v3427_v59 = vrot.slane %v3425_v61, 1  ;;  %v1220_v61 = vld [vmem:[#allocation2 + $0x98] sm:$0x1] }
 0x254   : > { %v2994_v15 = vpop.f32.mrf.mxu1  ;;  %v2262_v38 = vsel %vm1641_vm10, %v2260_v51, %v2261_v5  ;;  %v1525_v51 = vshll.u32 %v6802_v48, 16 }
 0x255   : > { %v3078_v10 = vpop.f32.mrf.mxu2  ;;  %v2995_v44 = vadd.f32 %v2994_v15, %v2906_v7  ;;  %v5241_v7 = vld [vmem:[#allocation2 + $0x78] sm:$0xf0] }
 0x256   : > { %v6786_v32 = vadd.f32 %v3078_v10, %v2990_v41  ;;  %v3335_v41 = vunpack.c.l.b16 %v3191_v3  ;;  %v5243_v15 = vor.u32 %v5242_v11, %v5241_v7  ;;  %v1518_v7 = vshrl.u32 %v6465_v43, 16  ;;  %v6817_v11 = vpop.f32.mrf.mxu0 }
 0x257   : > { %3033 = vmatmul.bf16.gmra.mxu1 %v1516_v13  ;;  %v2911_v43 = vadd.f32 %v6476_v40, %v6707_v55  ;;  %v5119_v40 = vld [vmem:[#allocation9 + $0x28] sm:$0xff] }
 0x258   : > { %7573 = vst [vmem:[#allocation28_spill] sm:$0xff] %v6786_v32  ;;  %v6805_v47 = vpack.c.b16 %v3335_v41, %v3335_v41  ;;  %v1672_v33 = vrot.slane %v5243_v15, 1  ;;  %v5279_v41 = vld [vmem:[#allocation2 + $0xc0] sm:$0xf0]  ;;  %4328 = vmatpush.bf16.msra.mxu2 %v5119_v40 }
 0x25a   : > { %v2689_v4 = vpop.f32.mrf.mxu3  ;;  %7576 = vst [vmem:[#allocation18_spill] sm:$0xff] %v6805_v47 }
 0x25b   : > { %v6795_v10 = vadd.f32 %v2689_v4, %v6528_v25  ;;  %v1673_v25 = vrot.slane %v6757_v23, 1  ;;  %v5090_v4 = vld [vmem:[#allocation8 + $0x180] sm:$0xff]  ;;  %v3423_v23 = vshrl.u32 %v6774_v26, 16 }
 0x25c   : > { %3992 = vmatmul.bf16.gmra.mxu0 %v3421_v60  ;;  %v2996_v28 = vpop.f32.mrf.mxu1  ;;  %v1522_v60 = vrot.slane %v1520_v58, 1  ;;  %3882 = vmatpush.bf16.msra.mxu3 %v5090_v4  ;;  %v5280_v58 = vld [vmem:[#allocation2 + $0xc0] sm:$0xe] }
 0x25d   : > { %v3080_v24 = vpop.f32.mrf.mxu2  ;;  %v2997_v13 = vadd.f32 %v2996_v28, %v2908_v52  ;;  %v1674_v5 = vsel %vm1641_vm10, %v1672_v33, %v1673_v25  ;;  %v3428_v15 = vor.u32 %v3427_v59, %v3423_v23  ;;  %v3192_v25 = vld [vmem:[#allocation2 + $0x68] sm:$0x1] }
 0x25e   : > { %2731 = vmatmul.bf16.gmra.mxu3 %v2262_v38  ;;  %v6807_v3 = vadd.f32 %v3080_v24, %v2992_v29  ;;  %v3430_v29 = vshll.u32 %v6805_v47, 16  ;;  %v1523_v52 = vor.u32 %v1522_v60, %v1518_v7  ;;  %v1527_v38 = vrot.slane %v1525_v51, 1  ;;  %v7578_v51 = vld [vmem:[#allocation21_spill] sm:$0xff] }
 0x25f   : > { %v5281_v24 = vor.u32 %v5280_v58, %v5279_v41  ;;  %v1364_v47 = vunpack.c.l.b16 %v1220_v61  ;;  %v3336_v7 = vunpack.c.l.b16 %v3192_v25  ;;  %v7579_v41 = vld [vmem:[#allocation31_spill] sm:$0xff]  ;;  %v6832_v58 = vld [vmem:[#allocation2 + $0x60] sm:$0xff]  }
 0x260   : > { %7577 = vst [vmem:[#allocation22_spill] sm:$0xff] %v6807_v3  ;;  %v1528_v32 = vsel %vm1384_vm9, %v1523_v52, %v1527_v38 }
 0x261   : > { %v2263_v59 = vrot.slane %v5281_v24, 1 }
 0x262   : > { %v2692_v56 = vpop.f32.mrf.mxu3  ;;  %3122 = vmatmul.bf16.gmra.mxu2 %v1674_v5  ;;  %v2264_v5 = vrot.slane %v7578_v51, 1  ;;  %v1221_v51 = vld [vmem:[#allocation2 + $0xa4] sm:$0x1] }
 0x263   : > { %v6813_v1 = vadd.f32 %v2692_v56, %v6541_v36  ;;  %v5468_v36 = vld [vmem:[#allocation2 + $0x84] sm:$0xe]  ;;  %v3432_v56 = vrot.slane %v3430_v29, 1 }
 0x264   : > { %v2999_v28 = vpop.f32.mrf.mxu1  ;;  %v5469_v29 = vor.u32 %v5468_v36, %v7579_v41  ;;  %v1676_v36 = vrot.slane %v6802_v48, 1  ;;  %v2916_v48 = vadd.f32 %v6513_v20, %v6740_v18  ;;  %v5106_v20 = vld [vmem:[#allocation8 + $0x200] sm:$0xff] }
 0x265   : > { %v3083_v4 = vpop.f32.mrf.mxu2  ;;  %v3000_v33 = vadd.f32 %v2999_v28, %v2911_v43  ;;  %v3433_v60 = vsel %vm1384_vm9, %v3428_v15, %v3432_v56  ;;  %v6836_v43 = vpack.c.b16 %v3336_v7, %v3336_v7  ;;  %v6838_v15 = vpop.f32.mrf.mxu0  ;;  %v2265_v28 = vsel %vm1641_vm10, %v2263_v59, %v2264_v5  ;;  %4060 = vmatpush.bf16.msra.mxu1 %v5106_v20 }
 0x266   : > { %v6821_v3 = vadd.f32 %v3083_v4, %v2995_v44  ;;  %v6830_v44 = vpack.c.b16 %v1364_v47, %v1364_v47  ;;  %v1675_v24 = vrot.slane %v5469_v29, 1  ;;  %v3437_v47 = vshll.u32 %v6832_v58, 16 }
 0x267   : > { %3038 = vmatmul.bf16.gmra.mxu1 %v1528_v32  ;;  %v7580_v32 = vld [vmem:[#allocation35_spill] sm:$0xff]  ;;  %v3435_v59 = vshrl.u32 %v6832_v58, 16  ;;  %v2921_v20 = vadd.f32 %v6550_v57, %v6780_v37 }
 0x268   : > { %v2913_v52 = vadd.f32 %v7580_v32, %v6720_v62  ;;  %v1537_v4 = vshll.u32 %v6830_v44, 16  ;;  %v3442_v62 = vshll.u32 %v6836_v43, 16  ;;  %v3439_v40 = vrot.slane %v3437_v47, 1 }
 0x26a   : > { %v2694_v55 = vpop.f32.mrf.mxu3  ;;  %v3440_v32 = vor.u32 %v3439_v40, %v3435_v59  ;;  %v3449_v40 = vshll.u32 %v6575_v9, 16 }
 0x26b   : > { %v6827_v23 = vadd.f32 %v2694_v55, %v6555_v54  ;;  %v1539_v55 = vrot.slane %v1537_v4, 1  ;;  %v1544_v4 = vshll.u32 %v6530_v17, 16 }
 0x26c   : > { %3997 = vmatmul.bf16.gmra.mxu0 %v3433_v60  ;;  %v3001_v61 = vpop.f32.mrf.mxu1  ;;  %v1677_v60 = vsel %vm1641_vm10, %v1675_v24, %v1676_v36  ;;  %v5244_v36 = vld [vmem:[#allocation2 + $0x90] sm:$0xf0] }
 0x26d   : > { %v3085_v38 = vpop.f32.mrf.mxu2  ;;  %v3002_v54 = vadd.f32 %v3001_v61, %v2913_v52  ;;  %v6854_v52 = vpop.f32.mrf.mxu0 }
 0x26e   : > { %2736 = vmatmul.bf16.gmra.mxu3 %v2265_v28  ;;  %v6843_v25 = vadd.f32 %v3085_v38, %v2997_v13  ;;  %v3444_v13 = vrot.slane %v3442_v62, 1  ;;  %v1365_v38 = vunpack.c.l.b16 %v1221_v51  ;;  %v5245_v62 = vld [vmem:[#allocation2 + $0x90] sm:$0xe]  ;;  %v1542_v51 = vshrl.u32 %v6530_v17, 16 }
 0x270   : > { %v3445_v24 = vsel %vm1384_vm9, %v3440_v32, %v3444_v13 }
 0x272   : > { %v2697_v56 = vpop.f32.mrf.mxu3  ;;  %3127 = vmatmul.bf16.gmra.mxu2 %v1677_v60  ;;  %v5246_v60 = vor.u32 %v5245_v62, %v5244_v36  ;;  %v1222_v36 = vld [vmem:[#allocation2 + $0xb0] sm:$0x1]  ;;  %v3194_v62 = vld [vmem:[#allocation2 + $0x80] sm:$0x1] }
 0x273   : > { %v6849_v7 = vadd.f32 %v2697_v56, %v6564_v27  ;;  %v7581_v27 = vld [vmem:[#allocation27_spill] sm:$0xff]  ;;  %v2918_v56 = vadd.f32 %v6534_v35, %v6754_v50  ;;  %v3451_v35 = vrot.slane %v3449_v40, 1 }
 0x274   : > { %v3004_v5 = vpop.f32.mrf.mxu1  ;;  %v1540_v28 = vsel %vm1384_vm9, %v7581_v27, %v1539_v55  ;;  %v1678_v32 = vrot.slane %v5246_v60, 1 }
 0x275   : > { %v3088_v41 = vpop.f32.mrf.mxu2  ;;  %v3005_v29 = vadd.f32 %v3004_v5, %v2916_v48  ;;  %v1546_v5 = vrot.slane %v1544_v4, 1  ;;  %v6878_v50 = vpop.f32.mrf.mxu0 }
 0x276   : > { %v6856_v61 = vadd.f32 %v3088_v41, %v3000_v33  ;;  %v6865_v33 = vpack.c.b16 %v1365_v38, %v1365_v38 }
 0x277   : > { %3043 = vmatmul.bf16.gmra.mxu1 %v1540_v28 }
 0x278   : > { %v1549_v41 = vshll.u32 %v6865_v33, 16 }
 0x27a   : > { %v2699_v18 = vpop.f32.mrf.mxu3  ;;  %v1551_v17 = vrot.slane %v1549_v41, 1  ;;  %v7582_v41 = vld [vmem:[#allocation45_spill] sm:$0xff] }
 0x27b   : > { %v6862_v47 = vadd.f32 %v2699_v18, %v6583_v14  ;;  %v1679_v14 = vrot.slane %v6830_v44, 1  ;;  %v3454_v44 = vshll.u32 %v6585_v63, 16 }
 0x27c   : > { %4002 = vmatmul.bf16.gmra.mxu0 %v3445_v24  ;;  %v3006_v55 = vpop.f32.mrf.mxu1  ;;  %v5471_v24 = vld [vmem:[#allocation2 + $0x9c] sm:$0xe] }
 0x27d   : > { %v3090_v48 = vpop.f32.mrf.mxu2  ;;  %v6870_v59 = vadd.f32 %v3006_v55, %v2918_v56  ;;  %v1680_v28 = vsel %vm1641_vm10, %v1678_v32, %v1679_v14  ;;  %v3456_v40 = vrot.slane %v3454_v44, 1  ;;  %v3338_v14 = vunpack.c.l.b16 %v3194_v62 }
 0x27e   : > { %3883 = vmatmul.bf16.vlgmr.msra.gmra.mxu3 %v6614_v39  ;;  %v6874_v13 = vadd.f32 %v3090_v48, %v3002_v54  ;;  %v3447_v39 = vshrl.u32 %v6575_v9, 16  ;;  %v1547_v54 = vor.u32 %v1546_v5, %v1542_v51  ;;  %v1366_v48 = vunpack.c.l.b16 %v1222_v36  ;;  %v5118_v51 = vld [vmem:[#allocation9 + $0x20] sm:$0xff] }
 0x27f   : > { %v5472_v37 = vor.u32 %v5471_v24, %v6532_v6  ;;  %4329 = vmatpush.bf16.msra.mxu2 %v5118_v51  ;;  %v1556_v32 = vshll.u32 %v7582_v41, 16  ;;  %v6903_v44 = vpack.c.b16 %v3338_v14, %v3338_v14  ;;  %v1682_v24 = vrot.slane %v6865_v33, 1  ;;  %v7587_v33 = vld [vmem:[#allocation47_spill] sm:$0xff] }
 0x280   : > { %v3452_v18 = vor.u32 %v3451_v35, %v3447_v39  ;;  %v1552_v55 = vsel %vm1384_vm9, %v1547_v54, %v1551_v17  ;;  %v1382_v35 = vpack.c.b16 %v1366_v48, %v1366_v48  ;;  %v1554_v36 = vshrl.u32 %v7582_v41, 16 }
 0x281   : > { %v1681_v6 = vrot.slane %v5472_v37, 1 }
 0x282   : > { %v2702_v27 = vpop.f32.mrf.mxu3  ;;  %3132 = vmatmul.bf16.gmra.mxu2 %v1680_v28  ;;  %v3457_v63 = vsel %vm1384_vm9, %v3452_v18, %v3456_v40  ;;  %v7583_v28 = vld [vmem:[#allocation44_spill] sm:$0xff]  ;;  %v1561_v62 = vshll.u32 %v1382_v35, 16 }
 0x283   : > { %v6882_v38 = vadd.f32 %v2702_v27, %v6602_v49  ;;  %v6899_v27 = vld [vmem:[#allocation2 + $0x78] sm:$0xff]   ;;  %v2923_v39 = vadd.f32 %v7583_v28, %v6795_v10  ;;  %v3466_v10 = vshll.u32 %v6903_v44, 16  ;;  %v1683_v40 = vsel %vm1641_vm10, %v1681_v6, %v1682_v24 }
 0x284   : > { %v3009_v4 = vpop.f32.mrf.mxu1  ;;  %v3461_v18 = vshll.u32 %v6899_v27, 16  ;;  %v1563_v51 = vrot.slane %v1561_v62, 1  ;;  %v3459_v37 = vshrl.u32 %v6899_v27, 16 }
 0x285   : > { %v3093_v56 = vpop.f32.mrf.mxu2  ;;  %v3010_v60 = vadd.f32 %v3009_v4, %v2921_v20  ;;  %v7585_v20 = vld [vmem:[#allocation53_spill] sm:$0xff]  ;;  %v1558_v4 = vrot.slane %v1556_v32, 1  ;;  %v3468_v41 = vrot.slane %v3466_v10, 1  ;;  %v1223_v32 = vld [vmem:[#allocation2 + $0xbc] sm:$0x1] }
 0x286   : > { %v6888_v49 = vadd.f32 %v3093_v56, %v3005_v29  ;;  %v6897_v29 = vpop.f32.mrf.mxu0  ;;  %v1367_v62 = vunpack.c.l.b16 %v1223_v32  ;;  %v7588_v10 = vld [vmem:[#allocation60_spill] sm:$0xff] }
 0x287   : > { %3048 = vmatmul.bf16.gmra.mxu1 %v1552_v55  ;;  %v7586_v55 = vld [vmem:[#allocation56_spill] sm:$0xff]  ;;  %v1559_v14 = vor.u32 %v1558_v4, %v1554_v36  ;;  %v5247_v36 = vld [vmem:[#allocation2 + $0xa8] sm:$0xf0]  ;;  %v5248_v4 = vld [vmem:[#allocation2 + $0xa8] sm:$0xe] }
 0x28a   : > { %v2704_v5 = vpop.f32.mrf.mxu3 }
 0x28b   : > { %v6893_v57 = vadd.f32 %v2704_v5, %v6621_v21  ;;  %v2926_v5 = vadd.f32 %v7587_v33, %v6813_v1  ;;  %v7589_v33 = vld [vmem:[#allocation48_spill] sm:$0xff] }
 0x28c   : > { %4007 = vmatmul.bf16.gmra.mxu0 %v3457_v63  ;;  %v3011_v54 = vpop.f32.mrf.mxu1  ;;  %v3463_v63 = vrot.slane %v3461_v18, 1  ;;  %v1564_v18 = vsel %vm1384_vm9, %v1559_v14, %v1563_v51 }
 0x28d   : > { %v6905_v17 = vpop.f32.mrf.mxu2  ;;  %v6907_v21 = vadd.f32 %v3011_v54, %v2923_v39 }
 0x28e   : > { %3888 = vmatmul.bf16.gmra.mxu3 %v7585_v20  ;;  %v6921_v28 = vpop.f32.mrf.mxu0  ;;  %v3464_v6 = vor.u32 %v3463_v63, %v3459_v37  ;;  %v7591_v37 = vld [vmem:[#allocation57_spill] sm:$0xff] }
 0x28f   : > { %7584 = vst [vmem:[#allocation20_spill] sm:$0xff] %v6907_v21  ;;  %v1568_v21 = vshll.u32 %v7589_v33, 16  ;;  %v3473_v14 = vshll.u32 %v7591_v37, 16 }
 0x290   : > { %v3469_v1 = vsel %vm1384_vm9, %v3464_v6, %v3468_v41 }
 0x292   : > { %v2707_v56 = vpop.f32.mrf.mxu3  ;;  %3137 = vmatmul.bf16.gmra.mxu2 %v1683_v40 }
 0x293   : > { %v6916_v48 = vadd.f32 %v2707_v56, %v7586_v55  ;;  %v5249_v55 = vor.u32 %v5248_v4, %v5247_v36  ;;  %v1570_v36 = vrot.slane %v1568_v21, 1 }
 0x294   : > { %v3014_v39 = vpop.f32.mrf.mxu1 }
 0x295   : > { %v3098_v54 = vpop.f32.mrf.mxu2  ;;  %v3015_v20 = vadd.f32 %v3014_v39, %v2926_v5  ;;  %v1383_v5 = vpack.c.b16 %v1367_v62, %v1367_v62  ;;  %v1684_v41 = vrot.slane %v5249_v55, 1  ;;  %v3475_v62 = vrot.slane %v3473_v14, 1  ;;  %v5474_v55 = vld [vmem:[#allocation2 + $0xb4] sm:$0xe]  ;;  %v3196_v14 = vld [vmem:[#allocation2 + $0x98] sm:$0x1] }
 0x296   : > { %v6923_v24 = vadd.f32 %v3098_v54, %v3010_v60  ;;  %v7590_v60 = vld [vmem:[#allocation51_spill] sm:$0xff]  ;;  %v1685_v54 = vrot.slane %v1382_v35, 1  ;;  %v6939_v6 = vpop.f32.mrf.mxu0 }
 0x297   : > { %3053 = vmatmul.bf16.gmra.mxu1 %v1564_v18  ;;  %v2928_v63 = vadd.f32 %v7590_v60, %v6827_v23  ;;  %v1566_v18 = vshrl.u32 %v7589_v33, 16  ;;  %v1573_v4 = vshll.u32 %v1383_v5, 16  ;;  %v3478_v60 = vshll.u32 %v6660_v12, 16 }
 0x298   : > { %v1686_v23 = vsel %vm1641_vm10, %v1684_v41, %v1685_v54 }
 0x299   : > { %v1575_v35 = vrot.slane %v1573_v4, 1  ;;  %v3480_v41 = vrot.slane %v3478_v60, 1 }
 0x29a   : > { %v2709_v56 = vpop.f32.mrf.mxu3 }
 0x29b   : > { %v6928_v40 = vadd.f32 %v2709_v56, %v7588_v10  ;;  %v3471_v10 = vshrl.u32 %v7591_v37, 16 }
 0x29c   : > { %4012 = vmatmul.bf16.gmra.mxu0 %v3469_v1  ;;  %v3016_v51 = vpop.f32.mrf.mxu1 }
 0x29d   : > { %v6934_v39 = vpop.f32.mrf.mxu2  ;;  %v6936_v32 = vadd.f32 %v3016_v51, %v2928_v63  ;;  %v7594_v63 = vld [vmem:[#allocation55_spill] sm:$0xff]  ;;  %v3476_v21 = vor.u32 %v3475_v62, %v3471_v10  ;;  %v7595_v62 = vld [vmem:[#allocation49_spill] sm:$0xff] }
 0x29e   : > { %7592 = vst [vmem:[#allocation21_spill] sm:$0xff] %v6934_v39  ;;  %3893 = vmatmul.bf16.gmra.mxu3 %v6688_v34  ;;  %v1571_v34 = vor.u32 %v1570_v36, %v1566_v18  ;;  %v2931_v33 = vadd.f32 %v7594_v63, %v6849_v7  ;;  %v5117_v18 = vld [vmem:[#allocation9 + $0x18] sm:$0xff]  ;;  %v6954_v36 = vpop.f32.mrf.mxu0 }
 0x29f   : > { %7593 = vst [vmem:[#allocation31_spill] sm:$0xff] %v6936_v32  ;;  %v3481_v12 = vsel %vm1384_vm9, %v3476_v21, %v3480_v41  ;;  %4330 = vmatpush.bf16.msra.mxu2 %v5117_v18  ;;  %v6960_v10 = vld [vmem:[#allocation2 + $0x90] sm:$0xff]   ;;  %v5289_v21 = vld [vmem:[#allocation2 + $0x18] sm:$0xf0] }
 0x2a2   : > { %v2712_v1 = vpop.f32.mrf.mxu3  ;;  %3142 = vmatmul.bf16.gmra.mxu2 %v1686_v23  ;;  %v5475_v23 = vor.u32 %v5474_v55, %v7595_v62  ;;  %v3485_v55 = vshll.u32 %v6960_v10, 16  ;;  %v3483_v62 = vshrl.u32 %v6960_v10, 16 }
 0x2a3   : > { %v6944_v56 = vadd.f32 %v2712_v1, %v6677_v53  ;;  %v1576_v53 = vsel %vm1384_vm9, %v1571_v34, %v1575_v35  ;;  %v3340_v1 = vunpack.c.l.b16 %v3196_v14 }
 0x2a4   : > { %v3019_v51 = vpop.f32.mrf.mxu1 }
 0x2a5   : > { %v3103_v32 = vpop.f32.mrf.mxu2  ;;  %v3020_v39 = vadd.f32 %v3019_v51, %v2931_v33  ;;  %v6964_v60 = vpack.c.b16 %v3340_v1, %v3340_v1  ;;  %v1687_v33 = vrot.slane %v5475_v23, 1  ;;  %v5290_v51 = vld [vmem:[#allocation2 + $0x18] sm:$0xe]  ;;  %v3487_v1 = vrot.slane %v3485_v55, 1 }
 0x2a6   : > { %v6950_v54 = vadd.f32 %v3103_v32, %v3015_v20  ;;  %v7596_v20 = vld [vmem:[#allocation58_spill] sm:$0xff]  ;;  %v6977_v18 = vpop.f32.mrf.mxu0 }
 0x2a7   : > { %3058 = vmatmul.bf16.gmra.mxu1 %v1576_v53  ;;  %v2933_v32 = vadd.f32 %v7596_v20, %v6862_v47  ;;  %v3490_v14 = vshll.u32 %v6964_v60, 16  ;;  %v5291_v53 = vor.u32 %v5290_v51, %v5289_v21  ;;  %v5426_v20 = vld [vmem:[#allocation2 + $0x9c] sm:$0xff]  }
 0x2a9   : > { %v3492_v23 = vrot.slane %v3490_v14, 1  ;;  %v3618_v21 = vrot.slane %v5291_v53, 1  ;;  %v5477_v53 = vld [vmem:[#allocation2 + $0x24] sm:$0xe] }
 0x2aa   : > { %v2714_v4 = vpop.f32.mrf.mxu3 }
 0x2ab   : > { %v6957_v7 = vadd.f32 %v2714_v4, %v6695_v22  ;;  %v1688_v22 = vrot.slane %v1383_v5, 1  ;;  %v2936_v5 = vadd.f32 %v6674_v2, %v6882_v38 }
 0x2ac   : > { %4017 = vmatmul.bf16.gmra.mxu0 %v3481_v12  ;;  %v3021_v34 = vpop.f32.mrf.mxu1 }
 0x2ad   : > { %v6966_v35 = vpop.f32.mrf.mxu2  ;;  %v6968_v63 = vadd.f32 %v3021_v34, %v2933_v32  ;;  %v1689_v47 = vsel %vm1641_vm10, %v1687_v33, %v1688_v22  ;;  %v3272_v32 = vunpack.c.l.b16 %v5426_v20  ;;  %v7603_v20 = vld [vmem:[#allocation54_spill] sm:$0xff] }
 0x2ae   : > { %3898 = vmatmul.bf16.gmra.mxu3 %v6701_v8  ;;  %v7598_v8 = vld [vmem:[#allocation52_spill] sm:$0xff] }
 0x2af   : > { %7597 = vst [vmem:[#allocation35_spill] sm:$0xff] %v6968_v63  ;;  %v3619_v4 = vrot.slane %v7598_v8, 1 }
 0x2b1   : > { %v3620_v55 = vsel %vm1641_vm10, %v3618_v21, %v3619_v4  ;;  %v7604_v21 = vld [vmem:[#allocation30_spill] sm:$0xff] }
 0x2b2   : > { %v2717_v41 = vpop.f32.mrf.mxu3  ;;  %3147 = vmatmul.bf16.gmra.mxu2 %v1689_v47  ;;  %v7599_v47 = vld [vmem:[#allocation29_spill] sm:$0xff] }
 0x2b3   : > { %v6975_v12 = vadd.f32 %v2717_v41, %v6713_v0  ;;  %v3488_v0 = vor.u32 %v3487_v1, %v3483_v62  ;;  %v7600_v8 = vunpack.c.h.b16 %v7599_v47  ;;  %v2938_v1 = vadd.f32 %v6699_v19, %v6893_v57  ;;  %v7605_v19 = vld [vmem:[#allocation33_spill] sm:$0xff] }
 0x2b4   : > { %v3024_v34 = vpop.f32.mrf.mxu1 }
 0x2b5   : > { %v3108_v33 = vpop.f32.mrf.mxu2  ;;  %v3025_v22 = vadd.f32 %v3024_v34, %v2936_v5  ;;  %v3493_v41 = vsel %vm1384_vm9, %v3488_v0, %v3492_v23  ;;  %v6989_v2 = vpack.c.b16 %v7600_v8, %v3272_v32  ;;  %v6997_v5 = vpop.f32.mrf.mxu0  ;;  %v5478_v32 = vor.u32 %v5477_v53, %v7603_v20 }
 0x2b6   : > { %v6983_v51 = vadd.f32 %v3108_v33, %v3020_v39  ;;  %v3502_v33 = vshll.u32 %v7604_v21, 16  ;;  %v2941_v8 = vadd.f32 %v6723_v45, %v6916_v48  ;;  %v7019_v45 = vld [vmem:[#allocation2 + $0xa8] sm:$0xff]  }
 0x2b7   : > { %4061 = vmatmul.bf16.vlgmr.msra.gmra.mxu1 %v3620_v55  ;;  %v3497_v39 = vshll.u32 %v6989_v2, 16  ;;  %v3621_v55 = vrot.slane %v5478_v32, 1  ;;  %v7608_v48 = vld [vmem:[#allocation34_spill] sm:$0xff] }
 0x2b9   : > { %v3499_v34 = vrot.slane %v3497_v39, 1 }
 0x2ba   : > { %v2719_v38 = vpop.f32.mrf.mxu3 }
 0x2bb   : > { %v6992_v14 = vadd.f32 %v2719_v38, %v6734_v16  ;;  %v3495_v16 = vshrl.u32 %v6989_v2, 16 }
 0x2bc   : > { %4022 = vmatmul.bf16.gmra.mxu0 %v3493_v41  ;;  %v3026_v4 = vpop.f32.mrf.mxu1  ;;  %v7606_v41 = vld [vmem:[#allocation59_spill] sm:$0xff] }
 0x2bd   : > { %v6999_v62 = vpop.f32.mrf.mxu2  ;;  %v7001_v23 = vadd.f32 %v3026_v4, %v2938_v1  ;;  %v3622_v47 = vrot.slane %v7606_v41, 1  ;;  %v3500_v38 = vor.u32 %v3499_v34, %v3495_v16  ;;  %v3504_v1 = vrot.slane %v3502_v33, 1  ;;  %v3198_v4 = vld [vmem:[#allocation2 + $0xb0] sm:$0x1] }
 0x2be   : > { %7601 = vst [vmem:[#allocation27_spill] sm:$0xff] %v6999_v62  ;;  %3903 = vmatmul.bf16.gmra.mxu3 %v6759_v42  ;;  %v2943_v34 = vadd.f32 %v6746_v46, %v6928_v40  ;;  %v3509_v33 = vshll.u32 %v7019_v45, 16 }
 0x2bf   : > { %7602 = vst [vmem:[#allocation45_spill] sm:$0xff] %v7001_v23  ;;  %v7013_v23 = vpop.f32.mrf.mxu0  ;;  %v3623_v21 = vsel %vm1641_vm10, %v3621_v55, %v3622_v47  ;;  %v3505_v32 = vsel %vm1384_vm9, %v3500_v38, %v3504_v1  ;;  %v5292_v38 = vld [vmem:[#allocation2 + $0x30] sm:$0xf0]  ;;  %v5293_v1 = vld [vmem:[#allocation2 + $0x30] sm:$0xe] }
 0x2c0   : > { %v5294_v40 = vor.u32 %v5293_v1, %v5292_v38 }
 0x2c2   : > { %v2722_v0 = vpop.f32.mrf.mxu3 }
 0x2c3   : > { %v7008_v57 = vadd.f32 %v2722_v0, %v7605_v19  ;;  %v3342_v0 = vunpack.c.l.b16 %v3198_v4  ;;  %v5116_v19 = vld [vmem:[#allocation9 + $0x10] sm:$0xff]  ;;  %v3511_v4 = vrot.slane %v3509_v33, 1  ;;  %v3624_v33 = vrot.slane %v5294_v40, 1 }
 0x2c4   : > { %v3029_v42 = vpop.f32.mrf.mxu1  ;;  %4331 = vmatpush.bf16.msra.mxu2 %v5116_v19  ;;  %v7612_v19 = vld [vmem:[#allocation62_spill] sm:$0xff] }
 0x2c5   : > { %v3113_v53 = vpop.f32.mrf.mxu2  ;;  %v3030_v20 = vadd.f32 %v3029_v42, %v2941_v8  ;;  %v3507_v42 = vshrl.u32 %v7019_v45, 16 }
 0x2c6   : > { %v7015_v39 = vadd.f32 %v3113_v53, %v3025_v22  ;;  %v7026_v22 = vpack.c.b16 %v3342_v0, %v3342_v0 }
 0x2c7   : > { %4066 = vmatmul.bf16.gmra.mxu1 %v3623_v21  ;;  %v7036_v21 = vpop.f32.mrf.mxu0 }
 0x2c8   : > { %7607 = vst [vmem:[#allocation44_spill] sm:$0xff] %v7015_v39  ;;  %v3514_v53 = vshll.u32 %v7026_v22, 16 }
 0x2ca   : > { %v2724_v41 = vpop.f32.mrf.mxu3 }
 0x2cb   : > { %v7022_v16 = vadd.f32 %v2724_v41, %v7608_v48  ;;  %v3625_v41 = vrot.slane %v7612_v19, 1  ;;  %v2946_v48 = vadd.f32 %v6768_v31, %v6944_v56  ;;  %v7615_v56 = vld [vmem:[#allocation39_spill] sm:$0xff] }
 0x2cc   : > { %4027 = vmatmul.bf16.gmra.mxu0 %v3505_v32  ;;  %v3031_v55 = vpop.f32.mrf.mxu1  ;;  %v7611_v32 = vld [vmem:[#allocation37_spill] sm:$0xff] }
 0x2cd   : > { %v7029_v47 = vpop.f32.mrf.mxu2  ;;  %v7031_v8 = vadd.f32 %v3031_v55, %v2943_v34  ;;  %v3516_v34 = vrot.slane %v3514_v53, 1  ;;  %v5427_v55 = vld [vmem:[#allocation2 + $0xb4] sm:$0xff]   ;;  %v3626_v38 = vsel %vm1641_vm10, %v3624_v33, %v3625_v41 }
 0x2ce   : > { %7609 = vst [vmem:[#allocation53_spill] sm:$0xff] %v7029_v47  ;;  %3908 = vmatmul.bf16.gmra.mxu3 %v6774_v26  ;;  %v3512_v26 = vor.u32 %v3511_v4, %v3507_v42  ;;  %v5480_v4 = vld [vmem:[#allocation2 + $0x3c] sm:$0xe] }
 0x2cf   : > { %7610 = vst [vmem:[#allocation56_spill] sm:$0xff] %v7031_v8  ;;  %v3276_v8 = vunpack.c.l.b16 %v5427_v55  ;;  %v7055_v53 = vpop.f32.mrf.mxu0  ;;  %v7619_v55 = vld [vmem:[#allocation38_spill] sm:$0xff] }
 0x2d0   : > { %v3517_v1 = vsel %vm1384_vm9, %v3512_v26, %v3516_v34  ;;  %v3526_v33 = vshll.u32 %v7619_v55, 16 }
 0x2d2   : > { %v2727_v46 = vpop.f32.mrf.mxu3 }
 0x2d3   : > { %v7039_v0 = vadd.f32 %v2727_v46, %v7611_v32  ;;  %v7613_v46 = vld [vmem:[#allocation36_spill] sm:$0xff] }
 0x2d4   : > { %v3034_v47 = vpop.f32.mrf.mxu1  ;;  %v7614_v32 = vunpack.c.h.b16 %v7613_v46 }
 0x2d5   : > { %v3118_v39 = vpop.f32.mrf.mxu2  ;;  %v3035_v62 = vadd.f32 %v3034_v47, %v2946_v48 }
 0x2d6   : > { %v7044_v63 = vadd.f32 %v3118_v39, %v3030_v20  ;;  %v7050_v19 = vpack.c.b16 %v7614_v32, %v3276_v8  ;;  %v2948_v20 = vadd.f32 %v6791_v30, %v6957_v7  ;;  %v7618_v8 = vld [vmem:[#allocation63_spill] sm:$0xff] }
 0x2d7   : > { %4071 = vmatmul.bf16.gmra.mxu1 %v3626_v38  ;;  %v5481_v48 = vor.u32 %v5480_v4, %v7618_v8  ;;  %v7621_v7 = vld [vmem:[#allocation23_spill] sm:$0xff] }
 0x2d8   : > { %v3521_v39 = vshll.u32 %v7050_v19, 16  ;;  %v3519_v26 = vshrl.u32 %v7050_v19, 16  ;;  %v3628_v32 = vrot.slane %v7621_v7, 1 }
 0x2d9   : > { %v3627_v30 = vrot.slane %v5481_v48, 1 }
 0x2da   : > { %v2729_v31 = vpop.f32.mrf.mxu3  ;;  %v3523_v34 = vrot.slane %v3521_v39, 1 }
 0x2db   : > { %v7053_v42 = vadd.f32 %v2729_v31, %v7615_v56  ;;  %v2951_v31 = vadd.f32 %v6817_v11, %v6975_v12  ;;  %v3629_v55 = vsel %vm1641_vm10, %v3627_v30, %v3628_v32  ;;  %v7080_v11 = vld [vmem:[#allocation2 + $0xc0] sm:$0xff]   ;;  %v7623_v12 = vld [vmem:[#allocation42_spill] sm:$0xff] }
 0x2dc   : > { %4032 = vmatmul.bf16.gmra.mxu0 %v3517_v1  ;;  %v3036_v47 = vpop.f32.mrf.mxu1  ;;  %v7620_v1 = vld [vmem:[#allocation41_spill] sm:$0xff]  ;;  %v3524_v56 = vor.u32 %v3523_v34, %v3519_v26  ;;  %v2953_v34 = vadd.f32 %v6838_v15, %v6992_v14 }
 0x2dd   : > { %v7060_v40 = vpop.f32.mrf.mxu2  ;;  %v7062_v41 = vadd.f32 %v3036_v47, %v2948_v20  ;;  %v3528_v20 = vrot.slane %v3526_v33, 1  ;;  %v3200_v47 = vld [vmem:[#allocation2 + $0xc8] sm:$0x1]  ;;  %v3533_v33 = vshll.u32 %v7080_v11, 16 }
 0x2de   : > { %7616 = vst [vmem:[#allocation47_spill] sm:$0xff] %v7060_v40  ;;  %3913 = vmatmul.bf16.gmra.mxu3 %v6832_v58  ;;  %v7074_v58 = vpop.f32.mrf.mxu0 }
 0x2df   : > { %7617 = vst [vmem:[#allocation60_spill] sm:$0xff] %v7062_v41  ;;  %v3529_v48 = vsel %vm1384_vm9, %v3524_v56, %v3528_v20  ;;  %v5295_v56 = vld [vmem:[#allocation2 + $0x48] sm:$0xf0] }
 0x2e2   : > { %v2732_v38 = vpop.f32.mrf.mxu3 }
 0x2e3   : > { %v7069_v46 = vadd.f32 %v2732_v38, %v7620_v1  ;;  %v3344_v38 = vunpack.c.l.b16 %v3200_v47  ;;  %v5115_v1 = vld [vmem:[#allocation9 + $0x8] sm:$0xff]  ;;  %v3531_v47 = vshrl.u32 %v7080_v11, 16 }
 0x2e4   : > { %v3039_v4 = vpop.f32.mrf.mxu1  ;;  %4332 = vmatpush.bf16.msra.mxu2 %v5115_v1  ;;  %v7627_v1 = vld [vmem:[#allocation19_spill] sm:$0xff] }
 0x2e5   : > { %v3123_v8 = vpop.f32.mrf.mxu2  ;;  %v3040_v39 = vadd.f32 %v3039_v4, %v2951_v31  ;;  %v5296_v4 = vld [vmem:[#allocation2 + $0x48] sm:$0xe] }
 0x2e6   : > { %v7076_v41 = vadd.f32 %v3123_v8, %v3035_v62  ;;  %v7087_v62 = vpack.c.b16 %v3344_v38, %v3344_v38  ;;  %v7095_v20 = vpop.f32.mrf.mxu0  ;;  %v3535_v8 = vrot.slane %v3533_v33, 1 }
 0x2e7   : > { %4076 = vmatmul.bf16.gmra.mxu1 %v3629_v55  ;;  %v5297_v55 = vor.u32 %v5296_v4, %v5295_v56 }
 0x2e8   : > { %7622 = vst [vmem:[#allocation48_spill] sm:$0xff] %v7076_v41  ;;  %v3538_v15 = vshll.u32 %v7087_v62, 16 }
 0x2ea   : > { %v2734_v7 = vpop.f32.mrf.mxu3 }
 0x2eb   : > { %v7083_v26 = vadd.f32 %v2734_v7, %v7623_v12  ;;  %v3631_v7 = vrot.slane %v7627_v1, 1  ;;  %v2956_v12 = vadd.f32 %v6854_v52, %v7008_v57  ;;  %v5483_v52 = vld [vmem:[#allocation2 + $0x54] sm:$0xe]  ;;  %v2958_v57 = vadd.f32 %v6878_v50, %v7022_v16 }
 0x2ec   : > { %4037 = vmatmul.bf16.gmra.mxu0 %v3529_v48  ;;  %v3041_v30 = vpop.f32.mrf.mxu1  ;;  %v7626_v48 = vld [vmem:[#allocation43_spill] sm:$0xff] }
 0x2ed   : > { %v7090_v32 = vpop.f32.mrf.mxu2  ;;  %v7092_v31 = vadd.f32 %v3041_v30, %v2953_v34  ;;  %v3536_v34 = vor.u32 %v3535_v8, %v3531_v47 }
 0x2ee   : > { %7624 = vst [vmem:[#allocation51_spill] sm:$0xff] %v7090_v32  ;;  %3918 = vmatmul.bf16.gmra.mxu3 %v6575_v9  ;;  %v3540_v9 = vrot.slane %v3538_v15, 1  ;;  %v7107_v4 = vpop.f32.mrf.mxu0 }
 0x2ef   : > { %7625 = vst [vmem:[#allocation57_spill] sm:$0xff] %v7092_v31  ;;  %v3630_v31 = vrot.slane %v5297_v55, 1 }
 0x2f0   : > { %v3541_v56 = vsel %vm1384_vm9, %v3536_v34, %v3540_v9  ;;  %v2961_v34 = vadd.f32 %v6897_v29, %v7039_v0  ;;  %v5298_v29 = vld [vmem:[#allocation2 + $0x60] sm:$0xf0]  ;;  %v5299_v0 = vld [vmem:[#allocation2 + $0x60] sm:$0xe] }
 0x2f1   : > { %v3632_v33 = vsel %vm1641_vm10, %v3630_v31, %v3631_v7  ;;  %v7630_v7 = vld [vmem:[#allocation18_spill] sm:$0xff] }
 0x2f2   : > { %v2737_v14 = vpop.f32.mrf.mxu3 }
 0x2f3   : > { %v2738_v38 = vadd.f32 %v2737_v14, %v7626_v48  ;;  %v7628_v48 = vld [vmem:[#allocation46_spill] sm:$0xff] }
 0x2f4   : > { %v3044_v30 = vpop.f32.mrf.mxu1 }
 0x2f5   : > { %v3128_v32 = vpop.f32.mrf.mxu2  ;;  %v3045_v41 = vadd.f32 %v3044_v30, %v2956_v12  ;;  %v3634_v12 = vrot.slane %v7630_v7, 1 }
 0x2f6   : > { %v7103_v40 = vadd.f32 %v3128_v32, %v3040_v39  ;;  %v7629_v32 = vld [vmem:[#allocation26_spill] sm:$0xff] }
 0x2f7   : > { %4081 = vmatmul.bf16.gmra.mxu1 %v3632_v33  ;;  %v5484_v31 = vor.u32 %v5483_v52, %v7629_v32  ;;  %v3637_v32 = vrot.slane %v6836_v43, 1 }
 0x2f9   : > { %v3633_v55 = vrot.slane %v5484_v31, 1  ;;  %v2966_v31 = vadd.f32 %v6939_v6, %v7069_v46  ;;  %v2971_v46 = vadd.f32 %v6977_v18, %v2738_v38  ;;  %v7158_v18 = vpop.f32.mrf.mxu0  ;;  %v5302_v38 = vld [vmem:[#allocation2 + $0x78] sm:$0xe] }
 0x2fa   : > { %v2739_v14 = vpop.f32.mrf.mxu3 }
 0x2fb   : > { %v2740_v1 = vadd.f32 %v2739_v14, %v7628_v48  ;;  %v3635_v16 = vsel %vm1641_vm10, %v3633_v55, %v3634_v12 }
 0x2fc   : > { %4042 = vmatmul.bf16.gmra.mxu0 %v3541_v56  ;;  %v3046_v47 = vpop.f32.mrf.mxu1  ;;  %v5114_v56 = vld [vmem:[#allocation9] sm:$0xff] }
 0x2fd   : > { %v7112_v8 = vpop.f32.mrf.mxu2  ;;  %v7114_v39 = vadd.f32 %v3046_v47, %v2958_v57  ;;  %4333 = vmatpush.bf16.msra.mxu2 %v5114_v56  ;;  %v5300_v47 = vor.u32 %v5299_v0, %v5298_v29  ;;  %v7631_v29 = vld [vmem:[#allocation50_spill] sm:$0xff] }
 0x2fe   : > { %3923 = vmatmul.bf16.gmra.mxu3 %v6899_v27  ;;  %v2963_v27 = vadd.f32 %v6921_v28, %v7053_v42 }
 0x2ff   : > { %v3636_v7 = vrot.slane %v5300_v47, 1 }
 0x302   : > { %v3884_v15 = vpop.f32.mrf.mxu3 }
 0x304   : > { %v3049_v9 = vpop.f32.mrf.mxu1 }
 0x305   : > { %v3133_v30 = vpop.f32.mrf.mxu2  ;;  %v3050_v33 = vadd.f32 %v3049_v9, %v2961_v34  ;;  %v3638_v34 = vsel %vm1641_vm10, %v3636_v7, %v3637_v32  ;;  %v3643_v7 = vrot.slane %v6903_v44, 1  ;;  %v7176_v44 = vld [vmem:[%s7468_s4] ss:$0 sm:$0xff] }
 0x306   : > { %v7121_v50 = vadd.f32 %v3133_v30, %v3045_v41 }
 0x307   : > { %4086 = vmatmul.bf16.gmra.mxu1 %v3635_v16 }
 0x30a   : > { %v3886_v14 = vpop.f32.mrf.mxu3 }
 0x30c   : > { %v3051_v48 = vpop.f32.mrf.mxu1 }
 0x30d   : > { %v7126_v52 = vpop.f32.mrf.mxu2  ;;  %v7128_v57 = vadd.f32 %v3051_v48, %v2963_v27 }
 0x30e   : > { %3928 = vmatmul.bf16.gmra.mxu3 %v7591_v37  ;;  %v2968_v37 = vadd.f32 %v6954_v36, %v7083_v26  ;;  %v2973_v36 = vadd.f32 %v6997_v5, %v2740_v1  ;;  %v3974_v5 = vadd.f32 %v7013_v23, %v3884_v15 }
 0x312   : > { %v3889_v41 = vpop.f32.mrf.mxu3 }
 0x314   : > { %v3054_v55 = vpop.f32.mrf.mxu1 }
 0x315   : > { %v3138_v12 = vpop.f32.mrf.mxu2  ;;  %v3055_v28 = vadd.f32 %v3054_v55, %v2966_v31 }
 0x316   : > { %v7134_v42 = vadd.f32 %v3138_v12, %v3050_v33 }
 0x317   : > { %4091 = vmatmul.bf16.gmra.mxu1 %v3638_v34 }
 0x31a   : > { %v3891_v9 = vpop.f32.mrf.mxu3 }
 0x31c   : > { %v3056_v30 = vpop.f32.mrf.mxu1 }
 0x31d   : > { %v7139_v16 = vpop.f32.mrf.mxu2  ;;  %v7141_v43 = vadd.f32 %v3056_v30, %v2968_v37 }
 0x31e   : > { %3933 = vmatmul.bf16.gmra.mxu3 %v6960_v10  ;;  %v5301_v10 = vld [vmem:[#allocation2 + $0x78] sm:$0xf0] }
 0x31f   : > { %v5303_v55 = vor.u32 %v5302_v38, %v5301_v10 }
 0x322   : > { %v7144_v6 = vpop.f32.mrf.mxu3 }
 0x324   : > { %v3059_v33 = vpop.f32.mrf.mxu1 }
 0x325   : > { %v3143_v56 = vpop.f32.mrf.mxu2  ;;  %v3060_v27 = vadd.f32 %v3059_v33, %v2971_v46  ;;  %v3976_v33 = vadd.f32 %v7036_v21, %v3886_v14 }
 0x326   : > { %v7147_v48 = vadd.f32 %v3143_v56, %v3055_v28  ;;  %v3642_v28 = vrot.slane %v5303_v55, 1  ;;  %v7632_v56 = vld [vmem:[#allocation25_spill] sm:$0xff] }
 0x327   : > { %4096 = vmatmul.bf16.gmra.mxu1 %v7631_v29 }
 0x328   : > { %v3644_v37 = vsel %vm1641_vm10, %v3642_v28, %v3643_v7 }
 0x32a   : > { %v7150_v0 = vpop.f32.mrf.mxu3 }
 0x32c   : > { %v3061_v26 = vpop.f32.mrf.mxu1 }
 0x32d   : > { %v7153_v47 = vpop.f32.mrf.mxu2  ;;  %v7155_v32 = vadd.f32 %v3061_v26, %v2973_v36  ;;  %v7633_v36 = vld [vmem:[#allocation24_spill] sm:$0xff] }
 0x32e   : > { %3938 = vmatmul.bf16.gmra.mxu3 %v6989_v2  ;;  %v7167_v2 = vpop.f32.mrf.mxu0 }
 0x332   : > { %v7160_v31 = vpop.f32.mrf.mxu3 }
 0x334   : > { %v4062_v12 = vpop.f32.mrf.mxu1 }
 0x335   : > { %v3148_v1 = vpop.f32.mrf.mxu2  ;;  %v4063_v30 = vadd.f32 %v4062_v12, %v3974_v5  ;;  %v3979_v12 = vadd.f32 %v7055_v53, %v3889_v41  ;;  %v7636_v53 = vld [vmem:[#allocation22_spill] sm:$0xff] }
 0x336   : > { %v7164_v34 = vadd.f32 %v3148_v1, %v3060_v27  ;;  %v7182_v38 = vpop.f32.mrf.mxu0  ;;  %v7634_v1 = vld [vmem:[#allocation61_spill] sm:$0xff] }
 0x337   : > { %4101 = vmatmul.bf16.gmra.mxu1 %v3644_v37  ;;  %v4142_v29 = vadd.f32 %v4063_v30, %v7632_v56  ;;  %v7635_v37 = vld [vmem:[#allocation28_spill] sm:$0xff] }
 0x339   : > { %v4178_v27 = vadd.f32 %v7176_v44, %v4142_v29 }
 0x33a   : > { %v7169_v46 = vpop.f32.mrf.mxu3 }
 0x33b   : > { %v4210_v21 = vmax.f32 %v4178_v27, 0.0 }
 0x33c   : > { %v4064_v23 = vpop.f32.mrf.mxu1 }
 0x33d   : > { %v4065_v15 = vadd.f32 %v4064_v23, %v3976_v33  ;;  %v5304_v23 = vld [vmem:[#allocation2 + $0x90] sm:$0xf0] }
 0x33e   : > { %3943 = vmatmul.bf16.gmra.mxu3 %v7019_v45  ;;  %v3981_v45 = vadd.f32 %v7074_v58, %v3891_v9  ;;  %v7190_v56 = vpop.f32.mrf.mxu0  ;;  %v3649_v58 = vrot.slane %v6964_v60, 1  ;;  %v3986_v60 = vadd.f32 %v7107_v4, %v7150_v0 }
 0x33f   : > { %v4143_v26 = vadd.f32 %v4065_v15, %v7633_v36  ;;  %v5305_v36 = vld [vmem:[#allocation2 + $0x90] sm:$0xe] }
 0x341   : > { %v4179_v10 = vadd.f32 %v7176_v44, %v4143_v26  ;;  %v5306_v26 = vor.u32 %v5305_v36, %v5304_v23 }
 0x342   : > { %v7184_v55 = vpop.f32.mrf.mxu3 }
 0x343   : > { %v4211_v14 = vmax.f32 %v4179_v10, 0.0 }
 0x344   : > { %v4067_v7 = vpop.f32.mrf.mxu1 }
 0x345   : > { %v4242_v28 = vpack.c.bf16 %v4211_v14, %v4210_v21  ;;  %v4068_v5 = vadd.f32 %v4067_v7, %v3979_v12  ;;  %v3648_v7 = vrot.slane %v5306_v26, 1  ;;  %v3984_v12 = vadd.f32 %v7095_v20, %v7144_v6  ;;  %v7637_v26 = vld [vmem:[#allocation32_spill] sm:$0xff] }
 0x347   : > { %4106 = vmatmul.bf16.gmra.mxu1 %v7634_v1  ;;  %4334 = vmatmul.bf16.vlgmr.msra.gmra.mxu2 %v4242_v28  ;;  %v4144_v30 = vadd.f32 %v4068_v5, %v7635_v37  ;;  %v3650_v28 = vsel %vm1641_vm10, %v3648_v7, %v3649_v58  ;;  %v7200_v5 = vpop.f32.mrf.mxu0  ;;  %v5307_v58 = vld [vmem:[#allocation2 + $0xa8] sm:$0xf0] }
 0x349   : > { %v4180_v27 = vadd.f32 %v7176_v44, %v4144_v30 }
 0x34a   : > { %v3906_v15 = vpop.f32.mrf.mxu3 }
 0x34b   : > { %v4212_v9 = vmax.f32 %v4180_v27, 0.0 }
 0x34c   : > { %v4069_v33 = vpop.f32.mrf.mxu1 }
 0x34d   : > { %v4070_v29 = vadd.f32 %v4069_v33, %v3981_v45 }
 0x34e   : > { %3948 = vmatmul.bf16.gmra.mxu3 %v7050_v19 }
 0x34f   : > { %v4145_v41 = vadd.f32 %v4070_v29, %v7636_v53  ;;  %v7210_v29 = vpop.f32.mrf.mxu0 }
 0x351   : > { %v4181_v10 = vadd.f32 %v7176_v44, %v4145_v41 }
 0x352   : > { %v7202_v45 = vpop.f32.mrf.mxu3 }
 0x353   : > { %v4213_v21 = vmax.f32 %v4181_v10, 0.0 }
 0x354   : > { %v4072_v14 = vpop.f32.mrf.mxu1 }
 0x355   : > { %v4243_v19 = vpack.c.bf16 %v4213_v21, %v4212_v9  ;;  %v4073_v1 = vadd.f32 %v4072_v14, %v3984_v12  ;;  %v5308_v9 = vld [vmem:[#allocation2 + $0xa8] sm:$0xe] }
 0x356   : > { %v5309_v12 = vor.u32 %v5308_v9, %v5307_v58  ;;  %v5485_v9 = vld [vmem:[#allocation2 + $0xcc] sm:$0xf0] }
 0x357   : > { %4111 = vmatmul.bf16.gmra.mxu1 %v3650_v28  ;;  %4339 = vmatmul.bf16.gmra.mxu2 %v4243_v19  ;;  %v4146_v37 = vadd.f32 %v4073_v1, %v6821_v3  ;;  %v3989_v3 = vadd.f32 %v7158_v18, %v7160_v31  ;;  %v3655_v1 = vrot.slane %v7026_v22, 1 }
 0x358   : > { %v3654_v28 = vrot.slane %v5309_v12, 1 }
 0x359   : > { %v4182_v20 = vadd.f32 %v7176_v44, %v4146_v37  ;;  %v3994_v37 = vadd.f32 %v7182_v38, %v7184_v55  ;;  %v3096_v38 = vadd.f32 %v6905_v17, %v6870_v59  ;;  %v3999_v17 = vadd.f32 %v7200_v5, %v7202_v45  ;;  %v7642_v5 = vld [vmem:[#allocation21_spill] sm:$0xff] }
 0x35a   : > { %v7213_v27 = vpop.f32.mrf.mxu3 }
 0x35b   : > { %v4214_v53 = vmax.f32 %v4182_v20, 0.0  ;;  %v3656_v20 = vsel %vm1641_vm10, %v3654_v28, %v3655_v1  ;;  %v4001_v1 = vadd.f32 %v7210_v29, %v7213_v27 }
 0x35c   : > { %v4074_v30 = vpop.f32.mrf.mxu1 }
 0x35d   : > { %v4075_v33 = vadd.f32 %v4074_v30, %v3986_v60 }
 0x35e   : > { %3953 = vmatmul.bf16.gmra.mxu3 %v7080_v11  ;;  %v7218_v11 = vpop.f32.mrf.mxu0 }
 0x35f   : > { %v4147_v6 = vadd.f32 %v4075_v33, %v6843_v25  ;;  %v3991_v25 = vadd.f32 %v7167_v2, %v7169_v46 }
 0x361   : > { %v4183_v23 = vadd.f32 %v7176_v44, %v4147_v6 }
 0x362   : > { %v7223_v21 = vpop.f32.mrf.mxu3 }
 0x363   : > { %v4215_v41 = vmax.f32 %v4183_v23, 0.0  ;;  %v648_v23 = vld [vmem:[#allocation2 + $0xcc] sm:$0x1] }
 0x364   : > { %v4077_v36 = vpop.f32.mrf.mxu1 }
 0x365   : > { %v4244_v4 = vpack.c.bf16 %v4215_v41, %v4214_v53  ;;  %v4078_v0 = vadd.f32 %v4077_v36, %v3989_v3  ;;  %v649_v36 = vsel %vm5894_vm2, 0, %v648_v23 }
 0x366   : > { %650 = vst [vmem:[#allocation2 + $0xcc] sm:$0x1] %v649_v36 }
 0x367   : > { %4116 = vmatmul.bf16.gmra.mxu1 %v7637_v26  ;;  %4344 = vmatmul.bf16.gmra.mxu2 %v4244_v4  ;;  %v4148_v10 = vadd.f32 %v4078_v0, %v6856_v61  ;;  %v7229_v61 = vpop.f32.mrf.mxu0 }
 0x369   : > { %v4184_v18 = vadd.f32 %v7176_v44, %v4148_v10 }
 0x36a   : > { %v7233_v33 = vpop.f32.mrf.mxu3 }
 0x36b   : > { %v4216_v60 = vmax.f32 %v4184_v18, 0.0  ;;  %v7640_v18 = vld [vmem:[#allocation40_spill] sm:$0xff] }
 0x36c   : > { %v4079_v14 = vpop.f32.mrf.mxu1 }
 0x36d   : > { %v4080_v7 = vadd.f32 %v4079_v14, %v3991_v25  ;;  %v704_v25 = vld [vmem:[#allocation2 + $0xd4] sm:$0x1]  ;;  %v3184_v58 = vld [vmem:[#allocation2 + $0xcc] sm:$0xff]  }
 0x36e   : > { %v705_v59 = vsel %vm5901_vm4, 0, %v704_v25  ;;  %3958 = vmatmul.bf16.gmra.mxu3 %v3184_v58 }
 0x36f   : > { %v4149_v31 = vadd.f32 %v4080_v7, %v6874_v13  ;;  %v3996_v13 = vadd.f32 %v7190_v56, %v3906_v15  ;;  %v7242_v3 = vpop.f32.mrf.mxu0  ;;  %706 = vst [vmem:[#allocation2 + $0xd4] sm:$0x1] %v705_v59 }
 0x371   : > { %v4185_v19 = vadd.f32 %v7176_v44, %v4149_v31 }
 0x372   : > { %v7245_v26 = vpop.f32.mrf.mxu3 }
 0x373   : > { %v4217_v2 = vmax.f32 %v4185_v19, 0.0  ;;  %v3545_v19 = vshll.u32 %v3184_v58, 16 }
 0x374   : > { %v4082_v46 = vpop.f32.mrf.mxu1 }
 0x375   : > { %v4245_v30 = vpack.c.bf16 %v4217_v2, %v4216_v60  ;;  %v4083_v6 = vadd.f32 %v4082_v46, %v3994_v37  ;;  %v5310_v2 = vld [vmem:[#allocation2 + $0xc0] sm:$0xf0]  ;;  %v5311_v46 = vld [vmem:[#allocation2 + $0xc0] sm:$0xe]  ;;  %v7641_v37 = vld [vmem:[#allocation20_spill] sm:$0xff]  ;;  %v3547_v23 = vrot.slane %v3545_v19, 1 }
 0x376   : > { %v3101_v45 = vadd.f32 %v7642_v5, %v7641_v37 }
 0x377   : > { %4121 = vmatmul.bf16.gmra.mxu1 %v3656_v20  ;;  %4349 = vmatmul.bf16.gmra.mxu2 %v4245_v30  ;;  %v4150_v22 = vadd.f32 %v4083_v6, %v6888_v49  ;;  %v7253_v31 = vpop.f32.mrf.mxu0  ;;  %v3201_v20 = vld [vmem:[#allocation2 + $0xd4] sm:$0x1] }
 0x379   : > { %v4186_v4 = vadd.f32 %v7176_v44, %v4150_v22  ;;  %v3543_v22 = vshrl.u32 %v3184_v58, 16  ;;  %v4004_v58 = vadd.f32 %v7218_v11, %v7223_v21 }
 0x37a   : > { %v3921_v28 = vpop.f32.mrf.mxu3 }
 0x37b   : > { %v4218_v49 = vmax.f32 %v4186_v4, 0.0  ;;  %v3548_v27 = vor.u32 %v3547_v23, %v3543_v22  ;;  %v3661_v4 = vrot.slane %v7087_v62, 1  ;;  %v4006_v62 = vadd.f32 %v7229_v61, %v7233_v33 }
 0x37c   : > { %v4084_v53 = vpop.f32.mrf.mxu1  ;;  %v4009_v33 = vadd.f32 %v7242_v3, %v7245_v26 }
 0x37d   : > { %v4085_v55 = vadd.f32 %v4084_v53, %v3996_v13  ;;  %v3345_v13 = vunpack.c.l.b16 %v3201_v20  ;;  %v5312_v53 = vor.u32 %v5311_v46, %v5310_v2 }
 0x37f   : > { %v4151_v0 = vadd.f32 %v4085_v55, %v3096_v38  ;;  %v3361_v38 = vpack.c.b16 %v3345_v13, %v3345_v13  ;;  %v3660_v55 = vrot.slane %v5312_v53, 1  ;;  %v4011_v53 = vadd.f32 %v7253_v31, %v3921_v28 }
 0x381   : > { %v4187_v56 = vadd.f32 %v7176_v44, %v4151_v0  ;;  %v4013_v0 = vpop.f32.mrf.mxu0 }
 0x382   : > { %v3924_v25 = vpop.f32.mrf.mxu3 }
 0x383   : > { %v4219_v15 = vmax.f32 %v4187_v56, 0.0 }
 0x384   : > { %v4087_v10 = vpop.f32.mrf.mxu1 }
 0x385   : > { %v4246_v7 = vpack.c.bf16 %v4219_v15, %v4218_v49  ;;  %v4088_v12 = vadd.f32 %v4087_v10, %v3999_v17  ;;  %v5486_v17 = vld [vmem:[#allocation2 + $0xcc] sm:$0xe] }
 0x387   : > { %4126 = vmatmul.bf16.gmra.mxu1 %v7640_v18  ;;  %4354 = vmatmul.bf16.gmra.mxu2 %v4246_v7  ;;  %v4152_v60 = vadd.f32 %v4088_v12, %v6923_v24  ;;  %v3550_v24 = vshll.u32 %v3361_v38, 16  ;;  %v3662_v7 = vsel %vm1641_vm10, %v3660_v55, %v3661_v4 }
 0x389   : > { %v4188_v41 = vadd.f32 %v7176_v44, %v4152_v60  ;;  %v3552_v15 = vrot.slane %v3550_v24, 1  ;;  %v7643_v60 = vld [vmem:[#allocation31_spill] sm:$0xff]  ;;  %v4015_v21 = vpop.f32.mrf.mxu0 }
 0x38a   : > { %v3106_v11 = vadd.f32 %v6966_v35, %v7643_v60  ;;  %v3926_v46 = vpop.f32.mrf.mxu3 }
 0x38b   : > { %v4220_v56 = vmax.f32 %v4188_v41, 0.0  ;;  %v3553_v59 = vsel %vm1384_vm9, %v3548_v27, %v3552_v15  ;;  %v4016_v28 = vadd.f32 %v4015_v21, %v3926_v46 }
 0x38c   : > { %v4089_v30 = vpop.f32.mrf.mxu1  ;;  %4047 = vmatmul.bf16.gmra.mxu0 %v3553_v59  ;;  %v7646_v59 = vld [vmem:[#allocation44_spill] sm:$0xff] }
 0x38d   : > { %v4090_v6 = vadd.f32 %v4089_v30, %v4001_v1  ;;  %v5487_v1 = vor.u32 %v5486_v17, %v5485_v9  ;;  %v3664_v30 = vrot.slane %v3361_v38, 1  ;;  %v7644_v38 = vld [vmem:[#allocation35_spill] sm:$0xff] }
 0x38f   : > { %v4153_v36 = vadd.f32 %v4090_v6, %v3101_v45  ;;  %v3663_v45 = vrot.slane %v5487_v1, 1 }
 0x391   : > { %v4189_v29 = vadd.f32 %v7176_v44, %v4153_v36  ;;  %v4018_v35 = vpop.f32.mrf.mxu0 }
 0x392   : > { %v3929_v23 = vpop.f32.mrf.mxu3 }
 0x393   : > { %v4221_v49 = vmax.f32 %v4189_v29, 0.0  ;;  %v7645_v29 = vld [vmem:[#allocation27_spill] sm:$0xff]  ;;  %v4019_v46 = vadd.f32 %v4018_v35, %v3929_v23  ;;  %v7649_v35 = vld [vmem:[#allocation56_spill] sm:$0xff] }
 0x394   : > { %v4092_v10 = vpop.f32.mrf.mxu1  ;;  %v3111_v27 = vadd.f32 %v7645_v29, %v7644_v38  ;;  %v7650_v23 = vld [vmem:[#allocation47_spill] sm:$0xff] }
 0x395   : > { %v4247_v14 = vpack.c.bf16 %v4221_v49, %v4220_v56  ;;  %v4093_v12 = vadd.f32 %v4092_v10, %v4004_v58  ;;  %v4014_v58 = vadd.f32 %v4013_v0, %v3924_v25  ;;  %v7288_v0 = vpop.f32.mrf.mxu2 }
 0x397   : > { %4131 = vmatmul.bf16.gmra.mxu1 %v3662_v7  ;;  %4359 = vmatmul.bf16.gmra.mxu2 %v4247_v14  ;;  %v4154_v18 = vadd.f32 %v4093_v12, %v6950_v54  ;;  %v3665_v54 = vsel %vm1641_vm10, %v3663_v45, %v3664_v30 }
 0x399   : > { %v4190_v37 = vadd.f32 %v7176_v44, %v4154_v18  ;;  %v4020_v56 = vpop.f32.mrf.mxu0  ;;  %v7648_v18 = vld [vmem:[#allocation53_spill] sm:$0xff] }
 0x39a   : > { %v3931_v26 = vpop.f32.mrf.mxu3 }
 0x39b   : > { %v4222_v6 = vmax.f32 %v4190_v37, 0.0 }
 0x39c   : > { %v4094_v19 = vpop.f32.mrf.mxu1 }
 0x39d   : > { %v4095_v2 = vadd.f32 %v4094_v19, %v4006_v62  ;;  %v7647_v62 = vld [vmem:[#allocation45_spill] sm:$0xff] }
 0x39e   : > { %v3116_v19 = vadd.f32 %v7648_v18, %v7647_v62  ;;  %v4417_v62 = vld [vmem:[%s5857_s15 + $0x10] sm:$0xff] }
 0x39f   : > { %v4155_v5 = vadd.f32 %v4095_v2, %v3106_v11 }
 0x3a1   : > { %v4191_v20 = vadd.f32 %v7176_v44, %v4155_v5 }
 0x3a2   : > { %v3934_v7 = vpop.f32.mrf.mxu3 }
 0x3a3   : > { %v4223_v13 = vmax.f32 %v4191_v20, 0.0 }
 0x3a4   : > { %v4097_v61 = vpop.f32.mrf.mxu1 }
 0x3a5   : > { %v4248_v9 = vpack.c.bf16 %v4223_v13, %v4222_v6  ;;  %v4098_v22 = vadd.f32 %v4097_v61, %v4009_v33  ;;  %v7293_v6 = vld [vmem:[%s7470_s6] ss:$0 sm:$0xff]  ;;  %v4415_v61 = vld [vmem:[%s5857_s15] sm:$0xff] }
 0x3a7   : > { %4136 = vmatmul.bf16.gmra.mxu1 %v3665_v54  ;;  %4364 = vmatmul.bf16.gmra.mxu2 %v4248_v9  ;;  %v4156_v41 = vadd.f32 %v4098_v22, %v6983_v51  ;;  %v4023_v51 = vpop.f32.mrf.mxu0  ;;  %v4021_v54 = vadd.f32 %v4020_v56, %v3931_v26  ;;  %v4416_v56 = vld [vmem:[%s5857_s15 + $0x8] sm:$0xff] }
 0x3a9   : > { %v4192_v55 = vadd.f32 %v7176_v44, %v4156_v41 }
 0x3aa   : > { %v3936_v30 = vpop.f32.mrf.mxu3 }
 0x3ab   : > { %v4224_v49 = vmax.f32 %v4192_v55, 0.0 }
 0x3ac   : > { %v4099_v36 = vpop.f32.mrf.mxu1 }
 0x3ad   : > { %v4100_v24 = vadd.f32 %v4099_v36, %v4011_v53  ;;  %v3121_v53 = vadd.f32 %v7650_v23, %v7649_v35 }
 0x3af   : > { %v4157_v4 = vadd.f32 %v4100_v24, %v3111_v27  ;;  %v4025_v21 = vpop.f32.mrf.mxu0 }
 0x3b0   : > { %v4026_v18 = vadd.f32 %v4025_v21, %v3936_v30  ;;  %v4418_v21 = vld [vmem:[%s5857_s15 + $0x18] sm:$0xff] }
 0x3b1   : > { %v4193_v3 = vadd.f32 %v7176_v44, %v4157_v4 }
 0x3b2   : > { %v3939_v55 = vpop.f32.mrf.mxu3 }
 0x3b3   : > { %v4225_v15 = vmax.f32 %v4193_v3, 0.0 }
 0x3b4   : > { %v4102_v10 = vpop.f32.mrf.mxu1 }
 0x3b5   : > { %v4249_v14 = vpack.c.bf16 %v4225_v15, %v4224_v49  ;;  %v4103_v31 = vadd.f32 %v4102_v10, %v4014_v58  ;;  %v4024_v10 = vadd.f32 %v4023_v51, %v3934_v7  ;;  %v7653_v51 = vld [vmem:[#allocation51_spill] sm:$0xff] }
 0x3b7   : > { %4369 = vmatmul.bf16.gmra.mxu2 %v4249_v14  ;;  %v4158_v17 = vadd.f32 %v4103_v31, %v7646_v59  ;;  %v4028_v38 = vpop.f32.mrf.mxu0 }
 0x3b8   : > { %v4029_v35 = vadd.f32 %v4028_v38, %v3939_v55 }
 0x3b9   : > { %v4194_v60 = vadd.f32 %v7176_v44, %v4158_v17 }
 0x3ba   : > { %v3941_v17 = vpop.f32.mrf.mxu3 }
 0x3bb   : > { %v4226_v25 = vmax.f32 %v4194_v60, 0.0 }
 0x3bc   : > { %v4104_v12 = vpop.f32.mrf.mxu1 }
 0x3bd   : > { %v4105_v1 = vadd.f32 %v4104_v12, %v4016_v28 }
 0x3bf   : > { %v4159_v11 = vadd.f32 %v4105_v1, %v3116_v19  ;;  %v4030_v59 = vpop.f32.mrf.mxu0  ;;  %v7651_v19 = vld [vmem:[#allocation48_spill] sm:$0xff] }
 0x3c1   : > { %v4195_v2 = vadd.f32 %v7176_v44, %v4159_v11 }
 0x3c3   : > { %v4227_v37 = vmax.f32 %v4195_v2, 0.0  ;;  %v7652_v2 = vld [vmem:[#allocation60_spill] sm:$0xff] }
 0x3c4   : > { %v4107_v5 = vpop.f32.mrf.mxu1  ;;  %v3126_v7 = vadd.f32 %v7653_v51, %v7652_v2 }
 0x3c5   : > { %v4250_v45 = vpack.c.bf16 %v4227_v37, %v4226_v25  ;;  %v4108_v20 = vadd.f32 %v4107_v5, %v4019_v46 }
 0x3c7   : > { %4374 = vmatmul.bf16.gmra.mxu2 %v4250_v45  ;;  %v4160_v33 = vadd.f32 %v4108_v20, %v7044_v63  ;;  %v4033_v30 = vpop.f32.mrf.mxu0 }
 0x3c9   : > { %v4196_v29 = vadd.f32 %v7176_v44, %v4160_v33 }
 0x3ca   : > { %v4335_v13 = vpop.f32.mrf.mxu2 }
 0x3cb   : > { %v4336_v9 = vadd.f32 %v7293_v6, %v4335_v13  ;;  %v4228_v3 = vmax.f32 %v4196_v29, 0.0 }
 0x3cc   : > { %v4109_v22 = vpop.f32.mrf.mxu1 }
 0x3cd   : > { %v4447_v41 = vadd.f32 %v4415_v61, %v4336_v9  ;;  %v4110_v36 = vadd.f32 %v4109_v22, %v4021_v54  ;;  %v3944_v9 = vpop.f32.mrf.mxu3 }
 0x3cf   : > { %v4479_v27 = vmax.f32 %v4447_v41, 0.0  ;;  %v4161_v24 = vadd.f32 %v4110_v36, %v3121_v53  ;;  %v4035_v38 = vpop.f32.mrf.mxu0 }
 0x3d1   : > { %4511 = vst [vmem:[%s7303_s20] sm:$0xff] %v4479_v27  ;;  %v4197_v63 = vadd.f32 %v7176_v44, %v4161_v24  ;;  %v4419_v27 = vld [vmem:[%s5857_s15 + $0x20] sm:$0xff]  ;;  %v4031_v24 = vadd.f32 %v4030_v59, %v3941_v17 }
 0x3d2   : > { %v4337_v4 = vpop.f32.mrf.mxu2 }
 0x3d3   : > { %v4229_v26 = vmax.f32 %v4197_v63, 0.0  ;;  %v4338_v49 = vadd.f32 %v7293_v6, %v4337_v4 }
 0x3d4   : > { %v4112_v15 = vpop.f32.mrf.mxu1 }
 0x3d5   : > { %v4448_v58 = vadd.f32 %v4416_v56, %v4338_v49  ;;  %v4251_v14 = vpack.c.bf16 %v4229_v26, %v4228_v3  ;;  %v4113_v28 = vadd.f32 %v4112_v15, %v4024_v10  ;;  %v7654_v3 = vld [vmem:[#allocation57_spill] sm:$0xff]  ;;  %v3946_v15 = vpop.f32.mrf.mxu3 }
 0x3d6   : > { %v3131_v26 = vadd.f32 %v7112_v8, %v7654_v3 }
 0x3d7   : > { %v4480_v31 = vmax.f32 %v4448_v58, 0.0  ;;  %4379 = vmatmul.bf16.gmra.mxu2 %v4251_v14  ;;  %v4162_v1 = vadd.f32 %v4113_v28, %v7651_v19 }
 0x3d9   : > { %4512 = vst [vmem:[%s7303_s20 + $0x8] sm:$0xff] %v4480_v31  ;;  %v4198_v5 = vadd.f32 %v7176_v44, %v4162_v1  ;;  %v4038_v1 = vpop.f32.mrf.mxu0 }
 0x3da   : > { %v4340_v12 = vpop.f32.mrf.mxu2 }
 0x3db   : > { %v4341_v60 = vadd.f32 %v7293_v6, %v4340_v12  ;;  %v4230_v61 = vmax.f32 %v4198_v5, 0.0 }
 0x3dc   : > { %v4114_v11 = vpop.f32.mrf.mxu1 }
 0x3dd   : > { %v4449_v25 = vadd.f32 %v4417_v62, %v4341_v60  ;;  %v4115_v37 = vadd.f32 %v4114_v11, %v4026_v18  ;;  %v4034_v62 = vadd.f32 %v4033_v30, %v3944_v9  ;;  %v3949_v2 = vpop.f32.mrf.mxu3 }
 0x3df   : > { %v4481_v46 = vmax.f32 %v4449_v25, 0.0  ;;  %v4163_v45 = vadd.f32 %v4115_v37, %v3126_v7  ;;  %v4421_v7 = vld [vmem:[%s5857_s15 + $0x30] sm:$0xff]  ;;  %v4036_v25 = vadd.f32 %v4035_v38, %v3946_v15 }
 0x3e1   : > { %4513 = vst [vmem:[%s7303_s20 + $0x10] sm:$0xff] %v4481_v46  ;;  %v4199_v20 = vadd.f32 %v7176_v44, %v4163_v45  ;;  %v3136_v45 = vadd.f32 %v7126_v52, %v7114_v39  ;;  %v4039_v52 = vadd.f32 %v4038_v1, %v3949_v2  ;;  %v4425_v2 = vld [vmem:[%s5857_s15 + $0x50] sm:$0xff] }
 0x3e2   : > { %v4342_v13 = vpop.f32.mrf.mxu2 }
 0x3e3   : > { %v4231_v54 = vmax.f32 %v4199_v20, 0.0  ;;  %v4343_v33 = vadd.f32 %v7293_v6, %v4342_v13 }
 0x3e4   : > { %v4117_v22 = vpop.f32.mrf.mxu1 }
 0x3e5   : > { %v4450_v23 = vadd.f32 %v4418_v21, %v4343_v33  ;;  %v4252_v53 = vpack.c.bf16 %v4231_v54, %v4230_v61  ;;  %v4118_v36 = vadd.f32 %v4117_v22, %v4029_v35  ;;  %v4040_v54 = vpop.f32.mrf.mxu0  ;;  %v3951_v9 = vpop.f32.mrf.mxu3  ;;  %v4422_v22 = vld [vmem:[%s5857_s15 + $0x38] sm:$0xff] }
 0x3e7   : > { %v4482_v41 = vmax.f32 %v4450_v23, 0.0  ;;  %4384 = vmatmul.bf16.gmra.mxu2 %v4252_v53  ;;  %v4164_v63 = vadd.f32 %v4118_v36, %v7103_v40  ;;  %v4420_v40 = vld [vmem:[%s5857_s15 + $0x28] sm:$0xff] }
 0x3e9   : > { %4514 = vst [vmem:[%s7303_s20 + $0x18] sm:$0xff] %v4482_v41  ;;  %v4200_v10 = vadd.f32 %v7176_v44, %v4164_v63  ;;  %v4423_v63 = vld [vmem:[%s5857_s15 + $0x40] sm:$0xff] }
 0x3ea   : > { %v4345_v29 = vpop.f32.mrf.mxu2 }
 0x3eb   : > { %v4346_v4 = vadd.f32 %v7293_v6, %v4345_v29  ;;  %v4232_v59 = vmax.f32 %v4200_v10, 0.0 }
 0x3ec   : > { %v4119_v56 = vpop.f32.mrf.mxu1 }
 0x3ed   : > { %v4451_v55 = vadd.f32 %v4419_v27, %v4346_v4  ;;  %v4120_v49 = vadd.f32 %v4119_v56, %v4031_v24  ;;  %v4043_v4 = vpop.f32.mrf.mxu0  ;;  %v4041_v56 = vadd.f32 %v4040_v54, %v3951_v9  ;;  %v3954_v38 = vpop.f32.mrf.mxu3 }
 0x3ef   : > { %v4483_v58 = vmax.f32 %v4451_v55, 0.0  ;;  %v4165_v14 = vadd.f32 %v4120_v49, %v3131_v26  ;;  %v3141_v49 = vadd.f32 %v7139_v16, %v7128_v57 }
 0x3f1   : > { %4515 = vst [vmem:[%s7303_s20 + $0x20] sm:$0xff] %v4483_v58  ;;  %v4201_v31 = vadd.f32 %v7176_v44, %v4165_v14 }
 0x3f2   : > { %v4347_v28 = vpop.f32.mrf.mxu2 }
 0x3f3   : > { %v4233_v17 = vmax.f32 %v4201_v31, 0.0  ;;  %v4348_v12 = vadd.f32 %v7293_v6, %v4347_v28 }
 0x3f4   : > { %v4122_v8 = vpop.f32.mrf.mxu1 }
 0x3f5   : > { %v4452_v18 = vadd.f32 %v4420_v40, %v4348_v12  ;;  %v4253_v19 = vpack.c.bf16 %v4233_v17, %v4232_v59  ;;  %v4123_v11 = vadd.f32 %v4122_v8, %v4034_v62  ;;  %v4044_v62 = vadd.f32 %v4043_v4, %v3954_v38 }
 0x3f7   : > { %v4484_v60 = vmax.f32 %v4452_v18, 0.0  ;;  %4389 = vmatmul.bf16.gmra.mxu2 %v4253_v19  ;;  %v4166_v37 = vadd.f32 %v4123_v11, %v7121_v50  ;;  %v4045_v18 = vpop.f32.mrf.mxu0  ;;  %v3956_v19 = vpop.f32.mrf.mxu3 }
 0x3f9   : > { %4516 = vst [vmem:[%s7303_s20 + $0x28] sm:$0xff] %v4484_v60  ;;  %v4202_v21 = vadd.f32 %v7176_v44, %v4166_v37 }
 0x3fa   : > { %v4350_v51 = vpop.f32.mrf.mxu2 }
 0x3fb   : > { %v4351_v5 = vadd.f32 %v7293_v6, %v4350_v51  ;;  %v4234_v35 = vmax.f32 %v4202_v21, 0.0  ;;  %v4046_v51 = vadd.f32 %v4045_v18, %v3956_v19  ;;  %v4431_v19 = vld [vmem:[%s5857_s15 + $0x80] sm:$0xff] }
 0x3fc   : > { %v4124_v46 = vpop.f32.mrf.mxu1 }
 0x3fd   : > { %v4453_v20 = vadd.f32 %v4421_v7, %v4351_v5  ;;  %v4125_v13 = vadd.f32 %v4124_v46, %v4036_v25  ;;  %v3146_v5 = vadd.f32 %v7153_v47, %v7141_v43 }
 0x3ff   : > { %v4485_v30 = vmax.f32 %v4453_v20, 0.0  ;;  %v4167_v61 = vadd.f32 %v4125_v13, %v3136_v45  ;;  %v3959_v20 = vpop.f32.mrf.mxu3 }
 0x401   : > { %4517 = vst [vmem:[%s7303_s20 + $0x30] sm:$0xff] %v4485_v30  ;;  %v4203_v33 = vadd.f32 %v7176_v44, %v4167_v61 }
 0x402   : > { %v4352_v50 = vpop.f32.mrf.mxu2 }
 0x403   : > { %v4235_v23 = vmax.f32 %v4203_v33, 0.0  ;;  %v4353_v53 = vadd.f32 %v7293_v6, %v4352_v50 }
 0x404   : > { %v4127_v39 = vpop.f32.mrf.mxu1 }
 0x405   : > { %v4454_v41 = vadd.f32 %v4422_v22, %v4353_v53  ;;  %v4254_v36 = vpack.c.bf16 %v4235_v23, %v4234_v35  ;;  %v4128_v27 = vadd.f32 %v4127_v39, %v4039_v52 }
 0x407   : > { %v4486_v29 = vmax.f32 %v4454_v41, 0.0  ;;  %4394 = vmatmul.bf16.gmra.mxu2 %v4254_v36  ;;  %v4168_v3 = vadd.f32 %v4128_v27, %v7134_v42  ;;  %v4424_v42 = vld [vmem:[%s5857_s15 + $0x48] sm:$0xff]  ;;  %v3961_v52 = vpop.f32.mrf.mxu3 }
 0x409   : > { %4518 = vst [vmem:[%s7303_s20 + $0x38] sm:$0xff] %v4486_v29  ;;  %v4204_v58 = vadd.f32 %v7176_v44, %v4168_v3  ;;  %v4048_v13 = vpop.f32.mrf.mxu0  ;;  %v4427_v29 = vld [vmem:[%s5857_s15 + $0x60] sm:$0xff] }
 0x40a   : > { %v4355_v24 = vpop.f32.mrf.mxu2  ;;  %v4049_v50 = vadd.f32 %v4048_v13, %v3959_v20 }
 0x40b   : > { %v4356_v26 = vadd.f32 %v7293_v6, %v4355_v24  ;;  %v4236_v59 = vmax.f32 %v4204_v58, 0.0 }
 0x40c   : > { %v4129_v55 = vpop.f32.mrf.mxu1 }
 0x40d   : > { %v4455_v15 = vadd.f32 %v4423_v63, %v4356_v26  ;;  %v4130_v10 = vadd.f32 %v4129_v55, %v4041_v56  ;;  %v3151_v56 = vadd.f32 %v7288_v0, %v7155_v32 }
 0x40f   : > { %v4487_v14 = vmax.f32 %v4455_v15, 0.0  ;;  %v4169_v31 = vadd.f32 %v4130_v10, %v3141_v49 }
 0x411   : > { %4519 = vst [vmem:[%s7303_s20 + $0x40] sm:$0xff] %v4487_v14  ;;  %v4205_v28 = vadd.f32 %v7176_v44, %v4169_v31  ;;  %v4050_v41 = vpop.f32.mrf.mxu0 }
 0x412   : > { %v4357_v40 = vpop.f32.mrf.mxu2  ;;  %v4051_v27 = vadd.f32 %v4050_v41, %v3961_v52  ;;  %v4437_v41 = vld [vmem:[%s5857_s15 + $0xb0] sm:$0xff] }
 0x413   : > { %v4237_v17 = vmax.f32 %v4205_v28, 0.0  ;;  %v4358_v12 = vadd.f32 %v7293_v6, %v4357_v40 }
 0x414   : > { %v4132_v8 = vpop.f32.mrf.mxu1 }
 0x415   : > { %v4456_v57 = vadd.f32 %v4424_v42, %v4358_v12  ;;  %v4255_v16 = vpack.c.bf16 %v4237_v17, %v4236_v59  ;;  %v4133_v60 = vadd.f32 %v4132_v8, %v4044_v62  ;;  %v4429_v42 = vld [vmem:[%s5857_s15 + $0x70] sm:$0xff]  ;;  %v4430_v8 = vld [vmem:[%s5857_s15 + $0x78] sm:$0xff] }
 0x417   : > { %v4488_v1 = vmax.f32 %v4456_v57, 0.0  ;;  %4399 = vmatmul.bf16.gmra.mxu2 %v4255_v16  ;;  %v4170_v7 = vadd.f32 %v4133_v60, %v7147_v48  ;;  %v4426_v48 = vld [vmem:[%s5857_s15 + $0x58] sm:$0xff] }
 0x419   : > { %4520 = vst [vmem:[%s7303_s20 + $0x48] sm:$0xff] %v4488_v1  ;;  %v4206_v21 = vadd.f32 %v7176_v44, %v4170_v7 }
 0x41a   : > { %v4360_v11 = vpop.f32.mrf.mxu2 }
 0x41b   : > { %v4361_v25 = vadd.f32 %v7293_v6, %v4360_v11  ;;  %v4238_v9 = vmax.f32 %v4206_v21, 0.0 }
 0x41c   : > { %v4134_v37 = vpop.f32.mrf.mxu1 }
 0x41d   : > { %v4457_v46 = vadd.f32 %v4425_v2, %v4361_v25  ;;  %v4135_v45 = vadd.f32 %v4134_v37, %v4046_v51  ;;  %v4432_v51 = vld [vmem:[%s5857_s15 + $0x88] sm:$0xff] }
 0x41f   : > { %v4489_v30 = vmax.f32 %v4457_v46, 0.0  ;;  %v4171_v61 = vadd.f32 %v4135_v45, %v3146_v5  ;;  %v4433_v46 = vld [vmem:[%s5857_s15 + $0x90] sm:$0xff] }
 0x421   : > { %4521 = vst [vmem:[%s7303_s20 + $0x50] sm:$0xff] %v4489_v30  ;;  %v4207_v54 = vadd.f32 %v7176_v44, %v4171_v61  ;;  %v4434_v30 = vld [vmem:[%s5857_s15 + $0x98] sm:$0xff] }
 0x422   : > { %v4362_v33 = vpop.f32.mrf.mxu2 }
 0x423   : > { %v4239_v22 = vmax.f32 %v4207_v54, 0.0  ;;  %v4363_v43 = vadd.f32 %v7293_v6, %v4362_v33 }
 0x424   : > { %v4137_v47 = vpop.f32.mrf.mxu1 }
 0x425   : > { %v4458_v35 = vadd.f32 %v4426_v48, %v4363_v43  ;;  %v4256_v23 = vpack.c.bf16 %v4239_v22, %v4238_v9  ;;  %v4138_v39 = vadd.f32 %v4137_v47, %v4049_v50  ;;  %v4435_v9 = vld [vmem:[%s5857_s15 + $0xa0] sm:$0xff] }
 0x427   : > { %v4490_v53 = vmax.f32 %v4458_v35, 0.0  ;;  %4404 = vmatmul.bf16.gmra.mxu2 %v4256_v23  ;;  %v4172_v24 = vadd.f32 %v4138_v39, %v7164_v34  ;;  %v4428_v34 = vld [vmem:[%s5857_s15 + $0x68] sm:$0xff] }
 0x428   : > { %v4436_v35 = vld [vmem:[%s5857_s15 + $0xa8] sm:$0xff] }
 0x429   : > { %4522 = vst [vmem:[%s7303_s20 + $0x58] sm:$0xff] %v4490_v53  ;;  %v4208_v38 = vadd.f32 %v7176_v44, %v4172_v24 }
 0x42a   : > { %v4365_v36 = vpop.f32.mrf.mxu2 }
 0x42b   : > { %v4366_v63 = vadd.f32 %v7293_v6, %v4365_v36  ;;  %v4240_v58 = vmax.f32 %v4208_v38, 0.0  ;;  %v4439_v38 = vld [vmem:[%s5857_s15 + $0xc0] sm:$0xff] }
 0x42c   : > { %v4139_v4 = vpop.f32.mrf.mxu1 }
 0x42d   : > { %v4459_v3 = vadd.f32 %v4427_v29, %v4366_v63  ;;  %v4140_v26 = vadd.f32 %v4139_v4, %v4051_v27  ;;  %v4438_v63 = vld [vmem:[%s5857_s15 + $0xb8] sm:$0xff] }
 0x42f   : > { %v4491_v55 = vmax.f32 %v4459_v3, 0.0  ;;  %v4173_v49 = vadd.f32 %v4140_v26, %v3151_v56 }
 0x431   : > { %4523 = vst [vmem:[%s7303_s20 + $0x60] sm:$0xff] %v4491_v55  ;;  %v4209_v15 = vadd.f32 %v7176_v44, %v4173_v49 }
 0x432   : > { %v4367_v10 = vpop.f32.mrf.mxu2 }
 0x433   : > { %v4241_v14 = vmax.f32 %v4209_v15, 0.0  ;;  %v4368_v31 = vadd.f32 %v7293_v6, %v4367_v10 }
 0x435   : > { %v4460_v32 = vadd.f32 %v4428_v34, %v4368_v31  ;;  %v4257_v0 = vpack.c.bf16 %v4241_v14, %v4240_v58  ;;  %v4440_v34 = vld [vmem:[%s5857_s15 + $0xc8] sm:$0xff] }
 0x437   : > { %v4492_v28 = vmax.f32 %v4460_v32, 0.0  ;;  %4409 = vmatmul.bf16.gmra.mxu2 %v4257_v0  ;;  %v4441_v0 = vld [vmem:[%s5857_s15 + $0xd0] sm:$0xff] }
 0x439   : > { %4524 = vst [vmem:[%s7303_s20 + $0x68] sm:$0xff] %v4492_v28 }
 0x43a   : > { %v4370_v40 = vpop.f32.mrf.mxu2 }
 0x43b   : > { %v4371_v44 = vadd.f32 %v7293_v6, %v4370_v40 }
 0x43d   : > { %v4461_v59 = vadd.f32 %v4429_v42, %v4371_v44 }
 0x43f   : > { %v4493_v17 = vmax.f32 %v4461_v59, 0.0  ;;  %v4442_v59 = vld [vmem:[%s5857_s15 + $0xd8] sm:$0xff] }
 0x441   : > { %4525 = vst [vmem:[%s7303_s20 + $0x70] sm:$0xff] %v4493_v17 }
 0x442   : > { %v4372_v12 = vpop.f32.mrf.mxu2 }
 0x443   : > { %v4373_v62 = vadd.f32 %v7293_v6, %v4372_v12 }
 0x445   : > { %v4462_v57 = vadd.f32 %v4430_v8, %v4373_v62 }
 0x447   : > { %v4494_v16 = vmax.f32 %v4462_v57, 0.0  ;;  %v4443_v57 = vld [vmem:[%s5857_s15 + $0xe0] sm:$0xff] }
 0x449   : > { %4526 = vst [vmem:[%s7303_s20 + $0x78] sm:$0xff] %v4494_v16 }
 0x44a   : > { %v4375_v18 = vpop.f32.mrf.mxu2 }
 0x44b   : > { %v4376_v1 = vadd.f32 %v7293_v6, %v4375_v18 }
 0x44d   : > { %v4463_v60 = vadd.f32 %v4431_v19, %v4376_v1 }
 0x44f   : > { %v4495_v11 = vmax.f32 %v4463_v60, 0.0  ;;  %v4444_v60 = vld [vmem:[%s5857_s15 + $0xe8] sm:$0xff] }
 0x451   : > { %4527 = vst [vmem:[%s7303_s20 + $0x80] sm:$0xff] %v4495_v11 }
 0x452   : > { %v4377_v2 = vpop.f32.mrf.mxu2 }
 0x453   : > { %v4378_v7 = vadd.f32 %v7293_v6, %v4377_v2 }
 0x455   : > { %v4464_v25 = vadd.f32 %v4432_v51, %v4378_v7 }
 0x457   : > { %v4496_v37 = vmax.f32 %v4464_v25, 0.0  ;;  %v4445_v25 = vld [vmem:[%s5857_s15 + $0xf0] sm:$0xff] }
 0x459   : > { %4528 = vst [vmem:[%s7303_s20 + $0x88] sm:$0xff] %v4496_v37 }
 0x45a   : > { %v4380_v5 = vpop.f32.mrf.mxu2 }
 0x45b   : > { %v4381_v45 = vadd.f32 %v7293_v6, %v4380_v5 }
 0x45d   : > { %v4465_v20 = vadd.f32 %v4433_v46, %v4381_v45 }
 0x45f   : > { %v4497_v13 = vmax.f32 %v4465_v20, 0.0  ;;  %v4446_v20 = vld [vmem:[%s5857_s15 + $0xf8] sm:$0xff]  ;;  %s5628_s15 = scalar_lea.hbm %s7471_s7, 512 }
 0x460   : > { %p5630_p9 = scmp.lt.s32.totalorder %s5628_s15, %s5624_s10 }
 0x461   : > { %4529 = vst [vmem:[%s7303_s20 + $0x90] sm:$0xff] %v4497_v13 }
 0x462   : > { %v4382_v21 = vpop.f32.mrf.mxu2  ;;  %p5631_p2 = por %p5630_p9, %p5629_p11 }
 0x463   : > { %v4383_v61 = vadd.f32 %v7293_v6, %v4382_v21 }
 0x464   : > { %p5632_p10 = pnand %p5631_p2, %p5627_p8 }
 0x465   : > { %v4466_v54 = vadd.f32 %v4434_v30, %v4383_v61 }
 0x467   : > { %v4498_v33 = vmax.f32 %v4466_v54, 0.0 }
 0x469   : > { %4530 = vst [vmem:[%s7303_s20 + $0x98] sm:$0xff] %v4498_v33 }
 0x46a   : > { %v4385_v48 = vpop.f32.mrf.mxu2 }
 0x46b   : > { %v4386_v50 = vadd.f32 %v7293_v6, %v4385_v48 }
 0x46d   : > { %v4467_v22 = vadd.f32 %v4435_v9, %v4386_v50 }
 0x46f   : > { %v4499_v43 = vmax.f32 %v4467_v22, 0.0 }
 0x471   : > { %4531 = vst [vmem:[%s7303_s20 + $0xa0] sm:$0xff] %v4499_v43 }
 0x472   : > { %v4387_v47 = vpop.f32.mrf.mxu2 }
 0x473   : > { %v4388_v23 = vadd.f32 %v7293_v6, %v4387_v47 }
 0x475   : > { %v4468_v53 = vadd.f32 %v4436_v35, %v4388_v23 }
 0x477   : > { %v4500_v39 = vmax.f32 %v4468_v53, 0.0 }
 0x479   : > { %4532 = vst [vmem:[%s7303_s20 + $0xa8] sm:$0xff] %v4500_v39 }
 0x47a   : > { %v4390_v52 = vpop.f32.mrf.mxu2 }
 0x47b   : > { %v4391_v36 = vadd.f32 %v7293_v6, %v4390_v52 }
 0x47d   : > { %v4469_v29 = vadd.f32 %v4437_v41, %v4391_v36 }
 0x47f   : > { %v4501_v27 = vmax.f32 %v4469_v29, 0.0 }
 0x481   : > { %4533 = vst [vmem:[%s7303_s20 + $0xb0] sm:$0xff] %v4501_v27 }
 0x482   : > { %v4392_v24 = vpop.f32.mrf.mxu2 }
 0x483   : > { %v4393_v4 = vadd.f32 %v7293_v6, %v4392_v24 }
 0x485   : > { %v4470_v56 = vadd.f32 %v4438_v63, %v4393_v4 }
 0x487   : > { %v4502_v3 = vmax.f32 %v4470_v56, 0.0 }
 0x489   : > { %4534 = vst [vmem:[%s7303_s20 + $0xb8] sm:$0xff] %v4502_v3 }
 0x48a   : > { %v4395_v26 = vpop.f32.mrf.mxu2 }
 0x48b   : > { %v4396_v55 = vadd.f32 %v7293_v6, %v4395_v26 }
 0x48d   : > { %v4471_v49 = vadd.f32 %v4439_v38, %v4396_v55 }
 0x48f   : > { %v4503_v15 = vmax.f32 %v4471_v49, 0.0 }
 0x491   : > { %4535 = vst [vmem:[%s7303_s20 + $0xc0] sm:$0xff] %v4503_v15 }
 0x492   : > { %v4397_v10 = vpop.f32.mrf.mxu2 }
 0x493   : > { %v4398_v58 = vadd.f32 %v7293_v6, %v4397_v10 }
 0x495   : > { %v4472_v14 = vadd.f32 %v4440_v34, %v4398_v58 }
 0x497   : > { %v4504_v31 = vmax.f32 %v4472_v14, 0.0 }
 0x499   : > { %4536 = vst [vmem:[%s7303_s20 + $0xc8] sm:$0xff] %v4504_v31 }
 0x49a   : > { %v4400_v32 = vpop.f32.mrf.mxu2 }
 0x49b   : > { %v4401_v28 = vadd.f32 %v7293_v6, %v4400_v32 }
 0x49d   : > { %v4473_v40 = vadd.f32 %v4441_v0, %v4401_v28 }
 0x49f   : > { %v4505_v42 = vmax.f32 %v4473_v40, 0.0 }
 0x4a1   : > { %4537 = vst [vmem:[%s7303_s20 + $0xd0] sm:$0xff] %v4505_v42 }
 0x4a2   : > { %v4402_v44 = vpop.f32.mrf.mxu2 }
 0x4a3   : > { %v4403_v17 = vadd.f32 %v7293_v6, %v4402_v44 }
 0x4a5   : > { %v4474_v12 = vadd.f32 %v4442_v59, %v4403_v17 }
 0x4a7   : > { %v4506_v8 = vmax.f32 %v4474_v12, 0.0 }
 0x4a9   : > { %4538 = vst [vmem:[%s7303_s20 + $0xd8] sm:$0xff] %v4506_v8 }
 0x4aa   : > { %v4405_v62 = vpop.f32.mrf.mxu2 }
 0x4ab   : > { %v4406_v16 = vadd.f32 %v7293_v6, %v4405_v62 }
 0x4ad   : > { %v4475_v18 = vadd.f32 %v4443_v57, %v4406_v16 }
 0x4af   : > { %v4507_v19 = vmax.f32 %v4475_v18, 0.0 }
 0x4b1   : > { %4539 = vst [vmem:[%s7303_s20 + $0xe0] sm:$0xff] %v4507_v19 }
 0x4b2   : > { %v4407_v1 = vpop.f32.mrf.mxu2 }
 0x4b3   : > { %v4408_v11 = vadd.f32 %v7293_v6, %v4407_v1 }
 0x4b5   : > { %v4476_v2 = vadd.f32 %v4444_v60, %v4408_v11 }
 0x4b7   : > { %v4508_v51 = vmax.f32 %v4476_v2, 0.0 }
 0x4b9   : > { %4540 = vst [vmem:[%s7303_s20 + $0xe8] sm:$0xff] %v4508_v51 }
 0x4ba   : > { %v4410_v7 = vpop.f32.mrf.mxu2 }
 0x4bb   : > { %v4411_v37 = vadd.f32 %v7293_v6, %v4410_v7 }
 0x4bd   : > { %v4477_v5 = vadd.f32 %v4445_v25, %v4411_v37 }
 0x4bf   : > { %v4509_v46 = vmax.f32 %v4477_v5, 0.0 }
 0x4c1   : > { %4541 = vst [vmem:[%s7303_s20 + $0xf0] sm:$0xff] %v4509_v46 }
 0x4c2   : > { %v4412_v45 = vpop.f32.mrf.mxu2 }
 0x4c3   : > { %v4413_v13 = vadd.f32 %v7293_v6, %v4412_v45 }
 0x4c5   : > { %v4478_v21 = vadd.f32 %v4446_v20, %v4413_v13 }
 0x4c7   : > { %v4510_v30 = vmax.f32 %v4478_v21, 0.0 }
 0x4c9   : > { %4542 = vst [vmem:[%s7303_s20 + $0xf8] sm:$0xff] %v4510_v30 }
 0x4ca   : > { %5635 = shalt.err (!%p5632_p10)
}
 0x4cb   : > { %s5698_s22 = smov 128   ;;  %s5699_s20 = smov 8  }
 0x4cc   : > { %5351 = dma.vmem_to_hbm [thread:$0]  (%p5823_p7), %s4557_s30, 4096, %s4559_s12, %s4544_s29, %s5698_s22, %s5698_s22, %s5699_s20  }
 0x4cd PF: > { %s4573_s21 = sand.u32 1, %s5676_s24   ;;  %p7655_p12 = scmp.ge.s32.totalorder %s5688_s27, 2 }
 0x4ce   : > { %s4574_s9 = scalar_lea.sflag [#allocation5], %s4573_s21 }
 0x4cf   : > { %p5368_p13 = pnand %p7655_p12, %p5775_p6 }
 0x4d1   : > { %p5369_p0 = pneg %p5368_p13 }
 0x4d3   : > { %5665 = dma.done.wait (%p5369_p0), %s4574_s9, 4096  }
 0x4d4   : > { %5667 = vsyncadd (%p5369_p0), %s4574_s9, 4294963200  ;;  %p22_p3 = scmp.ge.s32.totalorder %s5807_s11, 4   ;;  %s7656_s24 = smov %s5680_s25 }
 0x4d5   : > { %s7657_s25 = smov %s5684_s26  ;;  %s7658_s26 = smov %s5819_s17 }
 0x4d6   : > { %s7659_s27 = smov %s5807_s11  ;;  %24 = sbr.rel (!%p22_p3) target bundleno = 9 (0x9), region = 110 }
 0x4db   :  { %4580 = vsyncpa [#allocation4], 1 }
 0x4dc   :  { %4582 = vsyncpa [#allocation4 + $0x1], 1 }
 0x4dd   :  { %4583 = vsyncpa [#allocation7], 1 }
 0x4de   :  { %4584 = vsyncpa [#allocation10], 1 }
 0x4df   :  { %4585 = vsyncpa [#allocation5], 1 }
 0x4e0   :  { %4587 = vsyncpa [#allocation5 + $0x1], 1 }

</bundles_post_ra>
